<compile_context>
chip_gen: v6e
topology: v6e:2x2x1
jax: 0.10.0
libtpu: 0.0.40
codegen_flags: <defaults>
</compile_context>

<pallas_src>
import functools
import math

import jax
import jax.numpy as jnp
from jax.experimental import pallas as pl
from jax.experimental.pallas import tpu as pltpu


_PARAM_ORDER = (
    "ln1_g", "ln1_b",
    "wqkv", "bqkv", "wo", "bo",
    "ln2_g", "ln2_b",
    "wf1", "bf1", "wf2", "bf2",
)


def _layernorm_f32(v, g, b, eps=1e-5):
    # Two-pass (centered) variance in f32: avoids the E[x^2]-E[x]^2 cancellation of the
    # one-pass form when |mean| >> std.
    mu = jnp.mean(v, axis=-1, keepdims=True)
    c = v - mu
    var = jnp.mean(c * c, axis=-1, keepdims=True)
    return c * jax.lax.rsqrt(var + eps) * g + b


def _gelu_exact(x):
    # PyTorch nn.GELU() default (exact, erf based).
    # TODO(synk): switch to the tanh approximation (EUP slot) if profiling shows VALU
    # saturation and bit-parity with nn.GELU() is not required.
    return 0.5 * x * (1.0 + jax.lax.erf(x * (1.0 / math.sqrt(2.0))))


def encoder_block_kernel(
    x_ref,
    ln1_g_ref, ln1_b_ref,
    wqkv_ref, bqkv_ref, wo_ref, bo_ref,
    ln2_g_ref, ln2_b_ref,
    wf1_ref, bf1_ref, wf2_ref, bf2_ref,
    o_ref,
    *, num_heads, head_dim, block_b, seq_len,
):
    emb = num_heads * head_dim
    m_rows = block_b * seq_len
    bh = block_b * num_heads
    # NOTE: the reference module scales scores by 1/sqrt(emb_size), not 1/sqrt(head_dim).
    inv_scale = jnp.float32(1.0 / math.sqrt(float(emb)))

    # (Bt, N, E) -> (Bt*N, E): leading-dim collapse only (lane dim untouched).
    x = x_ref[...].reshape(m_rows, emb).astype(jnp.float32)

    # ---------------- attention block: x + Dropout(MHA(LN1(x))) ----------------
    h1 = _layernorm_f32(x, ln1_g_ref[...], ln1_b_ref[...])

    # Fused QKV projection: one wide bf16 MXU matmul (K = E, 3E output lanes), f32 acc.
    qkv = jnp.dot(h1.astype(jnp.bfloat16), wqkv_ref[...],
                  preferred_element_type=jnp.float32) + bqkv_ref[...]

    # Lane-tile-aligned q/k/v splits (offsets 0, E, 2E are multiples of 128 when E is).
    # 1/sqrt(E) is folded into q once (cheaper than scaling the (N, N) scores).
    q = (qkv[:, :emb] * inv_scale).astype(jnp.bfloat16)
    k = qkv[:, emb:2 * emb].astype(jnp.bfloat16)
    v = qkv[:, 2 * emb:].astype(jnp.bfloat16)

    def split_heads(t):
        # (M, E) -> (Bt*H, N, d): static per-head lane slices stacked along a new leading
        # (batch) dim so the attention contractions run as ONE batched einsum per step.
        # TODO(synk): replace the per-head slices with a single (b,n,h,d)->(b,h,n,d)
        # relayout (pltpu.einshape) once that transpose pattern is supported in-kernel.
        parts = [t[:, h * head_dim:(h + 1) * head_dim].reshape(block_b, seq_len, head_dim)
                 for h in range(num_heads)]
        return jnp.stack(parts, axis=1).reshape(bh, seq_len, head_dim)

    q_h, k_h, v_h = split_heads(q), split_heads(k), split_heads(v)

    # Batched over (Bt*H): one QK^T and one AV contraction per grid step.
    s = jnp.einsum('bnd,bmd->bnm', q_h, k_h,
                   preferred_element_type=jnp.float32)            # (Bt*H, N, N) f32
    s = s - jnp.max(s, axis=-1, keepdims=True)
    p = jnp.exp(s)
    p = p * (1.0 / jnp.sum(p, axis=-1, keepdims=True))            # exact normalization
    # TODO(synk): attention dropout (self.att_drop) omitted -> eval-mode identity.
    o_heads = jnp.einsum('bnm,bmd->bnd', p.astype(jnp.bfloat16), v_h,
                         preferred_element_type=jnp.float32)      # (Bt*H, N, d) f32

    # Re-join heads to (M, E) (per-head picks on a major dim are free, one lane concat),
    # then a single K=E output projection instead of H folded K=d matmuls.
    o_heads = o_heads.reshape(block_b, num_heads, seq_len, head_dim)
    ctx = jnp.concatenate(
        [o_heads[:, h].reshape(m_rows, head_dim) for h in range(num_heads)], axis=-1)
    attn = jnp.dot(ctx.astype(jnp.bfloat16), wo_ref[...],
                   preferred_element_type=jnp.float32) + bo_ref[...]

    # TODO(synk): for long sequences, tile the kv axis / use an online softmax instead of
    # materializing the full (Bt*H, N, N) score tensor (first to bite on v7x's 64 MiB).
    x = x + attn                      # residual; post-MHA dropout is identity in eval

    # ---------------- feed-forward block: x + Dropout(FFN(LN2(x))) ----------------
    h2 = _layernorm_f32(x, ln2_g_ref[...], ln2_b_ref[...])
    ff = jnp.dot(h2.astype(jnp.bfloat16), wf1_ref[...],
                 preferred_element_type=jnp.float32) + bf1_ref[...]
    ff = _gelu_exact(ff)
    # TODO(synk): FFN-internal dropout omitted -> eval-mode identity.
    ff = jnp.dot(ff.astype(jnp.bfloat16), wf2_ref[...],
                 preferred_element_type=jnp.float32) + bf2_ref[...]
    # TODO(synk): at production E, K-tile this FFN (chunk the 4E hidden in 128-col pieces)
    # to cap the f32 hidden's VMEM footprint on v7x.

    o_ref[...] = (x + ff).reshape(block_b, seq_len, emb).astype(o_ref.dtype)


def pack_params(params):
    """One-time packing of the parameter dict for the kernel.

    Fuses the Q/K/V projection weights into a single (E, 3E) matrix and casts matmul
    weights to bf16 (accumulation is f32 inside the kernel).  Hoisted out of the per-call
    wrapper so the concatenate / casts do not re-touch every weight in HBM per call.
    """
    f32, bf16 = jnp.float32, jnp.bfloat16
    return {
        "ln1_g": params["ln1_g"].astype(f32), "ln1_b": params["ln1_b"].astype(f32),
        "wqkv": jnp.concatenate(
            [params["wq"], params["wk"], params["wv"]], axis=1).astype(bf16),
        "bqkv": jnp.concatenate(
            [params["bq"], params["bk"], params["bv"]], axis=1).astype(f32),
        "wo": params["wo"].astype(bf16), "bo": params["bo"].astype(f32),
        "ln2_g": params["ln2_g"].astype(f32), "ln2_b": params["ln2_b"].astype(f32),
        "wf1": params["wf1"].astype(bf16), "bf1": params["bf1"].astype(f32),
        "wf2": params["wf2"].astype(bf16), "bf2": params["bf2"].astype(f32),
    }


def _derive_vmem_limit(block_b, seq_len, emb, hidden, num_heads, packed):
    """Scoped-VMEM budget derived from the actual buffer sizes, clamped per generation."""
    f32 = 4
    m = block_b * seq_len
    io_tiles = 2 * 2 * (block_b * seq_len * emb * f32)        # double-buffered in + out
    weights = 2 * sum(int(a.size) * a.dtype.itemsize for a in packed.values())
    acts = f32 * m * (4 * emb + 3 * emb + hidden)             # residuals/LN/qkv/ffn hidden
    scores = 2 * f32 * block_b * num_heads * seq_len * seq_len
    need = 2 * (io_tiles + weights + acts + scores) + (8 << 20)   # 2x headroom + slack
    try:
        cap = int(pltpu.get_tpu_info().vmem_capacity_bytes)   # 128 MiB v5e/v6e, 64 MiB v7x
    except Exception:
        cap = 64 << 20                                        # conservative default
    return int(max(32 << 20, min(need, int(cap * 0.9))))


@functools.partial(jax.jit, static_argnames=("num_heads", "block_b"))
def transformer_encoder_block(x, packed_params, *, num_heads, block_b=None):
    """x: (B, N, E) float32; packed_params: output of pack_params()."""
    B, N, E = x.shape
    assert E % num_heads == 0
    head_dim = E // num_heads

    if block_b is None:
        # Largest batch tile that still leaves >= 2 grid points so both v7x TensorCores
        # get work under "parallel" semantics, while lifting m_rows = block_b*N toward
        # the 128/256-row MXU.  On v5e/v6e (1 TC) block_b = B (a 1-point grid) is fine too.
        block_b = max((d for d in range(1, B + 1) if B % d == 0 and B // d >= 2),
                      default=B)
    if B % block_b != 0:
        block_b = 1

    param_list = [packed_params[k] for k in _PARAM_ORDER]
    hidden = packed_params["wf1"].shape[1]

    def const_spec(shape):
        nd = len(shape)
        # Constant-index weight/bias blocks: resident across the grid.
        # TODO(synk): at production E on v7x, single-buffer these resident blocks
        # (pipeline_mode=pl.Buffered(1)) to halve their VMEM footprint.
        return pl.BlockSpec(shape, lambda b, _nd=nd: (0,) * _nd)

    in_specs = [pl.BlockSpec((block_b, N, E), lambda b: (b, 0, 0))]
    in_specs += [const_spec(p.shape) for p in param_list]

    kernel = functools.partial(
        encoder_block_kernel,
        num_heads=num_heads, head_dim=head_dim, block_b=block_b, seq_len=N,
    )

    # TODO(synk): accept/emit bf16 activations to halve per-step HBM traffic if the
    # surrounding model tolerates it (f32 kept here for parity with the PyTorch module).
    return pl.pallas_call(
        kernel,
        out_shape=jax.ShapeDtypeStruct((B, N, E), x.dtype),
        grid_spec=pltpu.PrefetchScalarGridSpec(
            num_scalar_prefetch=0,
            grid=(B // block_b,),
            in_specs=in_specs,
            out_specs=pl.BlockSpec((block_b, N, E), lambda b: (b, 0, 0)),
        ),
        compiler_params=pltpu.CompilerParams(
            dimension_semantics=("parallel",),
            vmem_limit_bytes=_derive_vmem_limit(block_b, N, E, hidden, num_heads,
                                                packed_params),
        ),
    )(x, *param_list)


def init_params(key, emb_size, expansion):
    ks = jax.random.split(key, 12)
    scale = 0.05

    def lin(kw, kb, din, dout):
        w = jax.random.normal(kw, (din, dout), jnp.float32) * scale
        b = jax.random.normal(kb, (1, dout), jnp.float32) * scale
        return w, b

    wq, bq = lin(ks[0], ks[1], emb_size, emb_size)
    wk, bk = lin(ks[2], ks[3], emb_size, emb_size)
    wv, bv = lin(ks[4], ks[5], emb_size, emb_size)
    wo, bo = lin(ks[6], ks[7], emb_size, emb_size)
    wf1, bf1 = lin(ks[8], ks[9], emb_size, expansion * emb_size)
    wf2, bf2 = lin(ks[10], ks[11], expansion * emb_size, emb_size)

    return {
        "ln1_g": jnp.ones((1, emb_size), jnp.float32),
        "ln1_b": jnp.zeros((1, emb_size), jnp.float32),
        "wq": wq, "bq": bq, "wk": wk, "bk": bk, "wv": wv, "bv": bv,
        "wo": wo, "bo": bo,
        "ln2_g": jnp.ones((1, emb_size), jnp.float32),
        "ln2_b": jnp.zeros((1, emb_size), jnp.float32),
        "wf1": wf1, "bf1": bf1, "wf2": wf2, "bf2": bf2,
    }


if __name__ == "__main__":
    B, N, E = 8, 32, 128     # batch, seq, emb_size (E lane-dense: multiple of 128)
    NUM_HEADS = 4            # emb_size must divide by num_heads
    EXPANSION = 4
    BLOCK_B = 4              # m_rows = 128 rows per grid step, grid = 2 "parallel" points

    key = jax.random.PRNGKey(0)
    kx, kp = jax.random.split(key)
    x = jax.random.normal(kx, (B, N, E), jnp.float32)
    params = init_params(kp, E, EXPANSION)
    packed = pack_params(params)          # one-time QKV fusion + bf16 weight casts

    out = transformer_encoder_block(x, packed, num_heads=NUM_HEADS, block_b=BLOCK_B)
    jax.block_until_ready(out)
    assert out.shape == (B, N, E) and out.dtype == jnp.float32
    print("KERNEL_OK")
</pallas_src>

<mosaic_0001>
module attributes {stable_mosaic.version = 11 : i64} {
  func.func @encoder_block_kernel(%arg0: i32, %arg1: memref<4x32x128xf32, #tpu.memory_space<vmem>>, %arg2: memref<1x128xf32, #tpu.memory_space<vmem>>, %arg3: memref<1x128xf32, #tpu.memory_space<vmem>>, %arg4: memref<128x384xbf16, #tpu.memory_space<vmem>>, %arg5: memref<1x384xf32, #tpu.memory_space<vmem>>, %arg6: memref<128x128xbf16, #tpu.memory_space<vmem>>, %arg7: memref<1x128xf32, #tpu.memory_space<vmem>>, %arg8: memref<1x128xf32, #tpu.memory_space<vmem>>, %arg9: memref<1x128xf32, #tpu.memory_space<vmem>>, %arg10: memref<128x512xbf16, #tpu.memory_space<vmem>>, %arg11: memref<1x512xf32, #tpu.memory_space<vmem>>, %arg12: memref<512x128xbf16, #tpu.memory_space<vmem>>, %arg13: memref<1x128xf32, #tpu.memory_space<vmem>>, %arg14: memref<4x32x128xf32, #tpu.memory_space<vmem>>) attributes {dimension_semantics = [#tpu.dimension_semantics<parallel>], iteration_bounds = array<i64: 2>, scalar_prefetch = 0 : i64, scratch_operands = 0 : i64, tpu.core_type = #tpu.core_type<tc>, window_params = [{transform_indices = @transform_0, window_bounds = array<i64: 4, 32, 128>}, {pipeline_mode = #tpu.pipeline_mode<synchronous>, transform_indices = @transform_1, window_bounds = array<i64: 1, 128>}, {pipeline_mode = #tpu.pipeline_mode<synchronous>, transform_indices = @transform_2, window_bounds = array<i64: 1, 128>}, {pipeline_mode = #tpu.pipeline_mode<synchronous>, transform_indices = @transform_3, window_bounds = array<i64: 128, 384>}, {pipeline_mode = #tpu.pipeline_mode<synchronous>, transform_indices = @transform_4, window_bounds = array<i64: 1, 384>}, {pipeline_mode = #tpu.pipeline_mode<synchronous>, transform_indices = @transform_5, window_bounds = array<i64: 128, 128>}, {pipeline_mode = #tpu.pipeline_mode<synchronous>, transform_indices = @transform_6, window_bounds = array<i64: 1, 128>}, {pipeline_mode = #tpu.pipeline_mode<synchronous>, transform_indices = @transform_7, window_bounds = array<i64: 1, 128>}, {pipeline_mode = #tpu.pipeline_mode<synchronous>, transform_indices = @transform_8, window_bounds = array<i64: 1, 128>}, {pipeline_mode = #tpu.pipeline_mode<synchronous>, transform_indices = @transform_9, window_bounds = array<i64: 128, 512>}, {pipeline_mode = #tpu.pipeline_mode<synchronous>, transform_indices = @transform_10, window_bounds = array<i64: 1, 512>}, {pipeline_mode = #tpu.pipeline_mode<synchronous>, transform_indices = @transform_11, window_bounds = array<i64: 512, 128>}, {pipeline_mode = #tpu.pipeline_mode<synchronous>, transform_indices = @transform_12, window_bounds = array<i64: 1, 128>}, {transform_indices = @transform_13, window_bounds = array<i64: 4, 32, 128>}]} {
    %c0 = arith.constant 0 : index
    %c0_0 = arith.constant 0 : index
    %c0_1 = arith.constant 0 : index
    %0 = vector.load %arg1[%c0, %c0_0, %c0_1] : memref<4x32x128xf32, #tpu.memory_space<vmem>>, vector<4x32x128xf32>
    %1 = vector.shape_cast %0 : vector<4x32x128xf32> to vector<128x128xf32>
    %c0_2 = arith.constant 0 : index
    %c0_3 = arith.constant 0 : index
    %2 = vector.load %arg2[%c0_2, %c0_3] : memref<1x128xf32, #tpu.memory_space<vmem>>, vector<1x128xf32>
    %c0_4 = arith.constant 0 : index
    %c0_5 = arith.constant 0 : index
    %3 = vector.load %arg3[%c0_4, %c0_5] : memref<1x128xf32, #tpu.memory_space<vmem>>, vector<1x128xf32>
    %cst = arith.constant dense<0.000000e+00> : vector<128xf32>
    %4 = vector.multi_reduction <add>, %1, %cst [1] : vector<128x128xf32> to vector<128xf32>
    %5 = vector.shape_cast %4 : vector<128xf32> to vector<128x1xf32>
    %cst_6 = arith.constant 1.280000e+02 : f32
    %6 = vector.broadcast %cst_6 : f32 to vector<128x1xf32>
    %7 = arith.divf %5, %6 : vector<128x1xf32>
    %8 = vector.broadcast %7 : vector<128x1xf32> to vector<128x128xf32>
    %9 = arith.subf %1, %8 : vector<128x128xf32>
    %10 = arith.mulf %9, %9 : vector<128x128xf32>
    %cst_7 = arith.constant dense<0.000000e+00> : vector<128xf32>
    %11 = vector.multi_reduction <add>, %10, %cst_7 [1] : vector<128x128xf32> to vector<128xf32>
    %12 = vector.shape_cast %11 : vector<128xf32> to vector<128x1xf32>
    %cst_8 = arith.constant 1.280000e+02 : f32
    %13 = vector.broadcast %cst_8 : f32 to vector<128x1xf32>
    %14 = arith.divf %12, %13 : vector<128x1xf32>
    %cst_9 = arith.constant 9.99999974E-6 : f32
    %15 = vector.broadcast %cst_9 : f32 to vector<128x1xf32>
    %16 = arith.addf %14, %15 : vector<128x1xf32>
    %17 = math.rsqrt %16 : vector<128x1xf32>
    %18 = vector.broadcast %17 : vector<128x1xf32> to vector<128x128xf32>
    %19 = arith.mulf %9, %18 : vector<128x128xf32>
    %20 = vector.broadcast %2 : vector<1x128xf32> to vector<128x128xf32>
    %21 = arith.mulf %19, %20 : vector<128x128xf32>
    %22 = vector.broadcast %3 : vector<1x128xf32> to vector<128x128xf32>
    %23 = arith.addf %21, %22 : vector<128x128xf32>
    %24 = arith.truncf %23 : vector<128x128xf32> to vector<128x128xbf16>
    %c0_10 = arith.constant 0 : index
    %c0_11 = arith.constant 0 : index
    %25 = vector.load %arg4[%c0_10, %c0_11] : memref<128x384xbf16, #tpu.memory_space<vmem>>, vector<128x384xbf16>
    %cst_12 = arith.constant dense<0.000000e+00> : vector<128x384xf32>
    %26 = tpu.matmul %24, %25, %cst_12 {dimension_numbers = #tpu.dot_dimension_numbers<[1], [0], [0], [1], [0, 0, 1, 1], [], []>} : vector<128x128xbf16>, vector<128x384xbf16>, vector<128x384xf32> -> vector<128x384xf32>
    %c0_13 = arith.constant 0 : index
    %c0_14 = arith.constant 0 : index
    %27 = vector.load %arg5[%c0_13, %c0_14] : memref<1x384xf32, #tpu.memory_space<vmem>>, vector<1x384xf32>
    %28 = vector.broadcast %27 : vector<1x384xf32> to vector<128x384xf32>
    %29 = arith.addf %26, %28 : vector<128x384xf32>
    %30 = vector.extract_strided_slice %29 {offsets = [0, 0], sizes = [128, 128], strides = [1, 1]} : vector<128x384xf32> to vector<128x128xf32>
    %cst_15 = arith.constant 0.0883883461 : f32
    %31 = vector.broadcast %cst_15 : f32 to vector<128x128xf32>
    %32 = arith.mulf %30, %31 : vector<128x128xf32>
    %33 = arith.truncf %32 : vector<128x128xf32> to vector<128x128xbf16>
    %34 = vector.extract_strided_slice %29 {offsets = [0, 128], sizes = [128, 128], strides = [1, 1]} : vector<128x384xf32> to vector<128x128xf32>
    %35 = arith.truncf %34 : vector<128x128xf32> to vector<128x128xbf16>
    %36 = vector.extract_strided_slice %29 {offsets = [0, 256], sizes = [128, 128], strides = [1, 1]} : vector<128x384xf32> to vector<128x128xf32>
    %37 = arith.truncf %36 : vector<128x128xf32> to vector<128x128xbf16>
    %38 = vector.extract_strided_slice %33 {offsets = [0, 0], sizes = [128, 32], strides = [1, 1]} : vector<128x128xbf16> to vector<128x32xbf16>
    %39 = vector.shape_cast %38 : vector<128x32xbf16> to vector<4x32x32xbf16>
    %40 = vector.extract_strided_slice %33 {offsets = [0, 32], sizes = [128, 32], strides = [1, 1]} : vector<128x128xbf16> to vector<128x32xbf16>
    %41 = vector.shape_cast %40 : vector<128x32xbf16> to vector<4x32x32xbf16>
    %42 = vector.extract_strided_slice %33 {offsets = [0, 64], sizes = [128, 32], strides = [1, 1]} : vector<128x128xbf16> to vector<128x32xbf16>
    %43 = vector.shape_cast %42 : vector<128x32xbf16> to vector<4x32x32xbf16>
    %44 = vector.extract_strided_slice %33 {offsets = [0, 96], sizes = [128, 32], strides = [1, 1]} : vector<128x128xbf16> to vector<128x32xbf16>
    %45 = vector.shape_cast %44 : vector<128x32xbf16> to vector<4x32x32xbf16>
    %46 = vector.shape_cast %39 : vector<4x32x32xbf16> to vector<4x1x32x32xbf16>
    %47 = vector.shape_cast %41 : vector<4x32x32xbf16> to vector<4x1x32x32xbf16>
    %48 = vector.shape_cast %43 : vector<4x32x32xbf16> to vector<4x1x32x32xbf16>
    %49 = vector.shape_cast %45 : vector<4x32x32xbf16> to vector<4x1x32x32xbf16>
    %50 = tpu.concatenate %46, %47, %48, %49 in 1 : vector<4x1x32x32xbf16>, vector<4x1x32x32xbf16>, vector<4x1x32x32xbf16>, vector<4x1x32x32xbf16> -> vector<4x4x32x32xbf16>
    %51 = vector.shape_cast %50 : vector<4x4x32x32xbf16> to vector<16x32x32xbf16>
    %52 = vector.extract_strided_slice %35 {offsets = [0, 0], sizes = [128, 32], strides = [1, 1]} : vector<128x128xbf16> to vector<128x32xbf16>
    %53 = vector.shape_cast %52 : vector<128x32xbf16> to vector<4x32x32xbf16>
    %54 = vector.extract_strided_slice %35 {offsets = [0, 32], sizes = [128, 32], strides = [1, 1]} : vector<128x128xbf16> to vector<128x32xbf16>
    %55 = vector.shape_cast %54 : vector<128x32xbf16> to vector<4x32x32xbf16>
    %56 = vector.extract_strided_slice %35 {offsets = [0, 64], sizes = [128, 32], strides = [1, 1]} : vector<128x128xbf16> to vector<128x32xbf16>
    %57 = vector.shape_cast %56 : vector<128x32xbf16> to vector<4x32x32xbf16>
    %58 = vector.extract_strided_slice %35 {offsets = [0, 96], sizes = [128, 32], strides = [1, 1]} : vector<128x128xbf16> to vector<128x32xbf16>
    %59 = vector.shape_cast %58 : vector<128x32xbf16> to vector<4x32x32xbf16>
    %60 = vector.shape_cast %53 : vector<4x32x32xbf16> to vector<4x1x32x32xbf16>
    %61 = vector.shape_cast %55 : vector<4x32x32xbf16> to vector<4x1x32x32xbf16>
    %62 = vector.shape_cast %57 : vector<4x32x32xbf16> to vector<4x1x32x32xbf16>
    %63 = vector.shape_cast %59 : vector<4x32x32xbf16> to vector<4x1x32x32xbf16>
    %64 = tpu.concatenate %60, %61, %62, %63 in 1 : vector<4x1x32x32xbf16>, vector<4x1x32x32xbf16>, vector<4x1x32x32xbf16>, vector<4x1x32x32xbf16> -> vector<4x4x32x32xbf16>
    %65 = vector.shape_cast %64 : vector<4x4x32x32xbf16> to vector<16x32x32xbf16>
    %66 = vector.extract_strided_slice %37 {offsets = [0, 0], sizes = [128, 32], strides = [1, 1]} : vector<128x128xbf16> to vector<128x32xbf16>
    %67 = vector.shape_cast %66 : vector<128x32xbf16> to vector<4x32x32xbf16>
    %68 = vector.extract_strided_slice %37 {offsets = [0, 32], sizes = [128, 32], strides = [1, 1]} : vector<128x128xbf16> to vector<128x32xbf16>
    %69 = vector.shape_cast %68 : vector<128x32xbf16> to vector<4x32x32xbf16>
    %70 = vector.extract_strided_slice %37 {offsets = [0, 64], sizes = [128, 32], strides = [1, 1]} : vector<128x128xbf16> to vector<128x32xbf16>
    %71 = vector.shape_cast %70 : vector<128x32xbf16> to vector<4x32x32xbf16>
    %72 = vector.extract_strided_slice %37 {offsets = [0, 96], sizes = [128, 32], strides = [1, 1]} : vector<128x128xbf16> to vector<128x32xbf16>
    %73 = vector.shape_cast %72 : vector<128x32xbf16> to vector<4x32x32xbf16>
    %74 = vector.shape_cast %67 : vector<4x32x32xbf16> to vector<4x1x32x32xbf16>
    %75 = vector.shape_cast %69 : vector<4x32x32xbf16> to vector<4x1x32x32xbf16>
    %76 = vector.shape_cast %71 : vector<4x32x32xbf16> to vector<4x1x32x32xbf16>
    %77 = vector.shape_cast %73 : vector<4x32x32xbf16> to vector<4x1x32x32xbf16>
    %78 = tpu.concatenate %74, %75, %76, %77 in 1 : vector<4x1x32x32xbf16>, vector<4x1x32x32xbf16>, vector<4x1x32x32xbf16>, vector<4x1x32x32xbf16> -> vector<4x4x32x32xbf16>
    %79 = vector.shape_cast %78 : vector<4x4x32x32xbf16> to vector<16x32x32xbf16>
    "tpu.trace_start"() <{level = 10 : i32, message = "bnd,bmd->bnm"}> : () -> ()
    %cst_16 = arith.constant dense<0.000000e+00> : vector<16x32x32xf32>
    %80 = tpu.matmul %51, %65, %cst_16 {dimension_numbers = #tpu.dot_dimension_numbers<[2], [2], [1], [1], [0, 0, 0, 1, 1, 1], [0], [0]>} : vector<16x32x32xbf16>, vector<16x32x32xbf16>, vector<16x32x32xf32> -> vector<16x32x32xf32>
    "tpu.trace_stop"() : () -> ()
    %cst_17 = arith.constant dense<0xFF800000> : vector<16x32xf32>
    %81 = vector.multi_reduction <maximumf>, %80, %cst_17 [2] : vector<16x32x32xf32> to vector<16x32xf32>
    %82 = vector.shape_cast %81 : vector<16x32xf32> to vector<16x32x1xf32>
    %83 = vector.broadcast %82 : vector<16x32x1xf32> to vector<16x32x32xf32>
    %84 = arith.subf %80, %83 : vector<16x32x32xf32>
    %85 = math.exp %84 : vector<16x32x32xf32>
    %cst_18 = arith.constant dense<0.000000e+00> : vector<16x32xf32>
    %86 = vector.multi_reduction <add>, %85, %cst_18 [2] : vector<16x32x32xf32> to vector<16x32xf32>
    %87 = vector.shape_cast %86 : vector<16x32xf32> to vector<16x32x1xf32>
    %cst_19 = arith.constant 1.000000e+00 : f32
    %88 = vector.broadcast %cst_19 : f32 to vector<16x32x1xf32>
    %89 = arith.divf %88, %87 : vector<16x32x1xf32>
    %90 = vector.broadcast %89 : vector<16x32x1xf32> to vector<16x32x32xf32>
    %91 = arith.mulf %85, %90 : vector<16x32x32xf32>
    %92 = arith.truncf %91 : vector<16x32x32xf32> to vector<16x32x32xbf16>
    "tpu.trace_start"() <{level = 10 : i32, message = "bnm,bmd->bnd"}> : () -> ()
    %cst_20 = arith.constant dense<0.000000e+00> : vector<16x32x32xf32>
    %93 = tpu.matmul %92, %79, %cst_20 {dimension_numbers = #tpu.dot_dimension_numbers<[2], [1], [1], [2], [0, 0, 0, 1, 1, 2], [0], [0]>} : vector<16x32x32xbf16>, vector<16x32x32xbf16>, vector<16x32x32xf32> -> vector<16x32x32xf32>
    "tpu.trace_stop"() : () -> ()
    %94 = vector.shape_cast %93 : vector<16x32x32xf32> to vector<4x4x32x32xf32>
    %95 = vector.extract_strided_slice %94 {offsets = [0, 0, 0, 0], sizes = [4, 1, 32, 32], strides = [1, 1, 1, 1]} : vector<4x4x32x32xf32> to vector<4x1x32x32xf32>
    %96 = vector.shape_cast %95 : vector<4x1x32x32xf32> to vector<4x32x32xf32>
    %97 = vector.shape_cast %96 : vector<4x32x32xf32> to vector<128x32xf32>
    %98 = vector.extract_strided_slice %94 {offsets = [0, 1, 0, 0], sizes = [4, 1, 32, 32], strides = [1, 1, 1, 1]} : vector<4x4x32x32xf32> to vector<4x1x32x32xf32>
    %99 = vector.shape_cast %98 : vector<4x1x32x32xf32> to vector<4x32x32xf32>
    %100 = vector.shape_cast %99 : vector<4x32x32xf32> to vector<128x32xf32>
    %101 = vector.extract_strided_slice %94 {offsets = [0, 2, 0, 0], sizes = [4, 1, 32, 32], strides = [1, 1, 1, 1]} : vector<4x4x32x32xf32> to vector<4x1x32x32xf32>
    %102 = vector.shape_cast %101 : vector<4x1x32x32xf32> to vector<4x32x32xf32>
    %103 = vector.shape_cast %102 : vector<4x32x32xf32> to vector<128x32xf32>
    %104 = vector.extract_strided_slice %94 {offsets = [0, 3, 0, 0], sizes = [4, 1, 32, 32], strides = [1, 1, 1, 1]} : vector<4x4x32x32xf32> to vector<4x1x32x32xf32>
    %105 = vector.shape_cast %104 : vector<4x1x32x32xf32> to vector<4x32x32xf32>
    %106 = vector.shape_cast %105 : vector<4x32x32xf32> to vector<128x32xf32>
    %107 = tpu.concatenate %97, %100, %103, %106 in 1 : vector<128x32xf32>, vector<128x32xf32>, vector<128x32xf32>, vector<128x32xf32> -> vector<128x128xf32>
    %108 = arith.truncf %107 : vector<128x128xf32> to vector<128x128xbf16>
    %c0_21 = arith.constant 0 : index
    %c0_22 = arith.constant 0 : index
    %109 = vector.load %arg6[%c0_21, %c0_22] : memref<128x128xbf16, #tpu.memory_space<vmem>>, vector<128x128xbf16>
    %cst_23 = arith.constant dense<0.000000e+00> : vector<128x128xf32>
    %110 = tpu.matmul %108, %109, %cst_23 {dimension_numbers = #tpu.dot_dimension_numbers<[1], [0], [0], [1], [0, 0, 1, 1], [], []>} : vector<128x128xbf16>, vector<128x128xbf16>, vector<128x128xf32> -> vector<128x128xf32>
    %c0_24 = arith.constant 0 : index
    %c0_25 = arith.constant 0 : index
    %111 = vector.load %arg7[%c0_24, %c0_25] : memref<1x128xf32, #tpu.memory_space<vmem>>, vector<1x128xf32>
    %112 = vector.broadcast %111 : vector<1x128xf32> to vector<128x128xf32>
    %113 = arith.addf %110, %112 : vector<128x128xf32>
    %114 = arith.addf %1, %113 : vector<128x128xf32>
    %c0_26 = arith.constant 0 : index
    %c0_27 = arith.constant 0 : index
    %115 = vector.load %arg8[%c0_26, %c0_27] : memref<1x128xf32, #tpu.memory_space<vmem>>, vector<1x128xf32>
    %c0_28 = arith.constant 0 : index
    %c0_29 = arith.constant 0 : index
    %116 = vector.load %arg9[%c0_28, %c0_29] : memref<1x128xf32, #tpu.memory_space<vmem>>, vector<1x128xf32>
    %cst_30 = arith.constant dense<0.000000e+00> : vector<128xf32>
    %117 = vector.multi_reduction <add>, %114, %cst_30 [1] : vector<128x128xf32> to vector<128xf32>
    %118 = vector.shape_cast %117 : vector<128xf32> to vector<128x1xf32>
    %cst_31 = arith.constant 1.280000e+02 : f32
    %119 = vector.broadcast %cst_31 : f32 to vector<128x1xf32>
    %120 = arith.divf %118, %119 : vector<128x1xf32>
    %121 = vector.broadcast %120 : vector<128x1xf32> to vector<128x128xf32>
    %122 = arith.subf %114, %121 : vector<128x128xf32>
    %123 = arith.mulf %122, %122 : vector<128x128xf32>
    %cst_32 = arith.constant dense<0.000000e+00> : vector<128xf32>
    %124 = vector.multi_reduction <add>, %123, %cst_32 [1] : vector<128x128xf32> to vector<128xf32>
    %125 = vector.shape_cast %124 : vector<128xf32> to vector<128x1xf32>
    %cst_33 = arith.constant 1.280000e+02 : f32
    %126 = vector.broadcast %cst_33 : f32 to vector<128x1xf32>
    %127 = arith.divf %125, %126 : vector<128x1xf32>
    %cst_34 = arith.constant 9.99999974E-6 : f32
    %128 = vector.broadcast %cst_34 : f32 to vector<128x1xf32>
    %129 = arith.addf %127, %128 : vector<128x1xf32>
    %130 = math.rsqrt %129 : vector<128x1xf32>
    %131 = vector.broadcast %130 : vector<128x1xf32> to vector<128x128xf32>
    %132 = arith.mulf %122, %131 : vector<128x128xf32>
    %133 = vector.broadcast %115 : vector<1x128xf32> to vector<128x128xf32>
    %134 = arith.mulf %132, %133 : vector<128x128xf32>
    %135 = vector.broadcast %116 : vector<1x128xf32> to vector<128x128xf32>
    %136 = arith.addf %134, %135 : vector<128x128xf32>
    %137 = arith.truncf %136 : vector<128x128xf32> to vector<128x128xbf16>
    %c0_35 = arith.constant 0 : index
    %c0_36 = arith.constant 0 : index
    %138 = vector.load %arg10[%c0_35, %c0_36] : memref<128x512xbf16, #tpu.memory_space<vmem>>, vector<128x512xbf16>
    %cst_37 = arith.constant dense<0.000000e+00> : vector<128x512xf32>
    %139 = tpu.matmul %137, %138, %cst_37 {dimension_numbers = #tpu.dot_dimension_numbers<[1], [0], [0], [1], [0, 0, 1, 1], [], []>} : vector<128x128xbf16>, vector<128x512xbf16>, vector<128x512xf32> -> vector<128x512xf32>
    %c0_38 = arith.constant 0 : index
    %c0_39 = arith.constant 0 : index
    %140 = vector.load %arg11[%c0_38, %c0_39] : memref<1x512xf32, #tpu.memory_space<vmem>>, vector<1x512xf32>
    %141 = vector.broadcast %140 : vector<1x512xf32> to vector<128x512xf32>
    %142 = arith.addf %139, %141 : vector<128x512xf32>
    %cst_40 = arith.constant 5.000000e-01 : f32
    %143 = vector.broadcast %cst_40 : f32 to vector<128x512xf32>
    %144 = arith.mulf %143, %142 : vector<128x512xf32>
    %cst_41 = arith.constant 0.707106769 : f32
    %145 = vector.broadcast %cst_41 : f32 to vector<128x512xf32>
    %146 = arith.mulf %142, %145 : vector<128x512xf32>
    %147 = math.erf %146 : vector<128x512xf32>
    %cst_42 = arith.constant 1.000000e+00 : f32
    %148 = vector.broadcast %cst_42 : f32 to vector<128x512xf32>
    %149 = arith.addf %148, %147 : vector<128x512xf32>
    %150 = arith.mulf %144, %149 : vector<128x512xf32>
    %151 = arith.truncf %150 : vector<128x512xf32> to vector<128x512xbf16>
    %c0_43 = arith.constant 0 : index
    %c0_44 = arith.constant 0 : index
    %152 = vector.load %arg12[%c0_43, %c0_44] : memref<512x128xbf16, #tpu.memory_space<vmem>>, vector<512x128xbf16>
    %cst_45 = arith.constant dense<0.000000e+00> : vector<128x128xf32>
    %153 = tpu.matmul %151, %152, %cst_45 {dimension_numbers = #tpu.dot_dimension_numbers<[1], [0], [0], [1], [0, 0, 1, 1], [], []>} : vector<128x512xbf16>, vector<512x128xbf16>, vector<128x128xf32> -> vector<128x128xf32>
    %c0_46 = arith.constant 0 : index
    %c0_47 = arith.constant 0 : index
    %154 = vector.load %arg13[%c0_46, %c0_47] : memref<1x128xf32, #tpu.memory_space<vmem>>, vector<1x128xf32>
    %155 = vector.broadcast %154 : vector<1x128xf32> to vector<128x128xf32>
    %156 = arith.addf %153, %155 : vector<128x128xf32>
    %157 = arith.addf %114, %156 : vector<128x128xf32>
    %158 = vector.shape_cast %157 : vector<128x128xf32> to vector<4x32x128xf32>
    %c0_48 = arith.constant 0 : index
    %c0_49 = arith.constant 0 : index
    %c0_50 = arith.constant 0 : index
    %159 = vector.load %arg14[%c0_48, %c0_49, %c0_50] : memref<4x32x128xf32, #tpu.memory_space<vmem>>, vector<4x32x128xf32>
    tpu.vector_store %arg14[%c0_48, %c0_49, %c0_50], %158 {strides = array<i32>} : memref<4x32x128xf32, #tpu.memory_space<vmem>>, vector<4x32x128xf32>,
    return
  }
  func.func @transform_0(%arg0: i32) -> (i32, i32, i32) {
    %c0_i32 = arith.constant 0 : i32
    %c0_i32_0 = arith.constant 0 : i32
    %c0_i32_1 = arith.constant 0 : i32
    return %arg0, %c0_i32, %c0_i32_0 : i32, i32, i32
  }
  func.func @transform_1(%arg0: i32) -> (i32, i32) {
    %c0_i32 = arith.constant 0 : i32
    %c0_i32_0 = arith.constant 0 : i32
    %c0_i32_1 = arith.constant 0 : i32
    return %c0_i32, %c0_i32_0 : i32, i32
  }
  func.func @transform_2(%arg0: i32) -> (i32, i32) {
    %c0_i32 = arith.constant 0 : i32
    %c0_i32_0 = arith.constant 0 : i32
    %c0_i32_1 = arith.constant 0 : i32
    return %c0_i32, %c0_i32_0 : i32, i32
  }
  func.func @transform_3(%arg0: i32) -> (i32, i32) {
    %c0_i32 = arith.constant 0 : i32
    %c0_i32_0 = arith.constant 0 : i32
    %c0_i32_1 = arith.constant 0 : i32
    return %c0_i32, %c0_i32_0 : i32, i32
  }
  func.func @transform_4(%arg0: i32) -> (i32, i32) {
    %c0_i32 = arith.constant 0 : i32
    %c0_i32_0 = arith.constant 0 : i32
    %c0_i32_1 = arith.constant 0 : i32
    return %c0_i32, %c0_i32_0 : i32, i32
  }
  func.func @transform_5(%arg0: i32) -> (i32, i32) {
    %c0_i32 = arith.constant 0 : i32
    %c0_i32_0 = arith.constant 0 : i32
    %c0_i32_1 = arith.constant 0 : i32
    return %c0_i32, %c0_i32_0 : i32, i32
  }
  func.func @transform_6(%arg0: i32) -> (i32, i32) {
    %c0_i32 = arith.constant 0 : i32
    %c0_i32_0 = arith.constant 0 : i32
    %c0_i32_1 = arith.constant 0 : i32
    return %c0_i32, %c0_i32_0 : i32, i32
  }
  func.func @transform_7(%arg0: i32) -> (i32, i32) {
    %c0_i32 = arith.constant 0 : i32
    %c0_i32_0 = arith.constant 0 : i32
    %c0_i32_1 = arith.constant 0 : i32
    return %c0_i32, %c0_i32_0 : i32, i32
  }
  func.func @transform_8(%arg0: i32) -> (i32, i32) {
    %c0_i32 = arith.constant 0 : i32
    %c0_i32_0 = arith.constant 0 : i32
    %c0_i32_1 = arith.constant 0 : i32
    return %c0_i32, %c0_i32_0 : i32, i32
  }
  func.func @transform_9(%arg0: i32) -> (i32, i32) {
    %c0_i32 = arith.constant 0 : i32
    %c0_i32_0 = arith.constant 0 : i32
    %c0_i32_1 = arith.constant 0 : i32
    return %c0_i32, %c0_i32_0 : i32, i32
  }
  func.func @transform_10(%arg0: i32) -> (i32, i32) {
    %c0_i32 = arith.constant 0 : i32
    %c0_i32_0 = arith.constant 0 : i32
    %c0_i32_1 = arith.constant 0 : i32
    return %c0_i32, %c0_i32_0 : i32, i32
  }
  func.func @transform_11(%arg0: i32) -> (i32, i32) {
    %c0_i32 = arith.constant 0 : i32
    %c0_i32_0 = arith.constant 0 : i32
    %c0_i32_1 = arith.constant 0 : i32
    return %c0_i32, %c0_i32_0 : i32, i32
  }
  func.func @transform_12(%arg0: i32) -> (i32, i32) {
    %c0_i32 = arith.constant 0 : i32
    %c0_i32_0 = arith.constant 0 : i32
    %c0_i32_1 = arith.constant 0 : i32
    return %c0_i32, %c0_i32_0 : i32, i32
  }
  func.func @transform_13(%arg0: i32) -> (i32, i32, i32) {
    %c0_i32 = arith.constant 0 : i32
    %c0_i32_0 = arith.constant 0 : i32
    %c0_i32_1 = arith.constant 0 : i32
    return %arg0, %c0_i32, %c0_i32_0 : i32, i32, i32
  }
}

</mosaic_0001>

<bundles_post_ra>
// kernel: transformer_encoder_block.1
= control target key start
LH: loop header
LB: loop body
LE: loop exit
PB: predicated region body
PF: predicated region fallthrough
CT: control target
= control target key end

     0   :  { %s10575_s0 = inlined_call_operand.hbm [shape: f32[8,32,128], index: 0, kind: input, shape index: {}]   ;;  %s10576_s1 = inlined_call_operand.vmem [shape: f32[1,128], index: 1, kind: input, shape index: {}]   ;;  %s10577_s2 = inlined_call_operand.vmem [shape: f32[1,128], index: 2, kind: input, shape index: {}]   ;;  %s10578_s3 = inlined_call_operand.hbm [shape: bf16[128,384], index: 3, kind: input, shape index: {}]   ;;  %s10579_s4 = inlined_call_operand.vmem [shape: f32[1,384], index: 4, kind: input, shape index: {}]   ;;  %s10580_s5 = inlined_call_operand.hbm [shape: bf16[128,128], index: 5, kind: input, shape index: {}]   ;;  %s10581_s6 = inlined_call_operand.hbm [shape: f32[1,128], index: 6, kind: input, shape index: {}]   ;;  %s10582_s7 = inlined_call_operand.vmem [shape: f32[1,128], index: 7, kind: input, shape index: {}]   ;;  %s10583_s8 = inlined_call_operand.vmem [shape: f32[1,128], index: 8, kind: input, shape index: {}]   ;;  %s10584_s9 = inlined_call_operand.hbm [shape: bf16[128,512], index: 9, kind: input, shape index: {}]   ;;  %s10585_s10 = inlined_call_operand.hbm [shape: f32[1,512], index: 10, kind: input, shape index: {}]   ;;  %s10586_s11 = inlined_call_operand.hbm [shape: bf16[512,128], index: 11, kind: input, shape index: {}]   ;;  %s10587_s12 = inlined_call_operand.hbm [shape: f32[1,128], index: 12, kind: input, shape index: {}]   ;;  %s10588_s13 = inlined_call_operand.hbm [shape: f32[8,32,128], index: 13, kind: output, shape index: {}]  }
   0x1   :  { %10668 = sst [smem:[#allocation65_spill]] %s10578_s3 }
   0x2   :  { %10669 = sst [smem:[#allocation66_spill]] %s10580_s5 }
   0x3   :  { %10670 = sst [smem:[#allocation67_spill]] %s10581_s6 }
   0x4   :  { %10671 = sst [smem:[#allocation68_spill]] %s10583_s8 }
   0x5   :  { %10672 = sst [smem:[#allocation69_spill]] %s10584_s9 }
   0x6   :  { %10673 = sst [smem:[#allocation70_spill]] %s10585_s10 }
   0x7   :  { %10674 = sst [smem:[#allocation71_spill]] %s10588_s13 }
   0x8   :  { %18 = vsyncpa [#allocation3], 0 }
   0x9   :  { %20 = vsyncpa [#allocation3 + $0x1], 0 }
   0xa   :  { %21 = vsyncpa [#allocation6], 0 }
   0xb   :  { %22 = vsyncpa [#allocation9], 0 }
   0xc   :  { %23 = vsyncpa [#allocation12], 0 }
   0xd   :  { %24 = vsyncpa [#allocation15], 0 }
   0xe   :  { %25 = vsyncpa [#allocation4], 0 }
   0xf   :  { %27 = vsyncpa [#allocation4 + $0x1], 0  ;;  %s8242_s25 = smov 0   ;;  %s8244_s26 = smov 0  }
  0x10   :  { %s8246_s27 = smov 0   ;;  %s8248_s28 = smov 0  }
  0x11 LB: > { %s8149_s29 = smov [#allocation5]   ;;  %s8263_s14 = sadd.s32 4294967295, %s8147_s28   ;;  %s8147_s28 = sphi %s8248_s28, %s10833_s28   ;;  %s8143_s27 = sphi %s8246_s27, %s10832_s27   ;;  %s8139_s26 = sphi %s8244_s26, %s10831_s26   ;;  %s8135_s25 = sphi %s8242_s25, %s10830_s25  }
  0x12   : > { %s360_s30 = sshll.u32 %s8149_s29, 4  ;;  %p6183_p0 = scmp.ge.s32.totalorder %s8147_s28, 1  ;;  %s361_s30 = int_to_ptr.vmem [resolvable:$true] %s360_s30 }
  0x13   : > { %p10592_p1 = scmp.eq.s32.totalorder %s8263_s14, 0  ;;  %p342_p2 = scmp.lt.s32.totalorder %s8147_s28, 3 }
  0x14   : > { %s8150_s16 = smov [#allocation8]   ;;  %s8151_s19 = smov [#allocation11]  }
  0x15   : > { %p8268_p3 = pnand %p6183_p0, %p342_p2  ;;  %s390_s17 = sshll.u32 %s8150_s16, 4  ;;  %s391_s17 = int_to_ptr.vmem [resolvable:$true] %s390_s17 }
  0x16   : > { %s420_s20 = sshll.u32 %s8151_s19, 4  ;;  %s7868_s22 = scalar_lea.vmem %s361_s30, 3072  ;;  %s8281_s20 = int_to_ptr.vmem [resolvable:$true] %s420_s20 }
  0x17   : > { %s10675_s15 = scalar_select %p8268_p3, 1, 0 }
  0x18   : > { %p7054_p5 = pneg %p8268_p3  ;;  %p7869_p8 = scmp.ne.s32.totalorder %s361_s30, %s7868_s22 }
  0x19   : > { %p7876_p11 = scmp.lt.s32.totalorder %s361_s30, %s361_s30  ;;  %p7877_p12 = scmp.lt.s32.totalorder %s7868_s22, %s7868_s22 }
  0x1a   : > { %p8277_p6 = pnand %p7054_p5, %p10592_p1 }
  0x1b   : > { %p7878_p13 = por %p7877_p12, %p7876_p11 }
  0x1c   : > { %p8285_p7 = pneg %p8277_p6 }
  0x1e   : > { %p7871_p9 = pnand %p7869_p8, %p8285_p7 }
  0x20   : > { %p7872_p10 = pneg %p7871_p9 }
  0x22   : > { %p7879_p0 = pnand %p7878_p13, %p7872_p10 }
  0x24   : > { %7882 = shalt.err (!%p7879_p0)
}
  0x25   : > { %s8152_s23 = smov 192   ;;  %s8153_s24 = smov 12  }
  0x26   : > { %s10678_s3 = sld [smem:[#allocation65_spill]]  ;;  %s7894_s19 = scalar_lea.vmem %s391_s17, 16 }
  0x27   : > { %p7895_p2 = scmp.ne.s32.totalorder %s391_s17, %s7894_s19  ;;  %s7901_s13 = scalar_lea.vmem %s391_s17, 32 }
  0x28   : > { %p7902_p9 = scmp.lt.s32.totalorder %s391_s17, %s391_s17  ;;  %p7903_p4 = scmp.lt.s32.totalorder %s7901_s13, %s7894_s19 }
  0x29   : > { %p7897_p5 = pnand %p7895_p2, %p8285_p7 }
  0x2a   : > { %p7904_p11 = por %p7903_p4, %p7902_p9 }
  0x2b   : > { %p7898_p8 = pneg %p7897_p5 }
  0x2c   : > { %7057 = dma.hbm_to_vmem [thread:$0]  (!%p8277_p6), %s10678_s3, 3072, %s361_s30, [#allocation6], %s8152_s23, %s8152_s23, %s8153_s24  }
  0x2d   : > { %p7905_p10 = pnand %p7904_p11, %p7898_p8 }
  0x2f   : > { %7908 = shalt.err (!%p7905_p10)
}
  0x30   : > { %s10679_s6 = sld [smem:[#allocation67_spill]]  ;;  %s7920_s30 = scalar_lea.vmem %s8281_s20, 64 }
  0x31   : > { %p7921_p12 = scmp.ne.s32.totalorder %s8281_s20, %s7920_s30  ;;  %p7928_p2 = scmp.lt.s32.totalorder %s8281_s20, %s8281_s20 }
  0x32   : > { %p7929_p4 = scmp.lt.s32.totalorder %s7920_s30, %s7920_s30 }
  0x33   : > { %p7923_p13 = pnand %p7921_p12, %p8285_p7 }
  0x34   : > { %p7930_p5 = por %p7929_p4, %p7928_p2 }
  0x35   : > { %p7924_p0 = pneg %p7923_p13 }
  0x36   : > { %7063 = dma.hbm_to_vmem [thread:$0]  (!%p8277_p6), %s10679_s6, 16, %s391_s17, [#allocation9]  }
  0x37   : > { %p7931_p8 = pnand %p7930_p5, %p7924_p0 }
  0x39   : > { %7934 = shalt.err (!%p7931_p8)
}
  0x3a   : > { %s10680_s10 = sld [smem:[#allocation70_spill]]  ;;  %s8154_s17 = smov [#allocation7]  }
  0x3b   : > { %s376_s23 = sshll.u32 %s8154_s17, 4  ;;  %s377_s23 = int_to_ptr.vmem [resolvable:$true] %s376_s23 }
  0x3c   : > { %s7946_s24 = scalar_lea.vmem %s377_s23, 1024  ;;  %p7954_p12 = scmp.lt.s32.totalorder %s377_s23, %s377_s23 }
  0x3d   : > { %p7947_p9 = scmp.ne.s32.totalorder %s377_s23, %s7946_s24  ;;  %p7955_p13 = scmp.lt.s32.totalorder %s7946_s24, %s7946_s24 }
  0x3f   : > { %p7949_p11 = pnand %p7947_p9, %p8285_p7  ;;  %p7956_p0 = por %p7955_p13, %p7954_p12 }
  0x40   : > { %7069 = dma.hbm_to_vmem [thread:$0]  (!%p8277_p6), %s10680_s10, 64, %s8281_s20, [#allocation12]  }
  0x41   : > { %p7950_p10 = pneg %p7949_p11 }
  0x43   : > { %p7957_p2 = pnand %p7956_p0, %p7950_p10 }
  0x45   : > { %7960 = shalt.err (!%p7957_p2)
}
  0x46   : > { %s10590_s29 = smov 64   ;;  %s10591_s16 = smov 4  }
  0x47   : > { %s10681_s5 = sld [smem:[#allocation66_spill]]  ;;  %s8157_s22 = smov [#allocation10]  }
  0x48   : > { %s406_s30 = sshll.u32 %s8157_s22, 4  ;;  %s407_s30 = int_to_ptr.vmem [resolvable:$true] %s406_s30 }
  0x49   : > { %s7972_s8 = scalar_lea.vmem %s407_s30, 4096  ;;  %p7980_p9 = scmp.lt.s32.totalorder %s407_s30, %s407_s30 }
  0x4a   : > { %p7973_p4 = scmp.ne.s32.totalorder %s407_s30, %s7972_s8  ;;  %p7981_p11 = scmp.lt.s32.totalorder %s7972_s8, %s7972_s8 }
  0x4c   : > { %p7975_p5 = pnand %p7973_p4, %p8285_p7  ;;  %p7982_p10 = por %p7981_p11, %p7980_p9 }
  0x4d   : > { %7060 = dma.hbm_to_vmem [thread:$0]  (!%p8277_p6), %s10681_s5, 1024, %s377_s23, [#allocation6], %s10590_s29, %s10590_s29, %s10591_s16  }
  0x4e   : > { %p7976_p8 = pneg %p7975_p5 }
  0x50   : > { %p7983_p12 = pnand %p7982_p10, %p7976_p8 }
  0x52   : > { %7986 = shalt.err (!%p7983_p12)
}
  0x53   : > { %s8158_s13 = smov 256   ;;  %s8159_s17 = smov 16  }
  0x54   : > { %s10682_s9 = sld [smem:[#allocation69_spill]]  ;;  %s8160_s20 = smov [#allocation13]  }
  0x55   : > { %s430_s19 = sshll.u32 %s8160_s20, 4  ;;  %s8161_s22 = smov [#allocation14]   ;;  %s431_s19 = int_to_ptr.vmem [resolvable:$true] %s430_s19 }
  0x56   : > { %s444_s29 = sshll.u32 %s8161_s22, 4  ;;  %s7998_s16 = scalar_lea.vmem %s431_s19, 4096  ;;  %s445_s29 = int_to_ptr.vmem [resolvable:$true] %s444_s29 }
  0x57   : > { %p7999_p13 = scmp.ne.s32.totalorder %s431_s19, %s7998_s16  ;;  %p8006_p4 = scmp.lt.s32.totalorder %s431_s19, %s431_s19 }
  0x58   : > { %p8007_p5 = scmp.lt.s32.totalorder %s7998_s16, %s7998_s16 }
  0x59   : > { %p8001_p0 = pnand %p7999_p13, %p8285_p7 }
  0x5a   : > { %7066 = dma.hbm_to_vmem [thread:$0]  (!%p8277_p6), %s10682_s9, 4096, %s407_s30, [#allocation9], %s8158_s13, %s8158_s13, %s8159_s17  }
  0x5b   : > { %p8002_p2 = pneg %p8001_p0  ;;  %p8008_p8 = por %p8007_p5, %p8006_p4 }
  0x5d   : > { %p8009_p9 = pnand %p8008_p8, %p8002_p2 }
  0x5f   : > { %8012 = shalt.err (!%p8009_p9)
}
  0x60   : > { %s10683_s8 = smov 4   ;;  %s10684_s24 = smov 64  }
  0x61   : > { %7072 = dma.hbm_to_vmem [thread:$0]  (!%p8277_p6), %s10586_s11, 4096, %s431_s19, [#allocation12], %s10684_s24, %s10684_s24, %s10683_s8  }
  0x62   : > { %s8024_s17 = scalar_lea.vmem %s445_s29, 16  ;;  %s8031_s16 = scalar_lea.vmem %s445_s29, 32 }
  0x63   : > { %p8025_p11 = scmp.ne.s32.totalorder %s445_s29, %s8024_s17  ;;  %p8032_p13 = scmp.lt.s32.totalorder %s445_s29, %s445_s29 }
  0x64   : > { %p8033_p0 = scmp.lt.s32.totalorder %s8031_s16, %s8024_s17 }
  0x65   : > { %p8027_p10 = pnand %p8025_p11, %p8285_p7 }
  0x66   : > { %p8034_p2 = por %p8033_p0, %p8032_p13 }
  0x67   : > { %p8028_p12 = pneg %p8027_p10 }
  0x69   : > { %p8035_p4 = pnand %p8034_p2, %p8028_p12 }
  0x6b   : > { %8038 = shalt.err (!%p8035_p4)
}
  0x6c   : > { %7075 = dma.hbm_to_vmem [thread:$0]  (!%p8277_p6), %s10587_s12, 16, %s445_s29, [#allocation15]  }
  0x6d   : > { %s6182_s21 = sadd.s32 4294967294, %s8147_s28   ;;  %s8351_s18 = sadd.s32 1, %s8147_s28  }
  0x6e   : > { %s40_s19 = sadd.s32 1, %s8143_s27  ;;  %s37_s22 = ssub.s32 %s8147_s28, %s8351_s18 }
  0x6f   : > { %p47_p7 = scmp.ne.s32.totalorder %s8143_s27, %s8139_s26  ;;  %p38_p5 = scmp.eq.s32.totalorder %s37_s22, 0 }
  0x70   : > { %p48_p8 = scmp.eq.s32.totalorder %s8147_s28, 0  ;;  %p53_p9 = scmp.ne.s32.totalorder %s8139_s26, %s8135_s25 }
  0x71   : > { %p329_p11 = scmp.eq.s32.totalorder %s8263_s14, 1  ;;  %p335_p13 = scmp.eq.s32.totalorder %s6182_s21, 1 }
  0x72   : > { %s8363_s8 = scalar_select %p38_p5, %s8143_s27, %s40_s19  }
  0x73   : > { %p49_p10 = por %p48_p8, %p47_p7  ;;  %p8367_p12 = por %p10592_p1, %p53_p9 }
  0x74   : > { %p8371_p6 = por %p329_p11, %p47_p7  ;;  %p7091_p0 = scmp.lt.s32.totalorder %s8147_s28, 2 }
  0x75   : > { %s10685_s24 = scalar_select %p8367_p12, 1, 0 }
  0x76   : > { %s10686_s29 = scalar_select %p8371_p6, 1, 0 }
  0x77   : > { %s455_s30 = sand.u32 1, %s8143_s27   ;;  %p8377_p2 = por %p335_p13, %p53_p9 }
  0x78   : > { %s6192_s17 = sshll.u32 %s455_s30, 7  ;;  %s6379_s16 = sshll.u32 %s8147_s28, 11 }
  0x79   : > { %s10687_s13 = scalar_select %p8377_p2, 1, 0 }
  0x7a   : > { %s8385_s19 = scalar_lea.hbm %s10575_s0, %s6379_s16  ;;  %s459_s22 = scalar_lea.vmem [#allocation2], %s6192_s17 }
  0x7b   : > { %s467_s3 = sshll.u32 %s459_s22, 4  ;;  %p8387_p4 = pnand %p7091_p0, %p49_p10  ;;  %s8391_s3 = int_to_ptr.vmem [resolvable:$true] %s467_s3 }
  0x7c   : > { %s8393_s5 = scalar_lea.sflag [#allocation3], %s455_s30  ;;  %s8039_s6 = scalar_lea.hbm %s8385_s19, 2048 }
  0x7d   : > { %p8040_p7 = scmp.ne.s32.totalorder %s8385_s19, %s8039_s6  ;;  %p8041_p5 = pneg %p8387_p4 }
  0x7e   : > { %s8044_s17 = scalar_lea.hbm %s10575_s0, 4096  ;;  %p8045_p11 = scmp.lt.s32.totalorder %s8385_s19, %s10575_s0 }
  0x7f   : > { %p8042_p8 = pnand %p8041_p5, %p8040_p7  ;;  %p8046_p10 = scmp.lt.s32.totalorder %s8044_s17, %s8039_s6 }
  0x81   : > { %p8043_p9 = pneg %p8042_p8  ;;  %p8047_p13 = por %p8046_p10, %p8045_p11 }
  0x83   : > { %p8048_p0 = pnand %p8047_p13, %p8043_p9 }
  0x85   : > { %8051 = shalt.err (!%p8048_p0)
}
  0x86   : > { %s8052_s30 = scalar_lea.vmem %s8391_s3, 2048  ;;  %s8162_s9 = smov [#allocation2]  }
  0x87   : > { %p8053_p1 = scmp.ne.s32.totalorder %s8391_s3, %s8052_s30  ;;  %s8057_s10 = sshll.u32 %s8162_s9, 4  ;;  %s8058_s10 = int_to_ptr.vmem [resolvable:$false] %s8057_s10 }
  0x88   : > { %s8059_s16 = scalar_lea.vmem %s8058_s10, 4096  ;;  %p8060_p8 = scmp.lt.s32.totalorder %s8391_s3, %s8058_s10 }
  0x89   : > { %p8055_p2 = pnand %p8053_p1, %p8041_p5  ;;  %p8061_p6 = scmp.lt.s32.totalorder %s8059_s16, %s8052_s30 }
  0x8b   : > { %p8056_p7 = pneg %p8055_p2  ;;  %p8062_p12 = por %p8061_p6, %p8060_p8 }
  0x8d   : > { %p8063_p3 = pnand %p8062_p12, %p8056_p7 }
  0x8f   : > { %8066 = shalt.err (!%p8063_p3)
}
  0x90   : > { %s8163_s6 = smov 128   ;;  %s8164_s23 = smov 8  }
  0x91   : > { %7079 = dma.hbm_to_vmem [thread:$0]  (!%p8387_p4), %s8385_s19, 2048, %s8391_s3, %s8393_s5, %s8163_s6, %s8163_s6, %s8164_s23  }
  0x92   : > { %p10689_p1 = scmp.ne.s32.totalorder %s10675_s15, 0 }
  0x94   : > { %479 = sbr.rel (%p10689_p1) target bundleno = 2870 (0xb36), region = 72 }
  0x99   : > { %s8417_s9 = sand.u32 1, %s8139_s26   ;;  %p10690_p3 = scmp.ne.s32.totalorder %s10685_s24, 0 }
  0x9a   : > { %s6197_s10 = sshll.u32 %s8417_s9, 7  ;;  %s482_s17 = scalar_lea.sflag [#allocation3], %s8417_s9 }
  0x9b   : > { %s8423_s20 = scalar_lea.vmem [#allocation2], %s6197_s10 }
  0x9c   : > { %8110 = dma.done.wait (%p10690_p3), %s482_s17, 2048  }
  0x9d   : > { %8112 = vsyncadd (%p10690_p3), %s482_s17, 4294965248  ;;  %p10691_p12 = scmp.eq.s32.totalorder %s8263_s14, 0 }
  0x9f   : > { %8114 = dma.done.wait (%p10691_p12), [#allocation6], 4096   ;;  %p10692_p6 = pmov %p10691_p12 }
  0xa1   : > { %8116 = vsyncadd (%p10692_p6), [#allocation6], 4294963200  ;;  %p10693_p2 = pmov %p10692_p6 }
  0xa3   : > { %8118 = dma.done.wait (%p10693_p2), [#allocation9], 4112   ;;  %p10694_p4 = pmov %p10693_p2 }
  0xa4   : > { %p10695_p5 = pmov %p10693_p2 }
  0xa5   : > { %8120 = vsyncadd (%p10694_p4), [#allocation9], 4294963184 }
  0xa6   : > { %8122 = dma.done.wait (%p10695_p5), [#allocation12], 4160   ;;  %p10696_p9 = pmov %p10693_p2 }
  0xa7   : > { %p10697_p11 = pmov %p10693_p2 }
  0xa8   : > { %8124 = vsyncadd (%p10696_p9), [#allocation12], 4294963136 }
  0xa9   : > { %8126 = dma.done.wait (%p10697_p11), [#allocation15], 16   ;;  %p10698_p10 = pmov %p10693_p2 }
  0xaa   : > { %v559_v0 = vld [vmem:[%s8423_s20] sm:$0xff]  ;;  %v561_v1 = vld [vmem:[%s8423_s20 + $0x10] sm:$0xff]  ;;  %v560_v2 = vld [vmem:[%s8423_s20 + $0x8] sm:$0xff]  ;;  %vm1425_vm0 = vcmask 261120   ;;  %s8166_s22 = smov 96   ;;  %s8167_s30 = smov 64  }
  0xab   : > { %8128 = vsyncadd (%p10698_p10), [#allocation15], 4294967280  ;;  %577 = vadd.xlane.f32.xlu0 %v559_v0  ;;  %581 = vadd.xlane.f32.xlu1 %v561_v1  ;;  %v562_v3 = vld [vmem:[%s8423_s20 + $0x18] sm:$0xff]  ;;  %v563_v4 = vld [vmem:[%s8423_s20 + $0x20] sm:$0xff]  ;;  %s8168_s16 = smov 32   ;;  %vm4290_vm1 = vcmask 523264  }
  0xac   : > { %v8451_v5 = vld [vmem:[%s8423_s20 + $0x28] sm:$0xff]  ;;  %v8454_v6 = vld [vmem:[%s8423_s20 + $0x30] sm:$0xff]  ;;  %v8457_v7 = vld [vmem:[%s8423_s20 + $0x38] sm:$0xff]  ;;  %vm4307_vm2 = vcmask 785408   ;;  %s10814_s3 = sld [smem:[#allocation68_spill]]  ;;  %s10478_s5 = scalar_lea.vmem [#allocation16], %s6197_s10 }
  0xad   : > { %v7273_v8 = vld [vmem:[#allocation5 + $0xac] ss:$12 sps:$4 sm:$0xff]   ;;  %v7275_v9 = vld [vmem:[#allocation5 + $0xa8] ss:$12 sps:$4 sm:$0xff]   ;;  %v8471_v22 = vld [vmem:[%s8423_s20 + $0x40] sm:$0xff]  ;;  %s6381_s10 = sshll.u32 %s8263_s14, 11 }
  0xae   : > { %983 = vmatprep.subr.bf16.mxu0 %v7273_v8  ;;  %v8481_v26 = vld [vmem:[%s8423_s20 + $0x48] sm:$0xff]  ;;  %v8487_v29 = vld [vmem:[%s8423_s20 + $0x50] sm:$0xff]  ;;  %v8491_v34 = vld [vmem:[%s8423_s20 + $0x60] sm:$0xff]  ;;  %s6042_s15 = sshll.u32 %s10478_s5, 4  ;;  %s10825_s21 = sld [smem:[#allocation71_spill]]  ;;  %s10530_s15 = int_to_ptr.vmem [resolvable:$true] %s6042_s15 }
  0xaf   : > { %579 = vadd.xlane.f32.xlu0 %v560_v2  ;;  %583 = vadd.xlane.f32.xlu1 %v562_v3  ;;  %v7276_v30 = vld [vmem:[#allocation5 + $0x94] ss:$12 sps:$4 sm:$0xff]   ;;  %v7278_v32 = vld [vmem:[#allocation5 + $0x90] ss:$12 sps:$4 sm:$0xff]   ;;  %v7282_v39 = vld [vmem:[#allocation5 + $0x78] ss:$12 sps:$4 sm:$0xff]  }
  0xb0   : > { %984 = vmatpush1.bf16.msra.mxu0 %v7275_v9  ;;  %v8494_v35 = vld [vmem:[%s8423_s20 + $0x58] sm:$0xff]  ;;  %v8501_v43 = vld [vmem:[%s8423_s20 + $0x70] sm:$0xff]  ;;  %v8504_v44 = vld [vmem:[%s8423_s20 + $0x68] sm:$0xff]  ;;  %p10827_p0 = scmp.ne.s32.totalorder %s10686_s29, 0  ;;  %s8169_s14 = smov [#allocation16]  }
  0xb1   : > { %985 = vmatprep.subr.bf16.mxu0 %v7276_v30  ;;  %v7279_v37 = vld [vmem:[#allocation5 + $0x7c] ss:$12 sps:$4 sm:$0xff]   ;;  %v7283_v46 = vld [vmem:[#allocation5 + $0x64] ss:$12 sps:$4 sm:$0xff]   ;;  %v7286_v48 = vld [vmem:[#allocation5 + $0x60] ss:$12 sps:$4 sm:$0xff]  }
  0xb2   : > { %v7281_v38 = vld [vmem:[#allocation5 + $0xb0] ss:$12 sps:$4 sm:$0xff]   ;;  %v7285_v47 = vld [vmem:[#allocation5 + $0x98] ss:$12 sps:$4 sm:$0xff]   ;;  %v7289_v55 = vld [vmem:[#allocation5 + $0x80] ss:$12 sps:$4 sm:$0xff]  }
  0xb3   : > { %585 = vadd.xlane.f32.xlu0 %v563_v4  ;;  %587 = vadd.xlane.f32.xlu1 %v8451_v5  ;;  %v8517_v53 = vld [vmem:[%s8423_s20 + $0x78] sm:$0xff]  ;;  %v7290_v56 = vld [vmem:[#allocation5 + $0x48] ss:$12 sps:$4 sm:$0xff]   ;;  %s8071_s6 = sshll.u32 %s8169_s14, 4  ;;  %s8072_s6 = int_to_ptr.vmem [resolvable:$false] %s8071_s6 }
  0xb4   : > { %986 = vmatpush1.bf16.msra.mxu0 %v7278_v32  ;;  %6670 = vmatprep.subr.bf16.mxu1 %v7281_v38  ;;  %v7287_v54 = vld [vmem:[#allocation5 + $0x4c] ss:$12 sps:$4 sm:$0xff]   ;;  %v7291_v60 = vld [vmem:[#allocation5 + $0x34] ss:$12 sps:$4 sm:$0xff]   ;;  %v7294_v62 = vld [vmem:[#allocation5 + $0x30] ss:$12 sps:$4 sm:$0xff]   ;;  %p8074_p1 = scmp.lt.s32.totalorder %s10530_s15, %s8072_s6 }
  0xb5   : > { %987 = vmatprep.subr.bf16.mxu0 %v7279_v37  ;;  %6671 = vmatpush3.bf16.msra.mxu1 %v7281_v38  ;;  %v7293_v61 = vld [vmem:[#allocation5 + $0x68] ss:$12 sps:$4 sm:$0xff]   ;;  %s8073_s23 = scalar_lea.vmem %s8072_s6, 4096 }
  0xb6   : > { %6672 = vmatprep.subr.bf16.mxu1 %v7285_v47  ;;  %v7304_v8 = vld [vmem:[#allocation5 + $0x8] ss:$12 sps:$4 sm:$0xff]  }
  0xb7   : > { %589 = vadd.xlane.f32.xlu0 %v8454_v6  ;;  %591 = vadd.xlane.f32.xlu1 %v8457_v7 }
  0xb8   : > { %988 = vmatpush1.bf16.msra.mxu0 %v7282_v39 }
  0xb9   : > { %989 = vmatprep.subr.bf16.mxu0 %v7283_v46  ;;  %6673 = vmatpush3.bf16.msra.mxu1 %v7285_v47 }
  0xba   : > { %6674 = vmatprep.subr.bf16.mxu1 %v7289_v55 }
  0xbc   : > { %990 = vmatpush1.bf16.msra.mxu0 %v7286_v48 }
  0xbd   : > { %991 = vmatprep.subr.bf16.mxu0 %v7287_v54  ;;  %6675 = vmatpush3.bf16.msra.mxu1 %v7289_v55 }
  0xbe   : > { %6676 = vmatprep.subr.bf16.mxu1 %v7293_v61 }
  0xc0   : > { %992 = vmatpush1.bf16.msra.mxu0 %v7290_v56 }
  0xc1   : > { %993 = vmatprep.subr.bf16.mxu0 %v7291_v60  ;;  %6677 = vmatpush3.bf16.msra.mxu1 %v7293_v61 }
  0xc4   : > { %994 = vmatpush1.bf16.msra.mxu0 %v7294_v62 }
 0x134   : > { %v578_v10 = vpop.xlane.xlu0 %577  ;;  %v582_v11 = vpop.xlane.xlu1 %581 }
 0x135   : > { %v610_v12 = vmul.f32 0.0078125, %v578_v10  ;;  %v612_v14 = vmul.f32 0.0078125, %v582_v11 }
 0x137   : > { %v8462_v13 = vsub.f32 %v559_v0, %v610_v12  ;;  %v8468_v21 = vsub.f32 %v561_v1, %v612_v14  ;;  %v7295_v0 = vld [vmem:[#allocation5 + $0x1c] ss:$12 sps:$4 sm:$0xff]  }
 0x138   : > { %v580_v15 = vpop.xlane.xlu0 %579  ;;  %v584_v16 = vpop.xlane.xlu1 %583  ;;  %v7297_v1 = vld [vmem:[#allocation5 + $0x50] ss:$12 sps:$4 sm:$0xff]   ;;  %995 = vmatprep.subr.bf16.mxu0 %v7295_v0 }
 0x139   : > { %v611_v17 = vmul.f32 0.0078125, %v580_v15  ;;  %v642_v18 = vmul.f32 %v8462_v13, %v8462_v13  ;;  %v613_v20 = vmul.f32 0.0078125, %v584_v16  ;;  %v644_v24 = vmul.f32 %v8468_v21, %v8468_v21  ;;  %6678 = vmatprep.subr.bf16.mxu1 %v7297_v1 }
 0x13a   : > { %6679 = vmatpush3.bf16.msra.mxu1 %v7297_v1 }
 0x13b   : > { %658 = vadd.xlane.f32.xlu0 %v642_v18  ;;  %v8466_v19 = vsub.f32 %v560_v2, %v611_v17  ;;  %v8478_v25 = vsub.f32 %v562_v3, %v613_v20  ;;  %v7298_v2 = vld [vmem:[#allocation5 + $0x18] ss:$12 sps:$4 sm:$0xff]  }
 0x13c   : > { %v586_v27 = vpop.xlane.xlu0 %585  ;;  %v588_v31 = vpop.xlane.xlu1 %587  ;;  %996 = vmatpush1.bf16.msra.mxu0 %v7298_v2  ;;  %v7299_v3 = vld [vmem:[#allocation5 + $0x4] ss:$12 sps:$4 sm:$0xff]  }
 0x13d   : > { %v643_v23 = vmul.f32 %v8466_v19, %v8466_v19  ;;  %v645_v28 = vmul.f32 %v8478_v25, %v8478_v25  ;;  %v614_v33 = vmul.f32 0.0078125, %v586_v27  ;;  %v615_v40 = vmul.f32 0.0078125, %v588_v31  ;;  %997 = vmatprep.subr.bf16.mxu0 %v7299_v3 }
 0x13f   : > { %593 = vadd.xlane.f32.xlu0 %v8471_v22  ;;  %660 = vadd.xlane.f32.xlu1 %v643_v23  ;;  %v8498_v42 = vsub.f32 %v563_v4, %v614_v33  ;;  %v8511_v51 = vsub.f32 %v8451_v5, %v615_v40  ;;  %v7301_v4 = vld [vmem:[#allocation5 + $0x38] ss:$12 sps:$4 sm:$0xff]   ;;  %v7302_v5 = vld [vmem:[#allocation5] ss:$12 sps:$4 sm:$0xff]  }
 0x140   : > { %v590_v36 = vpop.xlane.xlu0 %589  ;;  %v592_v45 = vpop.xlane.xlu1 %591  ;;  %6680 = vmatprep.subr.bf16.mxu1 %v7301_v4  ;;  %998 = vmatpush1.bf16.msra.mxu0 %v7302_v5 }
 0x141   : > { %v616_v41 = vmul.f32 0.0078125, %v590_v36  ;;  %v646_v49 = vmul.f32 %v8498_v42, %v8498_v42  ;;  %v617_v50 = vmul.f32 0.0078125, %v592_v45  ;;  %v647_v57 = vmul.f32 %v8511_v51, %v8511_v51  ;;  %6681 = vmatpush3.bf16.msra.mxu1 %v7301_v4 }
 0x143   : > { %662 = vadd.xlane.f32.xlu0 %v644_v24  ;;  %595 = vadd.xlane.f32.xlu1 %v8481_v26  ;;  %v8514_v52 = vsub.f32 %v8454_v6, %v616_v41  ;;  %v8525_v59 = vsub.f32 %v8457_v7, %v617_v50  ;;  %v7303_v6 = vld [vmem:[#allocation5 + $0x20] ss:$12 sps:$4 sm:$0xff]   ;;  %v10599_v7 = vmov 0  }
 0x144   : > { %1015 = vmatprep.mubr.bf16.mxu0 %v10599_v7  ;;  %6682 = vmatprep.subr.bf16.mxu1 %v7303_v6 }
 0x145   : > { %v648_v58 = vmul.f32 %v8514_v52, %v8514_v52  ;;  %v649_v63 = vmul.f32 %v8525_v59, %v8525_v59  ;;  %6683 = vmatpush3.bf16.msra.mxu1 %v7303_v6 }
 0x146   : > { %6684 = vmatprep.subr.bf16.mxu1 %v7304_v8 }
 0x147   : > { %597 = vadd.xlane.f32.xlu0 %v8487_v29  ;;  %664 = vadd.xlane.f32.xlu1 %v645_v28 }
 0x149   : > { %6685 = vmatpush3.bf16.msra.mxu1 %v7304_v8 }
 0x14b   : > { %601 = vadd.xlane.f32.xlu0 %v8491_v34  ;;  %599 = vadd.xlane.f32.xlu1 %v8494_v35 }
 0x14f   : > { %605 = vadd.xlane.f32.xlu0 %v8501_v43  ;;  %603 = vadd.xlane.f32.xlu1 %v8504_v44 }
 0x153   : > { %607 = vadd.xlane.f32.xlu1 %v8517_v53  ;;  %666 = vadd.xlane.f32.xlu0 %v646_v49 }
 0x157   : > { %668 = vadd.xlane.f32.xlu1 %v647_v57  ;;  %670 = vadd.xlane.f32.xlu0 %v648_v58 }
 0x15b   : > { %672 = vadd.xlane.f32.xlu1 %v649_v63 }
 0x1c4   : > { %v659_v9 = vpop.xlane.xlu0 %658 }
 0x1c5   : > { %v690_v10 = vmul.f32 0.0078125, %v659_v9 }
 0x1c7   : > { %v706_v11 = vadd.f32 1e-05, %v690_v10 }
 0x1c8   : > { %v661_v12 = vpop.xlane.xlu1 %660  ;;  %v594_v14 = vpop.xlane.xlu0 %593 }
 0x1c9   : > { %7393 = vrsqrt.f32 %v706_v11  ;;  %v691_v15 = vmul.f32 0.0078125, %v661_v12  ;;  %v618_v16 = vmul.f32 0.0078125, %v594_v14 }
 0x1cb   : > { %v707_v17 = vadd.f32 1e-05, %v691_v15  ;;  %v8531_v18 = vsub.f32 %v8471_v22, %v618_v16 }
 0x1cc   : > { %v596_v20 = vpop.xlane.xlu1 %595  ;;  %v663_v23 = vpop.xlane.xlu0 %662 }
 0x1cd   : > { %7395 = vrsqrt.f32 %v707_v17  ;;  %v619_v24 = vmul.f32 0.0078125, %v596_v20  ;;  %v692_v27 = vmul.f32 0.0078125, %v663_v23  ;;  %v650_v28 = vmul.f32 %v8531_v18, %v8531_v18 }
 0x1cf   : > { %v708_v30 = vadd.f32 1e-05, %v692_v27  ;;  %674 = vadd.xlane.f32.xlu0 %v650_v28  ;;  %v8536_v31 = vsub.f32 %v8481_v26, %v619_v24 }
 0x1d0   : > { %v665_v32 = vpop.xlane.xlu1 %664  ;;  %v598_v33 = vpop.xlane.xlu0 %597 }
 0x1d1   : > { %7397 = vrsqrt.f32 %v708_v30  ;;  %v693_v36 = vmul.f32 0.0078125, %v665_v32  ;;  %v620_v37 = vmul.f32 0.0078125, %v598_v33  ;;  %v651_v22 = vmul.f32 %v8536_v31, %v8536_v31 }
 0x1d3   : > { %v709_v38 = vadd.f32 1e-05, %v693_v36  ;;  %676 = vadd.xlane.f32.xlu1 %v651_v22  ;;  %v8541_v39 = vsub.f32 %v8487_v29, %v620_v37 }
 0x1d4   : > { %v600_v40 = vpop.xlane.xlu1 %599  ;;  %v602_v41 = vpop.xlane.xlu0 %601 }
 0x1d5   : > { %7399 = vrsqrt.f32 %v709_v38  ;;  %v621_v45 = vmul.f32 0.0078125, %v600_v40  ;;  %v622_v46 = vmul.f32 0.0078125, %v602_v41  ;;  %v652_v26 = vmul.f32 %v8541_v39, %v8541_v39 }
 0x1d6   : > { %v7394_v47 = vpop.eup %7393 }
 0x1d7   : > { %678 = vadd.xlane.f32.xlu0 %v652_v26  ;;  %v8546_v48 = vsub.f32 %v8494_v35, %v621_v45  ;;  %v8549_v49 = vsub.f32 %v8491_v34, %v622_v46  ;;  %v738_v29 = vmul.f32 %v7394_v47, %v8462_v13  ;;  %v8559_v35 = vld [vmem:[%s10576_s1] ss:$0 sm:$0xff] }
 0x1d8   : > { %v604_v50 = vpop.xlane.xlu1 %603  ;;  %v606_v54 = vpop.xlane.xlu0 %605 }
 0x1d9   : > { %v623_v55 = vmul.f32 0.0078125, %v604_v50  ;;  %v624_v56 = vmul.f32 0.0078125, %v606_v54  ;;  %v653_v57 = vmul.f32 %v8546_v48, %v8546_v48  ;;  %v654_v58 = vmul.f32 %v8549_v49, %v8549_v49 }
 0x1da   : > { %v7396_v60 = vpop.eup %7395  ;;  %v760_v0 = vmul.f32 %v8559_v35, %v738_v29 }
 0x1db   : > { %680 = vadd.xlane.f32.xlu1 %v653_v57  ;;  %682 = vadd.xlane.f32.xlu0 %v654_v58  ;;  %v8562_v34 = vsub.f32 %v8504_v44, %v623_v55  ;;  %v8565_v13 = vsub.f32 %v8501_v43, %v624_v56  ;;  %v739_v61 = vmul.f32 %v7396_v60, %v8466_v19  ;;  %v8576_v44 = vld [vmem:[%s10577_s2] ss:$0 sm:$0xff] }
 0x1dc   : > { %v608_v62 = vpop.xlane.xlu1 %607  ;;  %v667_v63 = vpop.xlane.xlu0 %666  ;;  %v782_v11 = vadd.f32 %v8576_v44, %v760_v0 }
 0x1dd   : > { %v625_v1 = vmul.f32 0.0078125, %v608_v62  ;;  %v694_v2 = vmul.f32 0.0078125, %v667_v63  ;;  %v655_v3 = vmul.f32 %v8562_v34, %v8562_v34  ;;  %v656_v4 = vmul.f32 %v8565_v13, %v8565_v13 }
 0x1de   : > { %v7398_v43 = vpop.eup %7397  ;;  %v761_v19 = vmul.f32 %v8559_v35, %v739_v61 }
 0x1df   : > { %v710_v5 = vadd.f32 1e-05, %v694_v2  ;;  %684 = vadd.xlane.f32.xlu1 %v655_v3  ;;  %686 = vadd.xlane.f32.xlu0 %v656_v4  ;;  %v8580_v6 = vsub.f32 %v8517_v53, %v625_v1  ;;  %v740_v8 = vmul.f32 %v7398_v43, %v8468_v21 }
 0x1e0   : > { %v669_v9 = vpop.xlane.xlu1 %668  ;;  %v671_v10 = vpop.xlane.xlu0 %670  ;;  %v783_v12 = vadd.f32 %v8576_v44, %v761_v19 }
 0x1e1   : > { %7401 = vrsqrt.f32 %v710_v5  ;;  %v695_v14 = vmul.f32 0.0078125, %v669_v9  ;;  %v696_v15 = vmul.f32 0.0078125, %v671_v10  ;;  %v657_v16 = vmul.f32 %v8580_v6, %v8580_v6 }
 0x1e2   : > { %v7400_v17 = vpop.eup %7399  ;;  %v798_v20 = vpack.c.bf16 %v783_v12, %v782_v11  ;;  %v762_v21 = vmul.f32 %v8559_v35, %v740_v8 }
 0x1e3   : > { %v711_v23 = vadd.f32 1e-05, %v695_v14  ;;  %v712_v24 = vadd.f32 1e-05, %v696_v15  ;;  %688 = vadd.xlane.f32.xlu1 %v657_v16  ;;  %v741_v53 = vmul.f32 %v7400_v17, %v8478_v25 }
 0x1e4   : > { %1016 = vmatmul.mubr.bf16.vlgmr.msra.gmra.mxu0 %v798_v20  ;;  %6686 = vmatprep.mubr.bf16.mxu1 %v798_v20  ;;  %v673_v27 = vpop.xlane.xlu1 %672  ;;  %v784_v33 = vadd.f32 %v8576_v44, %v762_v21 }
 0x1e5   : > { %7403 = vrsqrt.f32 %v711_v23  ;;  %v697_v28 = vmul.f32 0.0078125, %v673_v27  ;;  %1025 = vmatprep.mubr.bf16.mxu0 %v10599_v7  ;;  %v763_v30 = vmul.f32 %v8559_v35, %v741_v53 }
 0x1e6   : > { %7405 = vrsqrt.f32 %v712_v24 }
 0x1e7   : > { %v713_v32 = vadd.f32 1e-05, %v697_v28  ;;  %v785_v36 = vadd.f32 %v8576_v44, %v763_v30 }
 0x1e9   : > { %7407 = vrsqrt.f32 %v713_v32  ;;  %v799_v37 = vpack.c.bf16 %v785_v36, %v784_v33 }
 0x1eb   : > { %6687 = vmatmul.mubr.bf16.vlgmr.msra.gmra.mxu1 %v799_v37 }
 0x1ec   : > { %1026 = vmatmul.mubr.bf16.gmra.mxu0 %v799_v37 }
 0x1ed   : > { %1035 = vmatprep.mubr.bf16.mxu0 %v10599_v7 }
 0x1ee   : > { %v7402_v25 = vpop.eup %7401 }
 0x1ef   : > { %v742_v22 = vmul.f32 %v7402_v25, %v8498_v42 }
 0x1f1   : > { %v764_v45 = vmul.f32 %v8559_v35, %v742_v22 }
 0x1f2   : > { %v7404_v38 = vpop.eup %7403 }
 0x1f3   : > { %v7406_v40 = vpop.eup %7405  ;;  %v743_v41 = vmul.f32 %v7404_v38, %v8511_v51  ;;  %v786_v50 = vadd.f32 %v8576_v44, %v764_v45 }
 0x1f4   : > { %v744_v46 = vmul.f32 %v7406_v40, %v8514_v52 }
 0x1f5   : > { %v765_v26 = vmul.f32 %v8559_v35, %v743_v41 }
 0x1f6   : > { %v7408_v47 = vpop.eup %7407  ;;  %v766_v55 = vmul.f32 %v8559_v35, %v744_v46 }
 0x1f7   : > { %v787_v54 = vadd.f32 %v8576_v44, %v765_v26  ;;  %v745_v29 = vmul.f32 %v7408_v47, %v8525_v59 }
 0x1f8   : > { %v788_v51 = vadd.f32 %v8576_v44, %v766_v55 }
 0x1f9   : > { %v800_v42 = vpack.c.bf16 %v787_v54, %v786_v50  ;;  %v767_v56 = vmul.f32 %v8559_v35, %v745_v29 }
 0x1fb   : > { %1036 = vmatmul.mubr.bf16.gmra.mxu0 %v800_v42  ;;  %6690 = vmatprep.mubr.bf16.mxu1 %v800_v42  ;;  %v789_v52 = vadd.f32 %v8576_v44, %v767_v56 }
 0x1fc   : > { %1045 = vmatprep.mubr.bf16.mxu0 %v10599_v7 }
 0x1fd   : > { %v801_v57 = vpack.c.bf16 %v789_v52, %v788_v51 }
 0x1ff   : > { %6691 = vmatmul.mubr.bf16.gmra.mxu1 %v801_v57 }
 0x203   : > { %1046 = vmatmul.mubr.bf16.gmra.mxu0 %v801_v57 }
 0x204   : > { %1055 = vmatprep.mubr.bf16.mxu0 %v10599_v7 }
 0x258   : > { %v675_v58 = vpop.xlane.xlu0 %674 }
 0x259   : > { %v698_v59 = vmul.f32 0.0078125, %v675_v58  ;;  %v840_v58 = vlaneseq }
 0x25b   : > { %v714_v60 = vadd.f32 1e-05, %v698_v59 }
 0x25c   : > { %v677_v61 = vpop.xlane.xlu1 %676 }
 0x25d   : > { %7409 = vrsqrt.f32 %v714_v60  ;;  %v699_v62 = vmul.f32 0.0078125, %v677_v61 }
 0x25f   : > { %v715_v63 = vadd.f32 1e-05, %v699_v62 }
 0x260   : > { %v679_v0 = vpop.xlane.xlu0 %678 }
 0x261   : > { %7411 = vrsqrt.f32 %v715_v63  ;;  %v700_v1 = vmul.f32 0.0078125, %v679_v0 }
 0x263   : > { %v716_v2 = vadd.f32 1e-05, %v700_v1 }
 0x264   : > { %v681_v3 = vpop.xlane.xlu1 %680  ;;  %v683_v4 = vpop.xlane.xlu0 %682 }
 0x265   : > { %7413 = vrsqrt.f32 %v716_v2  ;;  %v701_v43 = vmul.f32 0.0078125, %v681_v3  ;;  %v702_v19 = vmul.f32 0.0078125, %v683_v4 }
 0x267   : > { %v717_v5 = vadd.f32 1e-05, %v701_v43  ;;  %v718_v8 = vadd.f32 1e-05, %v702_v19 }
 0x268   : > { %v685_v9 = vpop.xlane.xlu1 %684  ;;  %v687_v10 = vpop.xlane.xlu0 %686 }
 0x269   : > { %7415 = vrsqrt.f32 %v717_v5  ;;  %v703_v11 = vmul.f32 0.0078125, %v685_v9  ;;  %v704_v12 = vmul.f32 0.0078125, %v687_v10 }
 0x26a   : > { %v7410_v14 = vpop.eup %7409  ;;  %7417 = vrsqrt.f32 %v718_v8 }
 0x26b   : > { %v719_v15 = vadd.f32 1e-05, %v703_v11  ;;  %v720_v16 = vadd.f32 1e-05, %v704_v12  ;;  %v746_v17 = vmul.f32 %v7410_v14, %v8531_v18 }
 0x26c   : > { %v689_v20 = vpop.xlane.xlu1 %688 }
 0x26d   : > { %7419 = vrsqrt.f32 %v719_v15  ;;  %v705_v23 = vmul.f32 0.0078125, %v689_v20  ;;  %v768_v27 = vmul.f32 %v8559_v35, %v746_v17 }
 0x26e   : > { %v7412_v24 = vpop.eup %7411  ;;  %7421 = vrsqrt.f32 %v720_v16 }
 0x26f   : > { %v721_v53 = vadd.f32 1e-05, %v705_v23  ;;  %v747_v21 = vmul.f32 %v7412_v24, %v8536_v31  ;;  %v790_v32 = vadd.f32 %v8576_v44, %v768_v27 }
 0x271   : > { %7423 = vrsqrt.f32 %v721_v53  ;;  %v769_v28 = vmul.f32 %v8559_v35, %v747_v21 }
 0x272   : > { %v7414_v30 = vpop.eup %7413 }
 0x273   : > { %v791_v33 = vadd.f32 %v8576_v44, %v769_v28  ;;  %v748_v18 = vmul.f32 %v7414_v30, %v8541_v39 }
 0x275   : > { %v802_v36 = vpack.c.bf16 %v791_v33, %v790_v32  ;;  %v770_v31 = vmul.f32 %v8559_v35, %v748_v18 }
 0x276   : > { %v7416_v37 = vpop.eup %7415 }
 0x277   : > { %v7418_v25 = vpop.eup %7417  ;;  %1056 = vmatmul.mubr.bf16.gmra.mxu0 %v802_v36  ;;  %6694 = vmatprep.mubr.bf16.mxu1 %v802_v36  ;;  %v749_v22 = vmul.f32 %v7416_v37, %v8546_v48  ;;  %v792_v39 = vadd.f32 %v8576_v44, %v770_v31 }
 0x278   : > { %1065 = vmatprep.mubr.bf16.mxu0 %v10599_v7  ;;  %v750_v38 = vmul.f32 %v7418_v25, %v8549_v49 }
 0x279   : > { %v771_v40 = vmul.f32 %v8559_v35, %v749_v22 }
 0x27a   : > { %v7420_v41 = vpop.eup %7419  ;;  %v772_v45 = vmul.f32 %v8559_v35, %v750_v38 }
 0x27b   : > { %v7422_v46 = vpop.eup %7421  ;;  %v793_v26 = vadd.f32 %v8576_v44, %v771_v40  ;;  %v751_v47 = vmul.f32 %v7420_v41, %v8562_v34 }
 0x27c   : > { %v752_v48 = vmul.f32 %v7422_v46, %v8565_v13  ;;  %v794_v49 = vadd.f32 %v8576_v44, %v772_v45 }
 0x27d   : > { %v803_v50 = vpack.c.bf16 %v793_v26, %v792_v39  ;;  %v773_v54 = vmul.f32 %v8559_v35, %v751_v47 }
 0x27e   : > { %v7424_v29 = vpop.eup %7423  ;;  %v774_v56 = vmul.f32 %v8559_v35, %v752_v48 }
 0x27f   : > { %1066 = vmatmul.mubr.bf16.gmra.mxu0 %v803_v50  ;;  %6695 = vmatmul.mubr.bf16.gmra.mxu1 %v803_v50  ;;  %v795_v55 = vadd.f32 %v8576_v44, %v773_v54  ;;  %v753_v42 = vmul.f32 %v7424_v29, %v8580_v6  ;;  %v8635_v6 = vshrl.u32 %v840_v58, 7 }
 0x280   : > { %1075 = vmatprep.mubr.bf16.mxu0 %v10599_v7  ;;  %v796_v13 = vadd.f32 %v8576_v44, %v774_v56 }
 0x281   : > { %v804_v51 = vpack.c.bf16 %v795_v55, %v794_v49  ;;  %v775_v34 = vmul.f32 %v8559_v35, %v753_v42  ;;  %10699 = vst [vmem:[#allocation23_spill] sm:$0xff] %v8635_v6  ;;  %v10598_v59 = vsub.s32 0, %v8635_v6  ;;  %v8641_v35 = vld [vmem:[%s10579_s4] sm:$0x7]  ;;  %v10596_v60 = vsub.s32 1, %v8635_v6 }
 0x283   : > { %6698 = vmatprep.mubr.bf16.mxu1 %v804_v51  ;;  %v797_v52 = vadd.f32 %v8576_v44, %v775_v34  ;;  %v8646_v44 = vrot.slane %v8641_v35, %v10598_v59  ;;  %v8653_v0 = vrot.slane %v8641_v35, %v10596_v60 }
 0x285   : > { %v805_v57 = vpack.c.bf16 %v797_v52, %v796_v13 }
 0x287   : > { %1076 = vmatmul.mubr.bf16.gmra.mxu0 %v804_v51  ;;  %6699 = vmatmul.mubr.bf16.gmra.mxu1 %v805_v57 }
 0x288   : > { %1085 = vmatprep.mubr.bf16.mxu0 %v10599_v7 }
 0x28f   : > { %1086 = vmatmul.mubr.bf16.gmra.mxu0 %v805_v57 }
 0x2a4   : > { %v1017_v61 = vpop.f32.mrf.mxu0 }
 0x2a5   : > { %v1018_v63 = vadd.f32 %v1017_v61, %v8646_v44 }
 0x2a6   : > { %v1019_v62 = vpop.f32.mrf.mxu0 }
 0x2a7   : > { %v1193_v4 = vmul.f32 0.088388346, %v1018_v63  ;;  %v1020_v43 = vadd.f32 %v1019_v62, %v8653_v0 }
 0x2a8   : > { %v1021_v1 = vpop.f32.mrf.mxu0 }
 0x2a9   : > { %v1022_v2 = vadd.f32 %v1021_v1, %v8646_v44 }
 0x2aa   : > { %v1023_v3 = vpop.f32.mrf.mxu0 }
 0x2ab   : > { %v1194_v19 = vmul.f32 0.088388346, %v1022_v2  ;;  %v1024_v5 = vadd.f32 %v1023_v3, %v8653_v0 }
 0x2ac   : > { %v1027_v8 = vpop.f32.mrf.mxu0 }
 0x2ad   : > { %v1209_v9 = vpack.c.bf16 %v1194_v19, %v1193_v4  ;;  %v1217_v10 = vpack.c.bf16 %v1024_v5, %v1020_v43  ;;  %v1028_v20 = vadd.f32 %v1027_v8, %v8646_v44 }
 0x2ae   : > { %v1029_v11 = vpop.f32.mrf.mxu0 }
 0x2af   : > { %1297 = vrot.lane.b32.xlu1 %v1217_v10, %s8166_s22  ;;  %6706 = vmatprep.mubr.msk.bf16.mxu1 %vm1425_vm0, %v1209_v9  ;;  %v1030_v16 = vadd.f32 %v1029_v11, %v8653_v0  ;;  %v1195_v21 = vmul.f32 0.088388346, %v1028_v20  ;;  %v1433_v18 = vsel %vm1425_vm0, %v1217_v10, 0 }
 0x2b0   : > { %v1031_v12 = vpop.f32.mrf.mxu0 }
 0x2b1   : > { %v1032_v14 = vadd.f32 %v1031_v12, %v8646_v44 }
 0x2b2   : > { %v1033_v15 = vpop.f32.mrf.mxu0 }
 0x2b3   : > { %v1034_v17 = vadd.f32 %v1033_v15, %v8653_v0  ;;  %1241 = vrot.lane.b32.xlu1 %v1209_v9, %s8166_s22  ;;  %v1196_v24 = vmul.f32 0.088388346, %v1032_v14 }
 0x2b5   : > { %v1218_v23 = vpack.c.bf16 %v1034_v17, %v1030_v16  ;;  %v1210_v27 = vpack.c.bf16 %v1196_v24, %v1195_v21 }
 0x2b7   : > { %1315 = vrot.lane.b32.xlu1 %v1218_v23, %s8167_s30  ;;  %6990 = vmatprep.subr.msk.bf16.mxu1 %vm1425_vm0, %v1218_v23  ;;  %v1436_v53 = vsel %vm1425_vm0, %v1218_v23, 0 }
 0x2b8   : > { %1299 = vrot.lane.b32.xlu0 %v1218_v23, %s8166_s22  ;;  %6703 = vmatpush3.bf16.xpose.msra.mxu1 %v1436_v53 }
 0x2b9   : > { %6991 = vmatprep.subr.msk.bf16.mxu1 %vm1425_vm0, %v1217_v10 }
 0x2bb   : > { %1313 = vrot.lane.b32.xlu1 %v1217_v10, %s8167_s30  ;;  %v1037_v28 = vpop.f32.mrf.mxu0 }
 0x2bc   : > { %1243 = vrot.lane.b32.xlu0 %v1210_v27, %s8166_s22  ;;  %v1038_v32 = vadd.f32 %v1037_v28, %v8646_v44 }
 0x2bd   : > { %v1039_v30 = vpop.f32.mrf.mxu0 }
 0x2be   : > { %v1197_v25 = vmul.f32 0.088388346, %v1038_v32  ;;  %v1040_v47 = vadd.f32 %v1039_v30, %v8653_v0 }
 0x2bf   : > { %1331 = vrot.lane.b32.xlu1 %v1218_v23, %s8168_s16  ;;  %v1041_v33 = vpop.f32.mrf.mxu0 }
 0x2c0   : > { %1257 = vrot.lane.b32.xlu0 %v1209_v9, %s8167_s30  ;;  %v1042_v36 = vadd.f32 %v1041_v33, %v8646_v44  ;;  %6705 = vmatpush3.bf16.xpose.msra.mxu1 %v1433_v18 }
 0x2c1   : > { %v1043_v37 = vpop.f32.mrf.mxu0 }
 0x2c2   : > { %v1198_v22 = vmul.f32 0.088388346, %v1042_v36  ;;  %v1044_v46 = vadd.f32 %v1043_v37, %v8653_v0 }
 0x2c3   : > { %1329 = vrot.lane.b32.xlu1 %v1217_v10, %s8168_s16  ;;  %v1047_v31 = vpop.f32.mrf.mxu0 }
 0x2c4   : > { %v1211_v38 = vpack.c.bf16 %v1198_v22, %v1197_v25  ;;  %1259 = vrot.lane.b32.xlu0 %v1210_v27, %s8167_s30  ;;  %v1219_v50 = vpack.c.bf16 %v1044_v46, %v1040_v47  ;;  %v1048_v49 = vadd.f32 %v1047_v31, %v8646_v44 }
 0x2c5   : > { %v1049_v40 = vpop.f32.mrf.mxu0 }
 0x2c6   : > { %6738 = vmatprep.mubr.msk.bf16.mxu0 %vm1425_vm0, %v1211_v38  ;;  %v1050_v39 = vadd.f32 %v1049_v40, %v8653_v0  ;;  %v1199_v42 = vmul.f32 0.088388346, %v1048_v49  ;;  %v1677_v56 = vsel %vm1425_vm0, %v1219_v50, 0 }
 0x2c7   : > { %6707 = vmatmul.mubr.msk.bf16.vlgmr.msra.gmra.mxu1 %vm1425_vm0, %v1210_v27  ;;  %v1051_v41 = vpop.f32.mrf.mxu0 }
 0x2c8   : > { %1273 = vrot.lane.b32.xlu0 %v1209_v9, %s8168_s16  ;;  %v1052_v29 = vadd.f32 %v1051_v41, %v8646_v44 }
 0x2c9   : > { %v1053_v45 = vpop.f32.mrf.mxu0 }
 0x2ca   : > { %v1054_v26 = vadd.f32 %v1053_v45, %v8653_v0  ;;  %v1200_v55 = vmul.f32 0.088388346, %v1052_v29 }
 0x2cc   : > { %v1220_v48 = vpack.c.bf16 %v1054_v26, %v1050_v39  ;;  %1275 = vrot.lane.b32.xlu0 %v1210_v27, %s8168_s16  ;;  %v1212_v51 = vpack.c.bf16 %v1200_v55, %v1199_v42  ;;  %v8759_v55 = vpop.f32.mrf.mxu1 }
 0x2ce   : > { %1303 = vrot.lane.b32.xlu1 %v1220_v48, %s8166_s22  ;;  %6998 = vmatprep.subr.msk.bf16.mxu0 %vm1425_vm0, %v1220_v48  ;;  %v1680_v54 = vsel %vm1425_vm0, %v1220_v48, 0 }
 0x2cf   : > { %6735 = vmatpush3.bf16.xpose.msra.mxu0 %v1680_v54 }
 0x2d0   : > { %1319 = vrot.lane.b32.xlu0 %v1220_v48, %s8167_s30  ;;  %6999 = vmatprep.subr.msk.bf16.mxu0 %vm1425_vm0, %v1219_v50 }
 0x2d2   : > { %1301 = vrot.lane.b32.xlu1 %v1219_v50, %s8166_s22 }
 0x2d4   : > { %1335 = vrot.lane.b32.xlu0 %v1220_v48, %s8168_s16 }
 0x2d6   : > { %1245 = vrot.lane.b32.xlu1 %v1211_v38, %s8166_s22 }
 0x2d7   : > { %6737 = vmatpush3.bf16.xpose.msra.mxu0 %v1677_v56 }
 0x2d8   : > { %1317 = vrot.lane.b32.xlu0 %v1219_v50, %s8167_s30 }
 0x2da   : > { %1247 = vrot.lane.b32.xlu1 %v1212_v51, %s8166_s22 }
 0x2dc   : > { %1261 = vrot.lane.b32.xlu0 %v1211_v38, %s8167_s30 }
 0x2de   : > { %1333 = vrot.lane.b32.xlu1 %v1219_v50, %s8168_s16  ;;  %6739 = vmatmul.mubr.msk.bf16.vlgmr.msra.gmra.mxu0 %vm1425_vm0, %v1212_v51 }
 0x2e0   : > { %1277 = vrot.lane.b32.xlu0 %v1211_v38, %s8168_s16 }
 0x2e2   : > { %1263 = vrot.lane.b32.xlu1 %v1212_v51, %s8167_s30 }
 0x2e4   : > { %1279 = vrot.lane.b32.xlu0 %v1212_v51, %s8168_s16 }
 0x321   : > { %v1298_v34 = vpop.permute.xlu1 %1297 }
 0x322   : > { %v1494_v1 = vsel %vm1425_vm0, %v1298_v34, 0 }
 0x325   : > { %v1242_v13 = vpop.permute.xlu1 %1241 }
 0x326   : > { %6714 = vmatprep.mubr.msk.bf16.mxu1 %vm1425_vm0, %v1242_v13 }
 0x329   : > { %v1316_v52 = vpop.permute.xlu1 %1315 }
 0x32a   : > { %v1300_v57 = vpop.permute.xlu0 %1299  ;;  %v1558_v5 = vsel %vm1425_vm0, %v1316_v52, 0 }
 0x32b   : > { %6992 = vmatprep.subr.msk.bf16.mxu1 %vm1425_vm0, %v1300_v57  ;;  %v1497_v58 = vsel %vm1425_vm0, %v1300_v57, 0  ;;  %v8765_v57 = vpop.f32.mrf.mxu1 }
 0x32c   : > { %6711 = vmatpush3.bf16.xpose.msra.mxu1 %v1497_v58 }
 0x32d   : > { %6993 = vmatprep.subr.msk.bf16.mxu1 %vm1425_vm0, %v1298_v34  ;;  %v1314_v62 = vpop.permute.xlu1 %1313 }
 0x32e   : > { %v1244_v61 = vpop.permute.xlu0 %1243  ;;  %v1555_v17 = vsel %vm1425_vm0, %v1314_v62, 0 }
 0x331   : > { %v1332_v2 = vpop.permute.xlu1 %1331 }
 0x332   : > { %v1258_v63 = vpop.permute.xlu0 %1257  ;;  %v1619_v38 = vsel %vm1425_vm0, %v1332_v2, 0 }
 0x334   : > { %6713 = vmatpush3.bf16.xpose.msra.mxu1 %v1494_v1 }
 0x335   : > { %6994 = vmatprep.subr.msk.bf16.mxu1 %vm1425_vm0, %v1316_v52  ;;  %v8714_v9 = vpop.permute.xlu1 %1329 }
 0x336   : > { %v1260_v3 = vpop.permute.xlu0 %1259  ;;  %v1616_v13 = vsel %vm1425_vm0, %v8714_v9, 0 }
 0x337   : > { %v1057_v4 = vpop.f32.mrf.mxu0 }
 0x338   : > { %v1058_v22 = vadd.f32 %v1057_v4, %v8646_v44 }
 0x339   : > { %v1059_v43 = vpop.f32.mrf.mxu0 }
 0x33a   : > { %v1274_v19 = vpop.permute.xlu0 %1273  ;;  %v1060_v31 = vadd.f32 %v1059_v43, %v8653_v0  ;;  %v1201_v50 = vmul.f32 0.088388346, %v1058_v22 }
 0x33b   : > { %6715 = vmatmul.mubr.msk.bf16.vlgmr.msra.gmra.mxu1 %vm1425_vm0, %v1244_v61  ;;  %v1061_v8 = vpop.f32.mrf.mxu0 }
 0x33c   : > { %6719 = vmatpush3.bf16.xpose.msra.mxu1 %v1558_v5  ;;  %6722 = vmatprep.mubr.msk.bf16.mxu1 %vm1425_vm0, %v1258_v63  ;;  %v1062_v18 = vadd.f32 %v1061_v8, %v8646_v44  ;;  %v6689_v63 = vpop.f32.mrf.mxu1 }
 0x33d   : > { %6995 = vmatprep.subr.msk.bf16.mxu1 %vm1425_vm0, %v1314_v62  ;;  %v1063_v10 = vpop.f32.mrf.mxu0 }
 0x33e   : > { %v8718_v11 = vpop.permute.xlu0 %1275  ;;  %v1064_v36 = vadd.f32 %v1063_v10, %v8653_v0  ;;  %v1202_v46 = vmul.f32 0.088388346, %v1062_v18  ;;  %v1133_v4 = vpop.f32.mrf.mxu1 }
 0x33f   : > { %v1067_v12 = vpop.f32.mrf.mxu0 }
 0x340   : > { %v8720_v14 = vpop.permute.xlu1 %1303  ;;  %v1221_v39 = vpack.c.bf16 %v1064_v36, %v1060_v31  ;;  %v1068_v54 = vadd.f32 %v1067_v12, %v8646_v44  ;;  %v1213_v42 = vpack.c.bf16 %v1202_v46, %v1201_v50  ;;  %v6692_v5 = vpop.f32.mrf.mxu1 }
 0x341   : > { %v1069_v15 = vpop.f32.mrf.mxu0 }
 0x342   : > { %v1320_v16 = vpop.permute.xlu0 %1319  ;;  %v1070_v21 = vadd.f32 %v1069_v15, %v8653_v0  ;;  %v1203_v34 = vmul.f32 0.088388346, %v1068_v54  ;;  %v1921_v43 = vsel %vm1425_vm0, %v1221_v39, 0 }
 0x343   : > { %7002 = vmatprep.subr.msk.bf16.mxu0 %vm1425_vm0, %v1320_v16  ;;  %v1802_v20 = vsel %vm1425_vm0, %v1320_v16, 0  ;;  %v1071_v23 = vpop.f32.mrf.mxu0 }
 0x344   : > { %6721 = vmatpush3.bf16.xpose.msra.mxu1 %v1555_v17  ;;  %6751 = vmatpush3.bf16.xpose.msra.mxu0 %v1802_v20  ;;  %v8725_v24 = vpop.permute.xlu1 %1301  ;;  %v1072_v26 = vadd.f32 %v1071_v23, %v8646_v44 }
 0x345   : > { %6996 = vmatprep.subr.msk.bf16.mxu1 %vm1425_vm0, %v1332_v2  ;;  %v1073_v53 = vpop.f32.mrf.mxu0  ;;  %v1741_v2 = vsel %vm1425_vm0, %v8720_v14, 0  ;;  %v1738_v15 = vsel %vm1425_vm0, %v8725_v24, 0 }
 0x346   : > { %v8729_v27 = vpop.permute.xlu0 %1335  ;;  %v1074_v28 = vadd.f32 %v1073_v53, %v8653_v0  ;;  %v1204_v56 = vmul.f32 0.088388346, %v1072_v26 }
 0x347   : > { %v8732_v30 = vpop.f32.mrf.mxu0 }
 0x348   : > { %v1222_v32 = vpack.c.bf16 %v1074_v28, %v1070_v21  ;;  %v1246_v33 = vpop.permute.xlu1 %1245  ;;  %v1214_v58 = vpack.c.bf16 %v1204_v56, %v1203_v34  ;;  %v1078_v12 = vadd.f32 %v8732_v30, %v8646_v44  ;;  %v10597_v28 = vsub.s32 2, %v8635_v6 }
 0x349   : > { %v8736_v37 = vpop.f32.mrf.mxu0 }
 0x34a   : > { %v1318_v25 = vpop.permute.xlu0 %1317  ;;  %1323 = vrot.lane.b32.xlu0 %v1222_v32, %s8167_s30  ;;  %1307 = vrot.lane.b32.xlu1 %v1222_v32, %s8166_s22  ;;  %v1924_v62 = vsel %vm1425_vm0, %v1222_v32, 0  ;;  %v1205_v23 = vmul.f32 0.088388346, %v1078_v12 }
 0x34b   : > { %6723 = vmatmul.mubr.msk.bf16.vlgmr.msra.gmra.mxu1 %vm1425_vm0, %v1260_v3  ;;  %7003 = vmatprep.subr.msk.bf16.mxu0 %vm1425_vm0, %v1318_v25  ;;  %v1799_v40 = vsel %vm1425_vm0, %v1318_v25, 0  ;;  %v1081_v41 = vpop.f32.mrf.mxu0 }
 0x34c   : > { %6727 = vmatpush3.bf16.xpose.msra.mxu1 %v1619_v38  ;;  %6730 = vmatprep.mubr.msk.bf16.mxu1 %vm1425_vm0, %v1274_v19  ;;  %v8747_v45 = vpop.permute.xlu1 %1247 }
 0x34d   : > { %6753 = vmatpush3.bf16.xpose.msra.mxu0 %v1799_v40  ;;  %6997 = vmatprep.subr.msk.bf16.mxu1 %vm1425_vm0, %v8714_v9  ;;  %v1083_v47 = vpop.f32.mrf.mxu0  ;;  %v1082_v9 = vadd.f32 %v1081_v41, %v8646_v44 }
 0x34e   : > { %7006 = vmatprep.subr.msk.bf16.mxu0 %vm1425_vm0, %v1222_v32  ;;  %v1262_v48 = vpop.permute.xlu0 %1261  ;;  %1339 = vrot.lane.b32.xlu0 %v1222_v32, %s8168_s16  ;;  %v1084_v10 = vadd.f32 %v1083_v47, %v8653_v0 }
 0x34f   : > { %6754 = vmatprep.mubr.msk.bf16.mxu0 %vm1425_vm0, %v1262_v48  ;;  %1305 = vrot.lane.b32.xlu1 %v1221_v39, %s8166_s22  ;;  %v1087_v29 = vpop.f32.mrf.mxu0  ;;  %v1206_v16 = vmul.f32 0.088388346, %v1082_v9 }
 0x350   : > { %v8757_v49 = vpop.permute.xlu1 %1333  ;;  %v1088_v53 = vadd.f32 %v1087_v29, %v8646_v44 }
 0x351   : > { %v1089_v51 = vpop.f32.mrf.mxu0  ;;  %v1860_v31 = vsel %vm1425_vm0, %v8757_v49, 0 }
 0x352   : > { %1321 = vrot.lane.b32.xlu0 %v1221_v39, %s8167_s30  ;;  %v1090_v19 = vadd.f32 %v1089_v51, %v8653_v0  ;;  %v1207_v32 = vmul.f32 0.088388346, %v1088_v53 }
 0x353   : > { %1249 = vrot.lane.b32.xlu1 %v1213_v42, %s8166_s22  ;;  %v1091_v61 = vpop.f32.mrf.mxu0 }
 0x354   : > { %6729 = vmatpush3.bf16.xpose.msra.mxu1 %v1616_v13  ;;  %v1264_v52 = vpop.permute.xlu1 %1263  ;;  %v1092_v20 = vadd.f32 %v1091_v61, %v8646_v44  ;;  %v1863_v44 = vsel %vm1425_vm0, %v8729_v27, 0 }
 0x355   : > { %7000 = vmatprep.subr.msk.bf16.mxu1 %vm1425_vm0, %v8720_v14  ;;  %6755 = vmatmul.mubr.msk.bf16.vlgmr.msra.gmra.mxu0 %vm1425_vm0, %v1264_v52  ;;  %v1093_v1 = vpop.f32.mrf.mxu0  ;;  %v1080_v14 = vadd.f32 %v8736_v37, %v8653_v0  ;;  %v851_v37 = vrot.slane %v8641_v35, %v10597_v28 }
 0x356   : > { %6767 = vmatpush3.bf16.xpose.msra.mxu0 %v1924_v62  ;;  %1265 = vrot.lane.b32.xlu0 %v1213_v42, %s8167_s30  ;;  %v1094_v3 = vadd.f32 %v1093_v1, %v8653_v0  ;;  %v1208_v21 = vmul.f32 0.088388346, %v1092_v20 }
 0x357   : > { %1251 = vrot.lane.b32.xlu1 %v1214_v58, %s8166_s22  ;;  %7007 = vmatprep.subr.msk.bf16.mxu0 %vm1425_vm0, %v1221_v39  ;;  %v8803_v17 = vpack.c.bf16 %v1084_v10, %v1080_v14  ;;  %v1139_v22 = vadd.f32 %v8759_v55, %v851_v37  ;;  %v1134_v38 = vadd.f32 %v1133_v4, %v851_v37 }
 0x358   : > { %6770 = vmatprep.mubr.msk.bf16.mxu0 %vm1425_vm0, %v1213_v42  ;;  %v8789_v8 = vpack.c.bf16 %v1094_v3, %v1090_v19  ;;  %v8826_v36 = vpack.c.bf16 %v1208_v21, %v1207_v32  ;;  %v1131_v41 = vadd.f32 %v8765_v57, %v851_v37  ;;  %v1155_v26 = vadd.f32 %v6692_v5, %v851_v37 }
 0x35a   : > { %1281 = vrot.lane.b32.xlu0 %v1213_v42, %s8168_s16 }
 0x35b   : > { %6731 = vmatmul.mubr.msk.bf16.vlgmr.msra.gmra.mxu1 %vm1425_vm0, %v8718_v11  ;;  %1337 = vrot.lane.b32.xlu1 %v1221_v39, %s8168_s16  ;;  %v1146_v11 = vpop.f32.mrf.mxu1 }
 0x35c   : > { %6743 = vmatpush3.bf16.xpose.msra.mxu1 %v1741_v2  ;;  %6746 = vmatprep.mubr.msk.bf16.mxu1 %vm1425_vm0, %v1246_v33  ;;  %v1278_v33 = vpop.permute.xlu0 %1277 }
 0x35d   : > { %7001 = vmatprep.subr.msk.bf16.mxu1 %vm1425_vm0, %v8725_v24  ;;  %v6693_v0 = vpop.f32.mrf.mxu1  ;;  %v8814_v24 = vpack.c.bf16 %v1206_v16, %v1205_v23 }
 0x35e   : > { %6769 = vmatpush3.bf16.xpose.msra.mxu0 %v1921_v43  ;;  %1283 = vrot.lane.b32.xlu0 %v1214_v58, %s8168_s16  ;;  %v1158_v46 = vadd.f32 %v6693_v0, %v851_v37 }
 0x35f   : > { %1267 = vrot.lane.b32.xlu1 %v1214_v58, %s8167_s30  ;;  %v1149_v30 = vpop.f32.mrf.mxu1 }
 0x360   : > { %v1280_v47 = vpop.permute.xlu0 %1279  ;;  %v8858_v48 = vpack.c.bf16 %v1158_v46, %v1155_v26  ;;  %v1150_v54 = vadd.f32 %v1149_v30, %v851_v37 }
 0x361   : > { %v6696_v18 = vpop.f32.mrf.mxu1 }
 0x362   : > { %1327 = vrot.lane.b32.xlu0 %v8789_v8, %s8167_s30  ;;  %v1171_v51 = vadd.f32 %v6696_v18, %v851_v37 }
 0x363   : > { %1311 = vrot.lane.b32.xlu1 %v8789_v8, %s8166_s22  ;;  %v1162_v25 = vpop.f32.mrf.mxu1 }
 0x364   : > { %6745 = vmatpush3.bf16.xpose.msra.mxu1 %v1738_v15  ;;  %v1163_v61 = vadd.f32 %v1162_v25, %v851_v37 }
 0x365   : > { %7004 = vmatprep.subr.msk.bf16.mxu1 %vm1425_vm0, %v8729_v27  ;;  %6771 = vmatmul.mubr.msk.bf16.vlgmr.msra.gmra.mxu0 %vm1425_vm0, %v1214_v58  ;;  %v1142_v27 = vadd.f32 %v6689_v63, %v851_v37  ;;  %v6697_v40 = vpop.f32.mrf.mxu1 }
 0x366   : > { %1343 = vrot.lane.b32.xlu0 %v8789_v8, %s8168_s16  ;;  %v1174_v42 = vadd.f32 %v6697_v40, %v851_v37  ;;  %v2168_v40 = vsel %vm1425_vm0, %v8789_v8, 0 }
 0x367   : > { %1309 = vrot.lane.b32.xlu1 %v8803_v17, %s8166_s22  ;;  %v8844_v35 = vpack.c.bf16 %v1142_v27, %v1139_v22  ;;  %v1165_v39 = vpop.f32.mrf.mxu1 }
 0x368   : > { %v8874_v34 = vpack.c.bf16 %v1174_v42, %v1171_v51  ;;  %v1166_v58 = vadd.f32 %v1165_v39, %v851_v37 }
 0x369   : > { %v6700_v50 = vpop.f32.mrf.mxu1 }
 0x36a   : > { %1325 = vrot.lane.b32.xlu0 %v8803_v17, %s8167_s30  ;;  %10701 = vst [vmem:[#allocation25_spill] sm:$0xff] %v8874_v34  ;;  %v1187_v52 = vadd.f32 %v6700_v50, %v851_v37  ;;  %v8894_v62 = vpack.c.bf16 %v1166_v58, %v1163_v61 }
 0x36b   : > { %6747 = vmatmul.mubr.msk.bf16.vlgmr.msra.gmra.mxu1 %vm1425_vm0, %v8747_v45  ;;  %1253 = vrot.lane.b32.xlu1 %v8814_v24, %s8166_s22  ;;  %v8851_v45 = vpack.c.bf16 %v1134_v38, %v1131_v41  ;;  %v1178_v29 = vpop.f32.mrf.mxu1 }
 0x36c   : > { %6759 = vmatpush3.bf16.xpose.msra.mxu1 %v1863_v44  ;;  %6762 = vmatprep.mubr.msk.bf16.mxu1 %vm1425_vm0, %v1278_v33  ;;  %10703 = vst [vmem:[#allocation27_spill] sm:$0xff] %v8894_v62  ;;  %v1179_v2 = vadd.f32 %v1178_v29, %v851_v37 }
 0x36d   : > { %7005 = vmatprep.subr.msk.bf16.mxu1 %vm1425_vm0, %v8757_v49  ;;  %v1147_v49 = vadd.f32 %v1146_v11, %v851_v37  ;;  %v6701_v56 = vpop.f32.mrf.mxu1 }
 0x36e   : > { %1269 = vrot.lane.b32.xlu0 %v8814_v24, %s8167_s30  ;;  %v1190_v13 = vadd.f32 %v6701_v56, %v851_v37 }
 0x36f   : > { %1255 = vrot.lane.b32.xlu1 %v8826_v36, %s8166_s22  ;;  %v8868_v55 = vpack.c.bf16 %v1150_v54, %v1147_v49  ;;  %v1181_v63 = vpop.f32.mrf.mxu1 }
 0x370   : > { %v8880_v57 = vpack.c.bf16 %v1190_v13, %v1187_v52  ;;  %v1182_v1 = vadd.f32 %v1181_v63, %v851_v37 }
 0x371   : > { %10700 = vst [vmem:[#allocation24_spill] sm:$0xff] %v8868_v55 }
 0x372   : > { %1285 = vrot.lane.b32.xlu0 %v8814_v24, %s8168_s16  ;;  %10702 = vst [vmem:[#allocation26_spill] sm:$0xff] %v8880_v57  ;;  %v8904_v3 = vpack.c.bf16 %v1182_v1, %v1179_v2 }
 0x373   : > { %1341 = vrot.lane.b32.xlu1 %v8803_v17, %s8168_s16 }
 0x374   : > { %6761 = vmatpush3.bf16.xpose.msra.mxu1 %v1860_v31  ;;  %10704 = vst [vmem:[#allocation28_spill] sm:$0xff] %v8904_v3 }
 0x376   : > { %1355 = vrot.lane.b32.xlu0 %v8844_v35, %s8166_s22 }
 0x377   : > { %1271 = vrot.lane.b32.xlu1 %v8826_v36, %s8167_s30 }
 0x37a   : > { %1377 = vrot.lane.b32.xlu0 %v8851_v45, %s8167_s30 }
 0x37b   : > { %6763 = vmatmul.mubr.msk.bf16.vlgmr.msra.gmra.mxu1 %vm1425_vm0, %v1280_v47  ;;  %1287 = vrot.lane.b32.xlu1 %v8826_v36, %s8168_s16 }
 0x37e   : > { %1359 = vrot.lane.b32.xlu0 %v8858_v48, %s8166_s22 }
 0x37f   : > { %1353 = vrot.lane.b32.xlu1 %v8851_v45, %s8166_s22 }
 0x382   : > { %1383 = vrot.lane.b32.xlu0 %v8858_v48, %s8167_s30 }
 0x383   : > { %1379 = vrot.lane.b32.xlu1 %v8844_v35, %s8167_s30 }
 0x386   : > { %1381 = vrot.lane.b32.xlu0 %v8868_v55, %s8167_s30 }
 0x387   : > { %1403 = vrot.lane.b32.xlu1 %v8844_v35, %s8168_s16  ;;  %v8906_v4 = vpop.f32.mrf.mxu1 }
 0x388   : > { %v2408_v43 = vsel %vm1425_vm0, %v8906_v4, -inf }
 0x389   : > { %v8912_v19 = vpop.f32.mrf.mxu1 }
 0x38a   : > { %1387 = vrot.lane.b32.xlu0 %v8874_v34, %s8167_s30  ;;  %v2402_v5 = vsel %vm1425_vm0, %v8912_v19, -inf }
 0x38b   : > { %1401 = vrot.lane.b32.xlu1 %v8851_v45, %s8168_s16  ;;  %v8918_v9 = vpop.f32.mrf.mxu1 }
 0x38c   : > { %v2411_v10 = vsel %vm1425_vm0, %v8918_v9, -inf }
 0x38d   : > { %v8950_v41 = vpop.f32.mrf.mxu1 }
 0x38e   : > { %1367 = vrot.lane.b32.xlu0 %v8880_v57, %s8166_s22  ;;  %v2405_v47 = vsel %vm1425_vm0, %v8950_v41, -inf }
 0x38f   : > { %1357 = vrot.lane.b32.xlu1 %v8868_v55, %s8166_s22 }
 0x392   : > { %1391 = vrot.lane.b32.xlu0 %v8880_v57, %s8167_s30 }
 0x393   : > { %1407 = vrot.lane.b32.xlu1 %v8858_v48, %s8168_s16 }
 0x397   : > { %1405 = vrot.lane.b32.xlu1 %v8868_v55, %s8168_s16 }
 0x39b   : > { %1363 = vrot.lane.b32.xlu1 %v8874_v34, %s8166_s22 }
 0x39e   : > { %v8922_v11 = vpop.f32.mrf.mxu0 }
 0x39f   : > { %1361 = vrot.lane.b32.xlu1 %v8894_v62, %s8166_s22  ;;  %v2456_v15 = vsel %vm1425_vm0, %v8922_v11, -inf }
 0x3a0   : > { %v8926_v16 = vpop.f32.mrf.mxu0 }
 0x3a1   : > { %v2450_v53 = vsel %vm1425_vm0, %v8926_v16, -inf }
 0x3a2   : > { %v8959_v50 = vpop.f32.mrf.mxu0 }
 0x3a3   : > { %1411 = vrot.lane.b32.xlu1 %v8874_v34, %s8168_s16  ;;  %v2459_v29 = vsel %vm1425_vm0, %v8959_v50, -inf }
 0x3a4   : > { %v8966_v49 = vpop.f32.mrf.mxu0 }
 0x3a5   : > { %v2453_v13 = vsel %vm1425_vm0, %v8966_v49, -inf }
 0x3a7   : > { %1385 = vrot.lane.b32.xlu1 %v8894_v62, %s8167_s30 }
 0x3ab   : > { %1409 = vrot.lane.b32.xlu1 %v8894_v62, %s8168_s16 }
 0x3af   : > { %1365 = vrot.lane.b32.xlu1 %v8904_v3, %s8166_s22 }
 0x3b1   : > { %2409 = vmax.xlane.f32.xlu0 %v2408_v43 }
 0x3b3   : > { %1415 = vrot.lane.b32.xlu1 %v8880_v57, %s8168_s16 }
 0x3b5   : > { %2403 = vmax.xlane.f32.xlu0 %v2402_v5 }
 0x3b9   : > { %2412 = vmax.xlane.f32.xlu0 %v2411_v10 }
 0x3bc   : > { %v1308_v12 = vpop.permute.xlu1 %1307  ;;  %v1324_v14 = vpop.permute.xlu0 %1323 }
 0x3bd   : > { %2457 = vmax.xlane.f32.xlu0 %v2456_v15  ;;  %7008 = vmatprep.subr.msk.bf16.mxu1 %vm1425_vm0, %v1308_v12  ;;  %v1985_v20 = vsel %vm1425_vm0, %v1308_v12, 0  ;;  %v2046_v0 = vsel %vm1425_vm0, %v1324_v14, 0 }
 0x3be   : > { %7010 = vmatprep.subr.msk.bf16.mxu0 %vm1425_vm0, %v1324_v14  ;;  %6775 = vmatpush3.bf16.xpose.msra.mxu1 %v1985_v20 }
 0x3bf   : > { %6783 = vmatpush3.bf16.xpose.msra.mxu0 %v2046_v0 }
 0x3c0   : > { %v1340_v23 = vpop.permute.xlu0 %1339 }
 0x3c1   : > { %v1306_v21 = vpop.permute.xlu1 %1305  ;;  %2451 = vmax.xlane.f32.xlu0 %v2450_v53  ;;  %v2107_v22 = vsel %vm1425_vm0, %v1340_v23, 0 }
 0x3c2   : > { %7009 = vmatprep.subr.msk.bf16.mxu1 %vm1425_vm0, %v1306_v21  ;;  %v1982_v33 = vsel %vm1425_vm0, %v1306_v21, 0 }
 0x3c4   : > { %v1322_v30 = vpop.permute.xlu0 %1321 }
 0x3c5   : > { %v1250_v32 = vpop.permute.xlu1 %1249  ;;  %7011 = vmatprep.subr.msk.bf16.mxu0 %vm1425_vm0, %v1322_v30  ;;  %v2043_v44 = vsel %vm1425_vm0, %v1322_v30, 0 }
 0x3c6   : > { %6778 = vmatprep.mubr.msk.bf16.mxu1 %vm1425_vm0, %v1250_v32  ;;  %6777 = vmatpush3.bf16.xpose.msra.mxu1 %v1982_v33 }
 0x3c7   : > { %6785 = vmatpush3.bf16.xpose.msra.mxu0 %v2043_v44  ;;  %7012 = vmatprep.subr.msk.bf16.mxu1 %vm1425_vm0, %v1340_v23 }
 0x3c8   : > { %7014 = vmatprep.subr.msk.bf16.mxu0 %vm1425_vm0, %v8789_v8  ;;  %v1266_v18 = vpop.permute.xlu0 %1265 }
 0x3c9   : > { %v1252_v37 = vpop.permute.xlu1 %1251  ;;  %6786 = vmatprep.mubr.msk.bf16.mxu0 %vm1425_vm0, %v1266_v18 }
 0x3cc   : > { %v1282_v27 = vpop.permute.xlu0 %1281 }
 0x3cd   : > { %v1338_v25 = vpop.permute.xlu1 %1337  ;;  %6779 = vmatmul.mubr.msk.bf16.vlgmr.msra.gmra.mxu1 %vm1425_vm0, %v1252_v37 }
 0x3ce   : > { %6791 = vmatpush3.bf16.xpose.msra.mxu1 %v2107_v22  ;;  %6794 = vmatprep.mubr.msk.bf16.mxu1 %vm1425_vm0, %v1282_v27  ;;  %v2104_v26 = vsel %vm1425_vm0, %v1338_v25, 0 }
 0x3cf   : > { %7013 = vmatprep.subr.msk.bf16.mxu1 %vm1425_vm0, %v1338_v25 }
 0x3d0   : > { %v1284_v31 = vpop.permute.xlu0 %1283 }
 0x3d1   : > { %v1268_v38 = vpop.permute.xlu1 %1267 }
 0x3d2   : > { %6787 = vmatmul.mubr.msk.bf16.vlgmr.msra.gmra.mxu0 %vm1425_vm0, %v1268_v38 }
 0x3d3   : > { %6799 = vmatpush3.bf16.xpose.msra.mxu0 %v2168_v40  ;;  %6802 = vmatprep.mubr.msk.bf16.mxu0 %vm1425_vm0, %v8814_v24  ;;  %v2165_v24 = vsel %vm1425_vm0, %v8803_v17, 0 }
 0x3d4   : > { %7015 = vmatprep.subr.msk.bf16.mxu0 %vm1425_vm0, %v8803_v17  ;;  %v1328_v46 = vpop.permute.xlu0 %1327 }
 0x3d5   : > { %v1312_v39 = vpop.permute.xlu1 %1311  ;;  %v2290_v58 = vsel %vm1425_vm0, %v1328_v46, 0 }
 0x3d6   : > { %6793 = vmatpush3.bf16.xpose.msra.mxu1 %v2104_v26  ;;  %v2229_v51 = vsel %vm1425_vm0, %v1312_v39, 0 }
 0x3d7   : > { %2406 = vmax.xlane.f32.xlu1 %v2405_v47  ;;  %7016 = vmatprep.subr.msk.bf16.mxu1 %vm1425_vm0, %v1312_v39 }
 0x3d8   : > { %v1344_v8 = vpop.permute.xlu0 %1343 }
 0x3d9   : > { %v1310_v54 = vpop.permute.xlu1 %1309  ;;  %v2351_v5 = vsel %vm1425_vm0, %v1344_v8, 0 }
 0x3da   : > { %v2226_v63 = vsel %vm1425_vm0, %v1310_v54, 0 }
 0x3db   : > { %6801 = vmatpush3.bf16.xpose.msra.mxu0 %v2165_v24  ;;  %2460 = vmax.xlane.f32.xlu1 %v2459_v29 }
 0x3dc   : > { %7018 = vmatprep.subr.msk.bf16.mxu0 %vm1425_vm0, %v1328_v46  ;;  %v1326_v42 = vpop.permute.xlu0 %1325 }
 0x3dd   : > { %v1254_v56 = vpop.permute.xlu1 %1253  ;;  %6795 = vmatmul.mubr.msk.bf16.vlgmr.msra.gmra.mxu1 %vm1425_vm0, %v1284_v31  ;;  %v2287_v2 = vsel %vm1425_vm0, %v1326_v42, 0 }
 0x3de   : > { %6807 = vmatpush3.bf16.xpose.msra.mxu1 %v2229_v51  ;;  %6810 = vmatprep.mubr.msk.bf16.mxu1 %vm1425_vm0, %v1254_v56 }
 0x3df   : > { %2454 = vmax.xlane.f32.xlu1 %v2453_v13  ;;  %7017 = vmatprep.subr.msk.bf16.mxu1 %vm1425_vm0, %v1310_v54 }
 0x3e0   : > { %v1270_v17 = vpop.permute.xlu0 %1269 }
 0x3e1   : > { %v1256_v52 = vpop.permute.xlu1 %1255 }
 0x3e2   : > { %6803 = vmatmul.mubr.msk.bf16.vlgmr.msra.gmra.mxu0 %vm1425_vm0, %v8826_v36 }
 0x3e3   : > { %6815 = vmatpush3.bf16.xpose.msra.mxu0 %v2290_v58  ;;  %6818 = vmatprep.mubr.msk.bf16.mxu0 %vm1425_vm0, %v1270_v17 }
 0x3e4   : > { %7019 = vmatprep.subr.msk.bf16.mxu0 %vm1425_vm0, %v1326_v42  ;;  %v1286_v36 = vpop.permute.xlu0 %1285 }
 0x3e5   : > { %v1342_v61 = vpop.permute.xlu1 %1341 }
 0x3e6   : > { %6809 = vmatpush3.bf16.xpose.msra.mxu1 %v2226_v63  ;;  %v2348_v14 = vsel %vm1425_vm0, %v1342_v61, 0 }
 0x3e7   : > { %7020 = vmatprep.subr.msk.bf16.mxu1 %vm1425_vm0, %v1344_v8 }
 0x3e8   : > { %v1356_v15 = vpop.permute.xlu0 %1355 }
 0x3e9   : > { %v1272_v1 = vpop.permute.xlu1 %1271 }
 0x3eb   : > { %6817 = vmatpush3.bf16.xpose.msra.mxu0 %v2287_v2 }
 0x3ec   : > { %6830 = vmatprep.subr.bf16.mxu0 %v8844_v35  ;;  %v9026_v25 = vpop.permute.xlu0 %1377 }
 0x3ed   : > { %v1288_v43 = vpop.permute.xlu1 %1287  ;;  %6811 = vmatmul.mubr.msk.bf16.vlgmr.msra.gmra.mxu1 %vm1425_vm0, %v1256_v52 }
 0x3ee   : > { %6823 = vmatpush3.bf16.xpose.msra.mxu1 %v2351_v5  ;;  %6826 = vmatprep.mubr.msk.bf16.mxu1 %vm1425_vm0, %v1286_v36 }
 0x3ef   : > { %7021 = vmatprep.subr.msk.bf16.mxu1 %vm1425_vm0, %v1342_v61 }
 0x3f0   : > { %v9034_v40 = vpop.permute.xlu0 %1359 }
 0x3f1   : > { %v1354_v10 = vpop.permute.xlu1 %1353  ;;  %10706 = vst [vmem:[#allocation30_spill] sm:$0xff] %v9034_v40 }
 0x3f2   : > { %6819 = vmatmul.mubr.msk.bf16.vlgmr.msra.gmra.mxu0 %vm1425_vm0, %v1272_v1 }
 0x3f3   : > { %6831 = vmatpush3.bf16.msra.mxu0 %v8844_v35 }
 0x3f4   : > { %6832 = vmatprep.subr.bf16.mxu0 %v8851_v45  ;;  %v9046_v54 = vpop.permute.xlu0 %1383 }
 0x3f5   : > { %v8991_v12 = vpop.permute.xlu1 %1379  ;;  %10707 = vst [vmem:[#allocation31_spill] sm:$0xff] %v9046_v54 }
 0x3f6   : > { %6825 = vmatpush3.bf16.xpose.msra.mxu1 %v2348_v14 }
 0x3f7   : > { %6833 = vmatpush3.bf16.msra.mxu0 %v8851_v45  ;;  %6838 = vmatprep.subr.bf16.mxu1 %v1356_v15 }
 0x3f8   : > { %6846 = vmatprep.subr.bf16.mxu0 %v8991_v12  ;;  %v9064_v58 = vpop.permute.xlu0 %1381 }
 0x3f9   : > { %v9011_v30 = vpop.permute.xlu1 %1403  ;;  %10709 = vst [vmem:[#allocation33_spill] sm:$0xff] %v9064_v58 }
 0x3fa   : > { %10705 = vst [vmem:[#allocation29_spill] sm:$0xff] %v9011_v30 }
 0x3fb   : > { %v8996_v20 = vpop.f32.mrf.mxu1 }
 0x3fc   : > { %v2420_v0 = vsel %vm1425_vm0, %v8996_v20, -inf  ;;  %v9078_v5 = vpop.permute.xlu0 %1387 }
 0x3fd   : > { %2421 = vmax.xlane.f32.xlu0 %v2420_v0  ;;  %v9000_v35 = vpop.f32.mrf.mxu1  ;;  %6827 = vmatmul.mubr.msk.bf16.vlgmr.msra.gmra.mxu1 %vm1425_vm0, %v1288_v43  ;;  %v9056_v51 = vpop.permute.xlu1 %1401  ;;  %10711 = vst [vmem:[#allocation35_spill] sm:$0xff] %v9078_v5 }
 0x3fe   : > { %6839 = vmatpush3.bf16.msra.mxu1 %v1356_v15  ;;  %v2414_v45 = vsel %vm1425_vm0, %v9000_v35, -inf  ;;  %10708 = vst [vmem:[#allocation32_spill] sm:$0xff] %v9056_v51 }
 0x3ff   : > { %v9003_v23 = vpop.f32.mrf.mxu1  ;;  %6840 = vmatprep.subr.bf16.mxu1 %v1354_v10 }
 0x400   : > { %v2423_v53 = vsel %vm1425_vm0, %v9003_v23, -inf }
 0x401   : > { %2415 = vmax.xlane.f32.xlu0 %v2414_v45  ;;  %2424 = vmax.xlane.f32.xlu1 %v2423_v53  ;;  %v9009_v21 = vpop.f32.mrf.mxu1  ;;  %v9068_v63 = vpop.permute.xlu1 %1357 }
 0x402   : > { %6841 = vmatpush3.bf16.msra.mxu1 %v1354_v10  ;;  %v2417_v32 = vsel %vm1425_vm0, %v9009_v21, -inf  ;;  %10710 = vst [vmem:[#allocation34_spill] sm:$0xff] %v9068_v63 }
 0x403   : > { %6854 = vmatprep.subr.bf16.mxu1 %v9011_v30 }
 0x405   : > { %2418 = vmax.xlane.f32.xlu1 %v2417_v32  ;;  %v9086_v0 = vpop.permute.xlu1 %1407 }
 0x406   : > { %10712 = vst [vmem:[#allocation36_spill] sm:$0xff] %v9086_v0 }
 0x40b   : > { %v9016_v33 = vpop.f32.mrf.mxu1 }
 0x40c   : > { %v2432_v44 = vsel %vm1425_vm0, %v9016_v33, -inf }
 0x40d   : > { %2433 = vmax.xlane.f32.xlu0 %v2432_v44  ;;  %v9020_v18 = vpop.f32.mrf.mxu1  ;;  %v9094_v44 = vpop.permute.xlu0 %1367 }
 0x40e   : > { %v2426_v26 = vsel %vm1425_vm0, %v9020_v18, -inf  ;;  %10713 = vst [vmem:[#allocation37_spill] sm:$0xff] %v9094_v44 }
 0x40f   : > { %v9022_v37 = vpop.f32.mrf.mxu1 }
 0x410   : > { %v2435_v27 = vsel %vm1425_vm0, %v9022_v37, -inf }
 0x411   : > { %2436 = vmax.xlane.f32.xlu1 %v2435_v27  ;;  %v9036_v46 = vpop.f32.mrf.mxu1  ;;  %v9096_v27 = vpop.permute.xlu1 %1405 }
 0x412   : > { %v2429_v29 = vsel %vm1425_vm0, %v9036_v46, -inf  ;;  %10714 = vst [vmem:[#allocation38_spill] sm:$0xff] %v9096_v27 }
 0x415   : > { %v9028_v22 = vpop.f32.mrf.mxu0 }
 0x416   : > { %v2480_v31 = vsel %vm1425_vm0, %v9028_v22, -inf }
 0x417   : > { %2481 = vmax.xlane.f32.xlu0 %v2480_v31  ;;  %v9032_v38 = vpop.f32.mrf.mxu0 }
 0x418   : > { %v2474_v24 = vsel %vm1425_vm0, %v9032_v38, -inf }
 0x419   : > { %v9038_v39 = vpop.f32.mrf.mxu0 }
 0x41a   : > { %v2483_v47 = vsel %vm1425_vm0, %v9038_v39, -inf }
 0x41b   : > { %v9044_v8 = vpop.f32.mrf.mxu1  ;;  %2427 = vmax.xlane.f32.xlu0 %v2426_v26  ;;  %2484 = vmax.xlane.f32.xlu1 %v2483_v47  ;;  %v9054_v56 = vpop.f32.mrf.mxu0 }
 0x41c   : > { %v2444_v13 = vsel %vm1425_vm0, %v9044_v8, -inf  ;;  %v2477_v17 = vsel %vm1425_vm0, %v9054_v56, -inf  ;;  %v9100_v26 = vpop.permute.xlu0 %1391  ;;  %v9102_v47 = vpop.permute.xlu1 %1363 }
 0x41d   : > { %v9052_v42 = vpop.f32.mrf.mxu1  ;;  %10715 = vst [vmem:[#allocation39_spill] sm:$0xff] %v9100_v26  ;;  %10716 = vst [vmem:[#allocation40_spill] sm:$0xff] %v9102_v47 }
 0x41e   : > { %v2438_v10 = vsel %vm1425_vm0, %v9052_v42, -inf }
 0x41f   : > { %2475 = vmax.xlane.f32.xlu0 %v2474_v24  ;;  %2430 = vmax.xlane.f32.xlu1 %v2429_v29  ;;  %v9062_v52 = vpop.f32.mrf.mxu1 }
 0x420   : > { %v2447_v1 = vsel %vm1425_vm0, %v9062_v52, -inf }
 0x421   : > { %v9084_v15 = vpop.f32.mrf.mxu1 }
 0x422   : > { %v2441_v53 = vsel %vm1425_vm0, %v9084_v15, -inf }
 0x423   : > { %2445 = vmax.xlane.f32.xlu0 %v2444_v13  ;;  %2478 = vmax.xlane.f32.xlu1 %v2477_v17  ;;  %v9105_v17 = vpop.permute.xlu1 %1361 }
 0x424   : > { %10717 = vst [vmem:[#allocation41_spill] sm:$0xff] %v9105_v17 }
 0x425   : > { %v9066_v61 = vpop.f32.mrf.mxu0 }
 0x426   : > { %v2504_v2 = vsel %vm1425_vm0, %v9066_v61, -inf }
 0x427   : > { %v9074_v36 = vpop.f32.mrf.mxu0  ;;  %2448 = vmax.xlane.f32.xlu1 %v2447_v1  ;;  %2505 = vmax.xlane.f32.xlu0 %v2504_v2 }
 0x428   : > { %v2498_v45 = vsel %vm1425_vm0, %v9074_v36, -inf }
 0x429   : > { %v9076_v43 = vpop.f32.mrf.mxu0 }
 0x42a   : > { %v2507_v14 = vsel %vm1425_vm0, %v9076_v43, -inf }
 0x42b   : > { %2439 = vmax.xlane.f32.xlu0 %v2438_v10  ;;  %2508 = vmax.xlane.f32.xlu1 %v2507_v14  ;;  %v9092_v32 = vpop.f32.mrf.mxu0 }
 0x42c   : > { %v2501_v31 = vsel %vm1425_vm0, %v9092_v32, -inf }
 0x42f   : > { %2499 = vmax.xlane.f32.xlu0 %v2498_v45  ;;  %2442 = vmax.xlane.f32.xlu1 %v2441_v53  ;;  %v9109_v53 = vpop.permute.xlu1 %1411 }
 0x430   : > { %10718 = vst [vmem:[#allocation42_spill] sm:$0xff] %v9109_v53 }
 0x433   : > { %2502 = vmax.xlane.f32.xlu1 %v2501_v31  ;;  %v9111_v60 = vpop.permute.xlu1 %1385 }
 0x434   : > { %10719 = vst [vmem:[#allocation43_spill] sm:$0xff] %v9111_v60 }
 0x43a   : > { %v2410_v24 = vpop.xlane.xlu0 %2409 }
 0x43b   : > { %v2596_v29 = vsub.f32 %v8906_v4, %v2410_v24 }
 0x43d   : > { %v2662_v13 = vmul.f32 1.442695, %v2596_v29 }
 0x43e   : > { %v2404_v1 = vpop.xlane.xlu0 %2403 }
 0x43f   : > { %7425 = vpow2.f32 %v2662_v13  ;;  %v2594_v2 = vsub.f32 %v8912_v19, %v2404_v1  ;;  %v9119_v19 = vpop.permute.xlu1 %1409 }
 0x440   : > { %10720 = vst [vmem:[#allocation44_spill] sm:$0xff] %v9119_v19 }
 0x441   : > { %v2658_v10 = vmul.f32 1.442695, %v2594_v2 }
 0x442   : > { %v2413_v14 = vpop.xlane.xlu0 %2412 }
 0x443   : > { %7427 = vpow2.f32 %v2658_v10  ;;  %v2597_v45 = vsub.f32 %v8918_v9, %v2413_v14  ;;  %v9123_v9 = vpop.f32.mrf.mxu1  ;;  %v9131_v10 = vpop.permute.xlu1 %1365 }
 0x444   : > { %v2468_v1 = vsel %vm1425_vm0, %v9123_v9, -inf  ;;  %10721 = vst [vmem:[#allocation45_spill] sm:$0xff] %v9131_v10 }
 0x445   : > { %v2664_v31 = vmul.f32 1.442695, %v2597_v45 }
 0x447   : > { %7429 = vpow2.f32 %v2664_v31  ;;  %v9133_v14 = vpop.permute.xlu1 %1415 }
 0x448   : > { %10722 = vst [vmem:[#allocation46_spill] sm:$0xff] %v9133_v14 }
 0x44c   : > { %v9113_v28 = vpop.eup %7425 }
 0x44d   : > { %v2792_v4 = vsel %vm1425_vm0, %v9113_v28, 0.0 }
 0x44e   : > { %2793 = vadd.xlane.f32.xlu0 %v2792_v4 }
 0x450   : > { %v9117_v24 = vpop.eup %7427 }
 0x451   : > { %v2786_v29 = vsel %vm1425_vm0, %v9117_v24, 0.0 }
 0x452   : > { %2787 = vadd.xlane.f32.xlu0 %v2786_v29  ;;  %v9136_v29 = vpop.f32.mrf.mxu1 }
 0x454   : > { %v9125_v13 = vpop.eup %7429  ;;  %v9142_v6 = vpop.f32.mrf.mxu1 }
 0x455   : > { %v2795_v2 = vsel %vm1425_vm0, %v9125_v13, 0.0 }
 0x456   : > { %2469 = vmax.xlane.f32.xlu0 %v2468_v1  ;;  %2796 = vadd.xlane.f32.xlu1 %v2795_v2  ;;  %v2471_v1 = vsel %vm1425_vm0, %v9142_v6, -inf  ;;  %v2458_v2 = vpop.xlane.xlu0 %2457 }
 0x460   : > { %v2407_v45 = vpop.xlane.xlu1 %2406 }
 0x461   : > { %v2595_v31 = vsub.f32 %v8950_v41, %v2407_v45  ;;  %v2612_v41 = vsub.f32 %v8922_v11, %v2458_v2  ;;  %v2452_v45 = vpop.xlane.xlu0 %2451 }
 0x463   : > { %v2660_v4 = vmul.f32 1.442695, %v2595_v31  ;;  %v2610_v31 = vsub.f32 %v8926_v16, %v2452_v45  ;;  %v9156_v16 = vpop.f32.mrf.mxu1 }
 0x464   : > { %v2461_v14 = vpop.xlane.xlu1 %2460 }
 0x465   : > { %7431 = vpow2.f32 %v2660_v4  ;;  %v2694_v4 = vmul.f32 1.442695, %v2612_v41  ;;  %v2613_v10 = vsub.f32 %v8959_v50, %v2461_v14  ;;  %v2690_v19 = vmul.f32 1.442695, %v2610_v31  ;;  %v9160_v14 = vpop.f32.mrf.mxu1 }
 0x467   : > { %7433 = vpow2.f32 %v2694_v4  ;;  %v2696_v53 = vmul.f32 1.442695, %v2613_v10  ;;  %v2465_v10 = vsel %vm1425_vm0, %v9156_v16, -inf }
 0x468   : > { %v2455_v44 = vpop.xlane.xlu1 %2454  ;;  %7435 = vpow2.f32 %v2690_v19 }
 0x469   : > { %7437 = vpow2.f32 %v2696_v53  ;;  %v9166_v53 = vpop.f32.mrf.mxu1 }
 0x46b   : > { %v9178_v4 = vpop.f32.mrf.mxu1 }
 0x472   : > { %v9138_v59 = vpop.eup %7431 }
 0x473   : > { %v2789_v7 = vsel %vm1425_vm0, %v9138_v59, 0.0 }
 0x474   : > { %2790 = vadd.xlane.f32.xlu1 %v2789_v7  ;;  %v2611_v7 = vsub.f32 %v8966_v49, %v2455_v44  ;;  %v2462_v49 = vsel %vm1425_vm0, %v9136_v29, -inf  ;;  %v9172_v41 = vpop.eup %7433 }
 0x475   : > { %10723 = vst [vmem:[#allocation47_spill] sm:$0xff] %v9172_v41  ;;  %v9176_v31 = vpop.eup %7435 }
 0x476   : > { %10724 = vst [vmem:[#allocation48_spill] sm:$0xff] %v9176_v31 }
 0x478   : > { %2472 = vmax.xlane.f32.xlu1 %v2471_v1  ;;  %v2692_v1 = vmul.f32 1.442695, %v2611_v7 }
 0x47a   : > { %7439 = vpow2.f32 %v2692_v1  ;;  %v2840_v1 = vsel %vm1425_vm0, %v9172_v41, 0.0 }
 0x486   : > { %v9198_v27 = vpop.xlane.xlu0 %2421 }
 0x48a   : > { %v9212_v5 = vpop.xlane.xlu0 %2415  ;;  %v2425_v51 = vpop.xlane.xlu1 %2424 }
 0x492   : > { %v9150_v17 = vpop.f32.mrf.mxu0 }
 0x493   : > { %v2528_v11 = vsel %vm1425_vm0, %v9150_v17, -inf }
 0x494   : > { %v9154_v2 = vpop.f32.mrf.mxu0  ;;  %2529 = vmax.xlane.f32.xlu0 %v2528_v11  ;;  %v9184_v11 = vpop.eup %7437 }
 0x495   : > { %v2522_v19 = vsel %vm1425_vm0, %v9154_v2, -inf  ;;  %10725 = vst [vmem:[#allocation49_spill] sm:$0xff] %v9184_v11 }
 0x496   : > { %v9158_v50 = vpop.f32.mrf.mxu0  ;;  %v9222_v34 = vpop.xlane.xlu0 %2433 }
 0x497   : > { %v2531_v44 = vsel %vm1425_vm0, %v9158_v50, -inf }
 0x498   : > { %2463 = vmax.xlane.f32.xlu0 %v2462_v49  ;;  %2532 = vmax.xlane.f32.xlu1 %v2531_v44  ;;  %v9174_v45 = vpop.f32.mrf.mxu0  ;;  %v9186_v49 = vpop.f32.mrf.mxu1  ;;  %v2843_v44 = vsel %vm1425_vm0, %v9184_v11, 0.0 }
 0x499   : > { %v2525_v7 = vsel %vm1425_vm0, %v9174_v45, -inf  ;;  %10726 = vst [vmem:[#allocation50_spill] sm:$0xff] %v9186_v49 }
 0x49a   : > { %v9196_v26 = vpop.f32.mrf.mxu1 }
 0x49b   : > { %10728 = vst [vmem:[#allocation52_spill] sm:$0xff] %v9196_v26 }
 0x49c   : > { %2523 = vmax.xlane.f32.xlu0 %v2522_v19  ;;  %2466 = vmax.xlane.f32.xlu1 %v2465_v10  ;;  %v2834_v19 = vsel %vm1425_vm0, %v9176_v31, 0.0  ;;  %v9192_v10 = vpop.eup %7439  ;;  %v9206_v60 = vpop.f32.mrf.mxu1 }
 0x49d   : > { %10727 = vst [vmem:[#allocation51_spill] sm:$0xff] %v9192_v10  ;;  %10730 = vst [vmem:[#allocation54_spill] sm:$0xff] %v9206_v60 }
 0x49e   : > { %v9216_v0 = vpop.f32.mrf.mxu1 }
 0x49f   : > { %10732 = vst [vmem:[#allocation56_spill] sm:$0xff] %v9216_v0  ;;  %v2519_v3 = vsel %vm1425_vm0, %v9216_v0, -inf }
 0x4a0   : > { %2526 = vmax.xlane.f32.xlu1 %v2525_v7  ;;  %2841 = vadd.xlane.f32.xlu0 %v2840_v1  ;;  %v2837_v7 = vsel %vm1425_vm0, %v9192_v10, 0.0  ;;  %v2492_v1 = vsel %vm1425_vm0, %v9160_v14, -inf  ;;  %v9224_v63 = vpop.f32.mrf.mxu1  ;;  %v9234_v41 = vpop.xlane.xlu0 %2481 }
 0x4a1   : > { %10733 = vst [vmem:[#allocation57_spill] sm:$0xff] %v9224_v63 }
 0x4a2   : > { %v9194_v47 = vpop.f32.mrf.mxu0  ;;  %v9228_v54 = vpop.f32.mrf.mxu1 }
 0x4a4   : > { %2844 = vadd.xlane.f32.xlu1 %v2843_v44  ;;  %2835 = vadd.xlane.f32.xlu0 %v2834_v19  ;;  %v9204_v57 = vpop.f32.mrf.mxu0  ;;  %v2495_v44 = vsel %vm1425_vm0, %v9178_v4, -inf  ;;  %v2552_v19 = vsel %vm1425_vm0, %v9194_v47, -inf  ;;  %v9242_v55 = vpop.f32.mrf.mxu1 }
 0x4a5   : > { %10729 = vst [vmem:[#allocation53_spill] sm:$0xff] %v9204_v57  ;;  %v9246_v10 = vpop.xlane.xlu0 %2427 }
 0x4a6   : > { %v9214_v62 = vpop.f32.mrf.mxu0 }
 0x4a7   : > { %10731 = vst [vmem:[#allocation55_spill] sm:$0xff] %v9214_v62 }
 0x4a8   : > { %2838 = vadd.xlane.f32.xlu1 %v2837_v7  ;;  %2493 = vmax.xlane.f32.xlu0 %v2492_v1  ;;  %v2555_v7 = vsel %vm1425_vm0, %v9214_v62, -inf  ;;  %v2486_v1 = vsel %vm1425_vm0, %v9166_v53, -inf  ;;  %v9226_v58 = vpop.f32.mrf.mxu0 }
 0x4a9   : > { %10734 = vst [vmem:[#allocation58_spill] sm:$0xff] %v9226_v58 }
 0x4ac   : > { %2496 = vmax.xlane.f32.xlu1 %v2495_v44  ;;  %2553 = vmax.xlane.f32.xlu0 %v2552_v19  ;;  %v2489_v44 = vsel %vm1425_vm0, %v9186_v49, -inf  ;;  %v2546_v19 = vsel %vm1425_vm0, %v9204_v57, -inf  ;;  %v9262_v49 = vpop.xlane.xlu0 %2475 }
 0x4b0   : > { %2556 = vmax.xlane.f32.xlu1 %v2555_v7  ;;  %2487 = vmax.xlane.f32.xlu0 %v2486_v1  ;;  %v2549_v7 = vsel %vm1425_vm0, %v9226_v58, -inf  ;;  %v2516_v1 = vsel %vm1425_vm0, %v9196_v26, -inf }
 0x4b2   : > { %v9236_v11 = vpop.f32.mrf.mxu0 }
 0x4b3   : > { %10735 = vst [vmem:[#allocation59_spill] sm:$0xff] %v9236_v11 }
 0x4b4   : > { %2490 = vmax.xlane.f32.xlu1 %v2489_v44  ;;  %2547 = vmax.xlane.f32.xlu0 %v2546_v19  ;;  %v9244_v31 = vpop.f32.mrf.mxu0  ;;  %v2576_v44 = vsel %vm1425_vm0, %v9236_v11, -inf  ;;  %v9252_v19 = vpop.f32.mrf.mxu1 }
 0x4b5   : > { %10736 = vst [vmem:[#allocation60_spill] sm:$0xff] %v9244_v31  ;;  %10737 = vst [vmem:[#allocation61_spill] sm:$0xff] %v9252_v19  ;;  %v2419_v11 = vpop.xlane.xlu1 %2418  ;;  %v2543_v62 = vsel %vm1425_vm0, %v9252_v19, -inf }
 0x4b6   : > { %v9254_v40 = vpop.f32.mrf.mxu0 }
 0x4b7   : > { %10738 = vst [vmem:[#allocation62_spill] sm:$0xff] %v9254_v40  ;;  %v2579_v30 = vsel %vm1425_vm0, %v9254_v40, -inf  ;;  %v2600_v40 = vsub.f32 %v8996_v20, %v9198_v27  ;;  %v2598_v20 = vsub.f32 %v9000_v35, %v9212_v5  ;;  %v2604_v35 = vsub.f32 %v9016_v33, %v9222_v34 }
 0x4b8   : > { %2550 = vmax.xlane.f32.xlu1 %v2549_v7  ;;  %2517 = vmax.xlane.f32.xlu0 %v2516_v1  ;;  %v2510_v7 = vsel %vm1425_vm0, %v9206_v60, -inf  ;;  %v9260_v1 = vpop.f32.mrf.mxu1  ;;  %v9270_v26 = vpop.f32.mrf.mxu0  ;;  %v2602_v34 = vsub.f32 %v9020_v18, %v9246_v10 }
 0x4b9   : > { %10739 = vst [vmem:[#allocation63_spill] sm:$0xff] %v9270_v26  ;;  %v2446_v60 = vpop.xlane.xlu0 %2445  ;;  %v2537_v5 = vsel %vm1425_vm0, %v9260_v1, -inf }
 0x4ba   : > { %v9264_v0 = vpop.f32.mrf.mxu1  ;;  %v2608_v10 = vsub.f32 %v9044_v8, %v2446_v60 }
 0x4bc   : > { %2520 = vmax.xlane.f32.xlu1 %v2519_v3  ;;  %2577 = vmax.xlane.f32.xlu0 %v2576_v44  ;;  %v2513_v3 = vsel %vm1425_vm0, %v9224_v63, -inf  ;;  %v2570_v44 = vsel %vm1425_vm0, %v9244_v31, -inf  ;;  %v9274_v58 = vpop.f32.mrf.mxu1  ;;  %v2540_v63 = vsel %vm1425_vm0, %v9228_v54, -inf  ;;  %v2670_v31 = vmul.f32 1.442695, %v2600_v40 }
 0x4bd   : > { %v2506_v57 = vpop.xlane.xlu0 %2505  ;;  %v2686_v60 = vmul.f32 1.442695, %v2608_v10 }
 0x4be   : > { %7441 = vpow2.f32 %v2670_v31  ;;  %v2678_v31 = vmul.f32 1.442695, %v2604_v35  ;;  %v2628_v8 = vsub.f32 %v9066_v61, %v2506_v57 }
 0x4c0   : > { %2580 = vmax.xlane.f32.xlu1 %v2579_v30  ;;  %2511 = vmax.xlane.f32.xlu0 %v2510_v7  ;;  %v9276_v30 = vpop.xlane.xlu1 %2436  ;;  %v2573_v7 = vsel %vm1425_vm0, %v9270_v26, -inf  ;;  %v2534_v26 = vsel %vm1425_vm0, %v9242_v55, -inf }
 0x4c1   : > { %v2440_v33 = vpop.xlane.xlu0 %2439 }
 0x4c4   : > { %2514 = vmax.xlane.f32.xlu1 %v2513_v3  ;;  %2571 = vmax.xlane.f32.xlu0 %v2570_v44  ;;  %v2601_v3 = vsub.f32 %v9003_v23, %v2425_v51  ;;  %v9283_v44 = vpop.f32.mrf.mxu1  ;;  %v9287_v27 = vpop.xlane.xlu1 %2484  ;;  %v2599_v23 = vsub.f32 %v9009_v21, %v2419_v11 }
 0x4c5   : > { %v2567_v11 = vsel %vm1425_vm0, %v9283_v44, -inf  ;;  %v2500_v35 = vpop.xlane.xlu0 %2499 }
 0x4c6   : > { %v2672_v40 = vmul.f32 1.442695, %v2601_v3  ;;  %v9294_v51 = vpop.f32.mrf.mxu1  ;;  %v2558_v3 = vsel %vm1425_vm0, %v9274_v58, -inf }
 0x4c8   : > { %2574 = vmax.xlane.f32.xlu1 %v2573_v7  ;;  %2541 = vmax.xlane.f32.xlu0 %v2540_v63  ;;  %v2666_v63 = vmul.f32 1.442695, %v2598_v20  ;;  %v2564_v7 = vsel %vm1425_vm0, %v9264_v0, -inf  ;;  %v9302_v19 = vpop.f32.mrf.mxu1  ;;  %v9306_v21 = vpop.xlane.xlu1 %2430  ;;  %7443 = vpow2.f32 %v2672_v40  ;;  %v2618_v40 = vsub.f32 %v9032_v38, %v9262_v49 }
 0x4ca   : > { %7445 = vpow2.f32 %v2666_v63  ;;  %v9314_v20 = vpop.f32.mrf.mxu1  ;;  %v2588_v63 = vsel %vm1425_vm0, %v9302_v19, -inf  ;;  %v2706_v38 = vmul.f32 1.442695, %v2618_v40 }
 0x4cb   : > { %v9327_v49 = vpop.eup %7441 }
 0x4cc   : > { %2544 = vmax.xlane.f32.xlu1 %v2543_v62  ;;  %2535 = vmax.xlane.f32.xlu0 %v2534_v26  ;;  %v2620_v62 = vsub.f32 %v9028_v22, %v9234_v41  ;;  %v2668_v26 = vmul.f32 1.442695, %v2599_v23  ;;  %v2674_v41 = vmul.f32 1.442695, %v2602_v34  ;;  %v2479_v18 = vpop.xlane.xlu1 %2478  ;;  %v2561_v23 = vsel %vm1425_vm0, %v9294_v51, -inf }
 0x4cd   : > { %v2804_v57 = vsel %vm1425_vm0, %v9327_v49, 0.0 }
 0x4ce   : > { %v2710_v22 = vmul.f32 1.442695, %v2620_v62  ;;  %7447 = vpow2.f32 %v2668_v26  ;;  %v2582_v26 = vsel %vm1425_vm0, %v9314_v20, -inf }
 0x4cf   : > { %7449 = vpow2.f32 %v2678_v31 }
 0x4d0   : > { %2538 = vmax.xlane.f32.xlu1 %v2537_v5  ;;  %2565 = vmax.xlane.f32.xlu0 %v2564_v7  ;;  %v9323_v5 = vpop.f32.mrf.mxu1  ;;  %7451 = vpow2.f32 %v2710_v22  ;;  %v2605_v7 = vsub.f32 %v9022_v37, %v9276_v30  ;;  %v2449_v37 = vpop.xlane.xlu1 %2448  ;;  %v2606_v22 = vsub.f32 %v9052_v42, %v2440_v33 }
 0x4d1   : > { %7453 = vpow2.f32 %v2674_v41  ;;  %v2591_v62 = vsel %vm1425_vm0, %v9323_v5, -inf }
 0x4d2   : > { %v9334_v34 = vpop.f32.mrf.mxu1  ;;  %v2680_v30 = vmul.f32 1.442695, %v2605_v7  ;;  %7455 = vpow2.f32 %v2706_v38  ;;  %v2682_v33 = vmul.f32 1.442695, %v2606_v22  ;;  %v2626_v7 = vsub.f32 %v9074_v36, %v2500_v35 }
 0x4d3   : > { %7457 = vpow2.f32 %v2686_v60  ;;  %v2585_v41 = vsel %vm1425_vm0, %v9334_v34, -inf }
 0x4d4   : > { %2568 = vmax.xlane.f32.xlu1 %v2567_v11  ;;  %2559 = vmax.xlane.f32.xlu0 %v2558_v3  ;;  %v2621_v11 = vsub.f32 %v9038_v39, %v9287_v27  ;;  %v2726_v3 = vmul.f32 1.442695, %v2628_v8  ;;  %7459 = vpow2.f32 %v2680_v30  ;;  %v2603_v39 = vsub.f32 %v9036_v46, %v9306_v21  ;;  %v2509_v42 = vpop.xlane.xlu1 %2508 }
 0x4d5   : > { %v9342_v61 = vpop.eup %7443  ;;  %v2619_v46 = vsub.f32 %v9054_v56, %v2479_v18  ;;  %v2722_v30 = vmul.f32 1.442695, %v2626_v7 }
 0x4d6   : > { %v2712_v10 = vmul.f32 1.442695, %v2621_v11  ;;  %7461 = vpow2.f32 %v2726_v3  ;;  %v2676_v8 = vmul.f32 1.442695, %v2603_v39 }
 0x4d7   : > { %v9336_v31 = vpop.xlane.xlu0 %2793  ;;  %v9347_v40 = vpop.eup %7445  ;;  %v2708_v56 = vmul.f32 1.442695, %v2619_v46 }
 0x4d8   : > { %2562 = vmax.xlane.f32.xlu1 %v2561_v23  ;;  %2589 = vmax.xlane.f32.xlu0 %v2588_v63  ;;  %v2807_v23 = vsel %vm1425_vm0, %v9342_v61, 0.0  ;;  %v2798_v38 = vsel %vm1425_vm0, %v9347_v40, 0.0  ;;  %7463 = vpow2.f32 %v2712_v10  ;;  %v2443_v18 = vpop.xlane.xlu1 %2442 }
 0x4d9   : > { %7465 = vpow2.f32 %v2682_v33 }
 0x4da   : > { %7467 = vpow2.f32 %v2676_v8 }
 0x4db   : > { %v9351_v27 = vpop.xlane.xlu0 %2787  ;;  %v9355_v63 = vpop.eup %7447  ;;  %7469 = vpow2.f32 %v2722_v30 }
 0x4dc   : > { %2592 = vmax.xlane.f32.xlu1 %v2591_v62  ;;  %2583 = vmax.xlane.f32.xlu0 %v2582_v26  ;;  %v9360_v60 = vpop.eup %7449  ;;  %v2629_v62 = vsub.f32 %v9076_v43, %v2509_v42  ;;  %v2801_v36 = vsel %vm1425_vm0, %v9355_v63, 0.0  ;;  %7471 = vpow2.f32 %v2708_v56  ;;  %v2503_v42 = vpop.xlane.xlu1 %2502 }
 0x4dd   : > { %v9363_v21 = vpop.eup %7451  ;;  %v2816_v35 = vsel %vm1425_vm0, %v9360_v60, 0.0  ;;  %v2627_v46 = vsub.f32 %v9092_v32, %v2503_v42 }
 0x4de   : > { %v9366_v26 = vpop.eup %7453  ;;  %v2728_v3 = vmul.f32 1.442695, %v2629_v62 }
 0x4df   : > { %v2470_v11 = vpop.xlane.xlu0 %2469  ;;  %v9373_v43 = vpop.eup %7455  ;;  %v2810_v10 = vsel %vm1425_vm0, %v9366_v26, 0.0 }
 0x4e0   : > { %2586 = vmax.xlane.f32.xlu1 %v2585_v41  ;;  %2805 = vadd.xlane.f32.xlu0 %v2804_v57  ;;  %v2609_v57 = vsub.f32 %v9062_v52, %v2449_v37  ;;  %v2616_v22 = vsub.f32 %v9123_v9, %v2470_v11  ;;  %v2864_v41 = vsel %vm1425_vm0, %v9363_v21, 0.0  ;;  %v9380_v39 = vpop.eup %7457  ;;  %7473 = vpow2.f32 %v2728_v3 }
 0x4e1   : > { %v9382_v52 = vpop.eup %7459  ;;  %v2607_v37 = vsub.f32 %v9084_v15, %v2443_v18  ;;  %v2858_v9 = vsel %vm1425_vm0, %v9373_v43, 0.0  ;;  %v2828_v7 = vsel %vm1425_vm0, %v9380_v39, 0.0 }
 0x4e2   : > { %v2702_v33 = vmul.f32 1.442695, %v2616_v22  ;;  %v2819_v15 = vsel %vm1425_vm0, %v9382_v52, 0.0 }
 0x4e3   : > { %v2684_v62 = vmul.f32 1.442695, %v2607_v37 }
 0x4e4   : > { %2808 = vadd.xlane.f32.xlu1 %v2807_v23  ;;  %2799 = vadd.xlane.f32.xlu0 %v2798_v38  ;;  %v2688_v23 = vmul.f32 1.442695, %v2609_v57  ;;  %v9389_v38 = vpop.eup %7461  ;;  %v2797_v57 = vpop.xlane.xlu1 %2796 }
 0x4e5   : > { %v9392_v8 = vpop.eup %7463  ;;  %v2888_v30 = vsel %vm1425_vm0, %v9389_v38, 0.0 }
 0x4e6   : > { %7475 = vpow2.f32 %v2688_v23  ;;  %v2867_v32 = vsel %vm1425_vm0, %v9392_v8, 0.0 }
 0x4e7   : > { %7477 = vpow2.f32 %v2702_v33 }
 0x4e8   : > { %2802 = vadd.xlane.f32.xlu1 %v2801_v36  ;;  %2817 = vadd.xlane.f32.xlu0 %v2816_v35  ;;  %v9398_v36 = vpop.eup %7465  ;;  %v2724_v35 = vmul.f32 1.442695, %v2627_v46  ;;  %7479 = vpow2.f32 %v2684_v62 }
 0x4e9   : > { %v9400_v11 = vpop.eup %7467  ;;  %v2822_v56 = vsel %vm1425_vm0, %v9398_v36, 0.0 }
 0x4ea   : > { %v9406_v18 = vpop.eup %7469  ;;  %7481 = vpow2.f32 %v2724_v35 }
 0x4eb   : > { %v9408_v3 = vpop.eup %7471  ;;  %7483 = vrcp.f32 %v2797_v57 }
 0x4ec   : > { %2865 = vadd.xlane.f32.xlu1 %v2864_v41  ;;  %2811 = vadd.xlane.f32.xlu0 %v2810_v10  ;;  %v2813_v41 = vsel %vm1425_vm0, %v9400_v11, 0.0  ;;  %v2882_v10 = vsel %vm1425_vm0, %v9406_v18, 0.0  ;;  %7485 = vrcp.f32 %v9351_v27  ;;  %v2861_v42 = vsel %vm1425_vm0, %v9408_v3, 0.0 }
 0x4ed   : > { %v9410_v22 = vpop.eup %7473  ;;  %7487 = vrcp.f32 %v9336_v31 }
 0x4ee   : > { %v2891_v33 = vsel %vm1425_vm0, %v9410_v22, 0.0 }
 0x4f0   : > { %2859 = vadd.xlane.f32.xlu1 %v2858_v9  ;;  %2829 = vadd.xlane.f32.xlu0 %v2828_v7 }
 0x4f3   : > { %v9418_v37 = vpop.eup %7475 }
 0x4f4   : > { %2820 = vadd.xlane.f32.xlu1 %v2819_v15  ;;  %2889 = vadd.xlane.f32.xlu0 %v2888_v30  ;;  %v9424_v9 = vpop.eup %7477  ;;  %v2831_v27 = vsel %vm1425_vm0, %v9418_v37, 0.0 }
 0x4f5   : > { %10740 = vst [vmem:[#allocation64_spill] sm:$0xff] %v9424_v9  ;;  %v2852_v31 = vsel %vm1425_vm0, %v9424_v9, 0.0  ;;  %v9430_v7 = vpop.eup %7479 }
 0x4f6   : > { %v2825_v62 = vsel %vm1425_vm0, %v9430_v7, 0.0 }
 0x4f7   : > { %v9432_v46 = vpop.eup %7481 }
 0x4f8   : > { %2868 = vadd.xlane.f32.xlu1 %v2867_v32  ;;  %2823 = vadd.xlane.f32.xlu0 %v2822_v56  ;;  %v7484_v15 = vpop.eup %7483  ;;  %v2885_v56 = vsel %vm1425_vm0, %v9432_v46, 0.0 }
 0x4f9   : > { %v7486_v30 = vpop.eup %7485  ;;  %v3109_v57 = vmul.f32 %v7484_v15, %v9125_v13 }
 0x4fa   : > { %v7488_v35 = vpop.eup %7487 }
 0x4fc   : > { %2814 = vadd.xlane.f32.xlu1 %v2813_v41  ;;  %2883 = vadd.xlane.f32.xlu0 %v2882_v10  ;;  %v3106_v41 = vmul.f32 %v7486_v30, %v9117_v24 }
 0x4fd   : > { %v2791_v23 = vpop.xlane.xlu1 %2790 }
 0x4fe   : > { %7489 = vrcp.f32 %v2791_v23  ;;  %v3108_v23 = vmul.f32 %v7488_v35, %v9113_v28 }
 0x500   : > { %2862 = vadd.xlane.f32.xlu1 %v2861_v42  ;;  %2892 = vadd.xlane.f32.xlu0 %v2891_v33  ;;  %v3171_v33 = vpack.c.bf16 %v3109_v57, %v3108_v23 }
 0x501   : > { %v2473_v13 = vpop.xlane.xlu1 %2472 }
 0x504   : > { %2832 = vadd.xlane.f32.xlu1 %v2831_v27  ;;  %2853 = vadd.xlane.f32.xlu0 %v2852_v31 }
 0x508   : > { %2826 = vadd.xlane.f32.xlu1 %v2825_v62 }
 0x50b   : > { %v7490_v32 = vpop.eup %7489 }
 0x50c   : > { %2886 = vadd.xlane.f32.xlu1 %v2885_v56  ;;  %v3107_v10 = vmul.f32 %v7490_v32, %v9138_v59 }
 0x50e   : > { %v3170_v42 = vpack.c.bf16 %v3107_v10, %v3106_v41 }
 0x510   : > { %6834 = vmatprep.mubr.msk.bf16.mxu0 %vm1425_vm0, %v3170_v42 }
 0x511   : > { %6835 = vmatmul.mubr.msk.bf16.vlgmr.msra.gmra.mxu0 %vm1425_vm0, %v3171_v33 }
 0x512   : > { %6847 = vmatpush3.bf16.msra.mxu0 %v8991_v12  ;;  %v2617_v12 = vsub.f32 %v9142_v6, %v2473_v13 }
 0x513   : > { %6848 = vmatprep.subr.bf16.mxu0 %v9026_v25 }
 0x514   : > { %v2704_v41 = vmul.f32 1.442695, %v2617_v12 }
 0x516   : > { %6849 = vmatpush3.bf16.msra.mxu0 %v9026_v25 }
 0x517   : > { %6862 = vmatprep.subr.bf16.mxu0 %v8858_v48 }
 0x51d   : > { %v2530_v24 = vpop.xlane.xlu0 %2529 }
 0x51e   : > { %v2636_v59 = vsub.f32 %v9150_v17, %v2530_v24 }
 0x520   : > { %v2742_v27 = vmul.f32 1.442695, %v2636_v59 }
 0x521   : > { %v2533_v28 = vpop.xlane.xlu1 %2532  ;;  %v2464_v31 = vpop.xlane.xlu0 %2463 }
 0x522   : > { %7491 = vpow2.f32 %v2742_v27  ;;  %v2637_v62 = vsub.f32 %v9158_v50, %v2533_v28  ;;  %v2614_v15 = vsub.f32 %v9136_v29, %v2464_v31 }
 0x524   : > { %v2698_v30 = vmul.f32 1.442695, %v2614_v15  ;;  %v2744_v35 = vmul.f32 1.442695, %v2637_v62 }
 0x525   : > { %v2467_v32 = vpop.xlane.xlu1 %2466  ;;  %v2524_v25 = vpop.xlane.xlu0 %2523 }
 0x526   : > { %v2634_v56 = vsub.f32 %v9154_v2, %v2524_v25  ;;  %7493 = vpow2.f32 %v2698_v30  ;;  %v2615_v17 = vsub.f32 %v9156_v16, %v2467_v32 }
 0x527   : > { %7495 = vpow2.f32 %v2744_v35 }
 0x528   : > { %v2738_v57 = vmul.f32 1.442695, %v2634_v56  ;;  %v2700_v6 = vmul.f32 1.442695, %v2615_v17 }
 0x529   : > { %v2527_v10 = vpop.xlane.xlu1 %2526  ;;  %v9454_v23 = vpop.xlane.xlu0 %2841 }
 0x52a   : > { %v2635_v50 = vsub.f32 %v9174_v45, %v2527_v10  ;;  %7497 = vpow2.f32 %v2738_v57 }
 0x52b   : > { %7499 = vpow2.f32 %v2704_v41 }
 0x52c   : > { %v2740_v29 = vmul.f32 1.442695, %v2635_v50 }
 0x52d   : > { %v9457_v42 = vpop.xlane.xlu1 %2844  ;;  %v9459_v33 = vpop.xlane.xlu0 %2835 }
 0x52e   : > { %7501 = vpow2.f32 %v2740_v29 }
 0x52f   : > { %v9461_v2 = vpop.eup %7491  ;;  %7503 = vpow2.f32 %v2700_v6 }
 0x530   : > { %v2912_v13 = vsel %vm1425_vm0, %v9461_v2, 0.0 }
 0x531   : > { %v9465_v16 = vpop.xlane.xlu1 %2838  ;;  %2913 = vadd.xlane.f32.xlu0 %v2912_v13  ;;  %v2494_v24 = vpop.xlane.xlu0 %2493 }
 0x532   : > { %v2624_v45 = vsub.f32 %v9160_v14, %v2494_v24 }
 0x533   : > { %v9468_v59 = vpop.eup %7493 }
 0x534   : > { %v2718_v27 = vmul.f32 1.442695, %v2624_v45  ;;  %v2846_v31 = vsel %vm1425_vm0, %v9468_v59, 0.0  ;;  %v9472_v15 = vpop.eup %7495  ;;  %v10741_v45 = vld [vmem:[#allocation53_spill] sm:$0xff] }
 0x535   : > { %v2497_v28 = vpop.xlane.xlu1 %2496  ;;  %v2554_v62 = vpop.xlane.xlu0 %2553  ;;  %2847 = vadd.xlane.f32.xlu0 %v2846_v31  ;;  %v2915_v14 = vsel %vm1425_vm0, %v9472_v15, 0.0 }
 0x536   : > { %7505 = vpow2.f32 %v2718_v27  ;;  %v2644_v30 = vsub.f32 %v9194_v47, %v2554_v62  ;;  %v2625_v50 = vsub.f32 %v9178_v4, %v2497_v28  ;;  %v10742_v62 = vld [vmem:[#allocation55_spill] sm:$0xff] }
 0x537   : > { %v9475_v12 = vpop.eup %7497 }
 0x538   : > { %v2758_v35 = vmul.f32 1.442695, %v2644_v30  ;;  %v2906_v25 = vsel %vm1425_vm0, %v9475_v12, 0.0  ;;  %v9481_v57 = vpop.eup %7499  ;;  %v2720_v31 = vmul.f32 1.442695, %v2625_v50  ;;  %v10746_v50 = vld [vmem:[#allocation50_spill] sm:$0xff] }
 0x539   : > { %v2557_v32 = vpop.xlane.xlu1 %2556  ;;  %v2488_v56 = vpop.xlane.xlu0 %2487  ;;  %2916 = vadd.xlane.f32.xlu0 %v2915_v14  ;;  %2907 = vadd.xlane.f32.xlu1 %v2906_v25  ;;  %v2855_v6 = vsel %vm1425_vm0, %v9481_v57, 0.0  ;;  %v10743_v14 = vld [vmem:[#allocation58_spill] sm:$0xff] }
 0x53a   : > { %v2622_v41 = vsub.f32 %v9166_v53, %v2488_v56  ;;  %7507 = vpow2.f32 %v2758_v35  ;;  %v2645_v30 = vsub.f32 %v10742_v62, %v2557_v32  ;;  %v10744_v56 = vld [vmem:[#allocation52_spill] sm:$0xff]  ;;  %v10747_v62 = vld [vmem:[#allocation59_spill] sm:$0xff] }
 0x53b   : > { %v9484_v17 = vpop.eup %7501 }
 0x53c   : > { %v2714_v47 = vmul.f32 1.442695, %v2622_v41  ;;  %v2909_v10 = vsel %vm1425_vm0, %v9484_v17, 0.0  ;;  %v9491_v24 = vpop.eup %7503  ;;  %v2760_v32 = vmul.f32 1.442695, %v2645_v30  ;;  %v10748_v30 = vld [vmem:[#allocation56_spill] sm:$0xff] }
 0x53d   : > { %v2491_v29 = vpop.xlane.xlu1 %2490  ;;  %v2548_v13 = vpop.xlane.xlu0 %2547  ;;  %2910 = vadd.xlane.f32.xlu0 %v2909_v10  ;;  %2856 = vadd.xlane.f32.xlu1 %v2855_v6  ;;  %v2849_v4 = vsel %vm1425_vm0, %v9491_v24, 0.0 }
 0x53e   : > { %v2642_v53 = vsub.f32 %v10741_v45, %v2548_v13  ;;  %7509 = vpow2.f32 %v2714_v47  ;;  %v2623_v13 = vsub.f32 %v10746_v50, %v2491_v29  ;;  %v10749_v29 = vld [vmem:[#allocation54_spill] sm:$0xff] }
 0x540   : > { %v2754_v27 = vmul.f32 1.442695, %v2642_v53 }
 0x541   : > { %v2551_v35 = vpop.xlane.xlu1 %2550  ;;  %v2518_v28 = vpop.xlane.xlu0 %2517  ;;  %2850 = vadd.xlane.f32.xlu1 %v2849_v4 }
 0x542   : > { %v2643_v25 = vsub.f32 %v10743_v14, %v2551_v35  ;;  %v2632_v41 = vsub.f32 %v10744_v56, %v2518_v28  ;;  %7511 = vpow2.f32 %v2754_v27  ;;  %v2716_v27 = vmul.f32 1.442695, %v2623_v13 }
 0x543   : > { %v9499_v9 = vpop.eup %7505  ;;  %7513 = vpow2.f32 %v2720_v31 }
 0x544   : > { %10745 = vst [vmem:[#allocation53_spill] sm:$0xff] %v9499_v9  ;;  %v2756_v10 = vmul.f32 1.442695, %v2643_v25  ;;  %v2734_v6 = vmul.f32 1.442695, %v2632_v41  ;;  %v2876_v47 = vsel %vm1425_vm0, %v9499_v9, 0.0 }
 0x545   : > { %v2521_v45 = vpop.xlane.xlu1 %2520  ;;  %2877 = vadd.xlane.f32.xlu0 %v2876_v47  ;;  %v2578_v53 = vpop.xlane.xlu0 %2577 }
 0x546   : > { %7515 = vpow2.f32 %v2756_v10  ;;  %v2652_v35 = vsub.f32 %v10747_v62, %v2578_v53  ;;  %v2633_v56 = vsub.f32 %v10748_v30, %v2521_v45  ;;  %v10751_v53 = vld [vmem:[#allocation60_spill] sm:$0xff]  ;;  %v10752_v45 = vld [vmem:[#allocation62_spill] sm:$0xff] }
 0x547   : > { %v9505_v4 = vpop.eup %7507  ;;  %7517 = vpow2.f32 %v2734_v6 }
 0x548   : > { %v2774_v28 = vmul.f32 1.442695, %v2652_v35  ;;  %7519 = vpow2.f32 %v2760_v32  ;;  %v2936_v25 = vsel %vm1425_vm0, %v9505_v4, 0.0  ;;  %v2736_v13 = vmul.f32 1.442695, %v2633_v56 }
 0x549   : > { %v2581_v14 = vpop.xlane.xlu1 %2580  ;;  %v2512_v31 = vpop.xlane.xlu0 %2511  ;;  %2937 = vadd.xlane.f32.xlu0 %v2936_v25 }
 0x54a   : > { %v2630_v41 = vsub.f32 %v10749_v29, %v2512_v31  ;;  %7521 = vpow2.f32 %v2774_v28  ;;  %v2653_v25 = vsub.f32 %v10752_v45, %v2581_v14 }
 0x54b   : > { %v9511_v47 = vpop.eup %7509  ;;  %7523 = vpow2.f32 %v2716_v27 }
 0x54c   : > { %10750 = vst [vmem:[#allocation55_spill] sm:$0xff] %v9511_v47  ;;  %v2730_v10 = vmul.f32 1.442695, %v2630_v41  ;;  %v2870_v6 = vsel %vm1425_vm0, %v9511_v47, 0.0 }
 0x54d   : > { %v2515_v50 = vpop.xlane.xlu1 %2514  ;;  %v2572_v32 = vpop.xlane.xlu0 %2571  ;;  %2871 = vadd.xlane.f32.xlu1 %v2870_v6  ;;  %v2776_v6 = vmul.f32 1.442695, %v2653_v25  ;;  %v10756_v25 = vld [vmem:[#allocation63_spill] sm:$0xff] }
 0x54e   : > { %v2650_v62 = vsub.f32 %v10751_v53, %v2572_v32  ;;  %7525 = vpow2.f32 %v2730_v10  ;;  %v10754_v32 = vld [vmem:[#allocation57_spill] sm:$0xff] }
 0x54f   : > { %v9516_v35 = vpop.eup %7511  ;;  %7527 = vpow2.f32 %v2736_v13  ;;  %v2631_v53 = vsub.f32 %v10754_v32, %v2515_v50 }
 0x550   : > { %v2770_v31 = vmul.f32 1.442695, %v2650_v62  ;;  %v2930_v28 = vsel %vm1425_vm0, %v9516_v35, 0.0  ;;  %v9521_v29 = vpop.eup %7513 }
 0x551   : > { %v2575_v30 = vpop.xlane.xlu1 %2574  ;;  %v2542_v27 = vpop.xlane.xlu0 %2541  ;;  %10753 = vst [vmem:[#allocation58_spill] sm:$0xff] %v9521_v29  ;;  %2931 = vadd.xlane.f32.xlu1 %v2930_v28  ;;  %v2879_v13 = vsel %vm1425_vm0, %v9521_v29, 0.0  ;;  %v2732_v50 = vmul.f32 1.442695, %v2631_v53 }
 0x552   : > { %v2640_v56 = vsub.f32 %v9228_v54, %v2542_v27  ;;  %7529 = vpow2.f32 %v2770_v31  ;;  %v2651_v31 = vsub.f32 %v10756_v25, %v2575_v30  ;;  %v10758_v30 = vld [vmem:[#allocation61_spill] sm:$0xff] }
 0x553   : > { %v9524_v41 = vpop.eup %7515 }
 0x554   : > { %v2750_v14 = vmul.f32 1.442695, %v2640_v56  ;;  %v2933_v10 = vsel %vm1425_vm0, %v9524_v41, 0.0  ;;  %v9529_v62 = vpop.eup %7517 }
 0x555   : > { %10755 = vst [vmem:[#allocation52_spill] sm:$0xff] %v9529_v62  ;;  %v2545_v45 = vpop.xlane.xlu1 %2544  ;;  %2934 = vadd.xlane.f32.xlu0 %v2933_v10  ;;  %v2536_v28 = vpop.xlane.xlu0 %2535  ;;  %2880 = vadd.xlane.f32.xlu1 %v2879_v13  ;;  %v2900_v56 = vsel %vm1425_vm0, %v9529_v62, 0.0 }
 0x556   : > { %v9533_v9 = vpop.eup %7519  ;;  %v2638_v54 = vsub.f32 %v9242_v55, %v2536_v28  ;;  %7531 = vpow2.f32 %v2750_v14  ;;  %v2772_v55 = vmul.f32 1.442695, %v2651_v31 }
 0x557   : > { %7533 = vpow2.f32 %v2776_v6  ;;  %v9539_v32 = vpop.eup %7521  ;;  %v2939_v47 = vsel %vm1425_vm0, %v9533_v9, 0.0  ;;  %v2641_v6 = vsub.f32 %v10758_v30, %v2545_v45 }
 0x558   : > { %v2746_v27 = vmul.f32 1.442695, %v2638_v54  ;;  %10757 = vst [vmem:[#allocation50_spill] sm:$0xff] %v9539_v32  ;;  %v9543_v13 = vpop.eup %7523  ;;  %v2960_v53 = vsel %vm1425_vm0, %v9539_v32, 0.0 }
 0x559   : > { %v2539_v10 = vpop.xlane.xlu1 %2538  ;;  %2901 = vadd.xlane.f32.xlu0 %v2900_v56  ;;  %v2566_v29 = vpop.xlane.xlu0 %2565  ;;  %2940 = vadd.xlane.f32.xlu1 %v2939_v47  ;;  %v2873_v54 = vsel %vm1425_vm0, %v9543_v13, 0.0 }
 0x55a   : > { %7535 = vpow2.f32 %v2746_v27  ;;  %v2639_v31 = vsub.f32 %v9260_v1, %v2539_v10  ;;  %v2648_v10 = vsub.f32 %v9264_v0, %v2566_v29 }
 0x55b   : > { %7537 = vpow2.f32 %v2732_v50  ;;  %v9548_v14 = vpop.eup %7525  ;;  %v2752_v50 = vmul.f32 1.442695, %v2641_v6 }
 0x55c   : > { %v9553_v47 = vpop.eup %7527  ;;  %7539 = vpow2.f32 %v2772_v55  ;;  %v2894_v30 = vsel %vm1425_vm0, %v9548_v14, 0.0  ;;  %v2748_v1 = vmul.f32 1.442695, %v2639_v31  ;;  %v2766_v29 = vmul.f32 1.442695, %v2648_v10 }
 0x55d   : > { %v2569_v28 = vpop.xlane.xlu1 %2568  ;;  %2961 = vadd.xlane.f32.xlu0 %v2960_v53  ;;  %v2560_v25 = vpop.xlane.xlu0 %2559  ;;  %2874 = vadd.xlane.f32.xlu1 %v2873_v54 }
 0x55e   : > { %v2649_v56 = vsub.f32 %v9283_v44, %v2569_v28 }
 0x55f   : > { %v9556_v45 = vpop.eup %7529 }
 0x560   : > { %10759 = vst [vmem:[#allocation59_spill] sm:$0xff] %v9556_v45  ;;  %v2768_v27 = vmul.f32 1.442695, %v2649_v56  ;;  %v2954_v53 = vsel %vm1425_vm0, %v9556_v45, 0.0  ;;  %v2903_v56 = vsel %vm1425_vm0, %v9553_v47, 0.0 }
 0x561   : > { %v2563_v32 = vpop.xlane.xlu1 %2562  ;;  %2895 = vadd.xlane.f32.xlu0 %v2894_v30  ;;  %v2590_v62 = vpop.xlane.xlu0 %2589  ;;  %2955 = vadd.xlane.f32.xlu1 %v2954_v53 }
 0x562   : > { %7541 = vpow2.f32 %v2768_v27  ;;  %v2647_v44 = vsub.f32 %v9294_v51, %v2563_v32  ;;  %v2656_v55 = vsub.f32 %v9302_v19, %v2590_v62  ;;  %v2646_v19 = vsub.f32 %v9274_v58, %v2560_v25 }
 0x563   : > { %v9565_v6 = vpop.eup %7531  ;;  %7543 = vpow2.f32 %v2752_v50 }
 0x564   : > { %v2764_v28 = vmul.f32 1.442695, %v2647_v44  ;;  %v2782_v54 = vmul.f32 1.442695, %v2656_v55  ;;  %v9569_v30 = vpop.eup %7533  ;;  %v2924_v51 = vsel %vm1425_vm0, %v9565_v6, 0.0 }
 0x565   : > { %10760 = vst [vmem:[#allocation56_spill] sm:$0xff] %v9569_v30  ;;  %v2593_v45 = vpop.xlane.xlu1 %2592  ;;  %2904 = vadd.xlane.f32.xlu0 %v2903_v56  ;;  %v2584_v32 = vpop.xlane.xlu0 %2583  ;;  %2925 = vadd.xlane.f32.xlu1 %v2924_v51  ;;  %v2963_v50 = vsel %vm1425_vm0, %v9569_v30, 0.0  ;;  %v2762_v44 = vmul.f32 1.442695, %v2646_v19 }
 0x566   : > { %7545 = vpow2.f32 %v2764_v28  ;;  %v2654_v0 = vsub.f32 %v9314_v20, %v2584_v32  ;;  %v2657_v55 = vsub.f32 %v9323_v5, %v2593_v45 }
 0x567   : > { %7547 = vpow2.f32 %v2748_v1  ;;  %v9575_v62 = vpop.eup %7535 }
 0x568   : > { %7549 = vpow2.f32 %v2782_v54  ;;  %v2778_v31 = vmul.f32 1.442695, %v2654_v0  ;;  %v9579_v27 = vpop.eup %7537  ;;  %v2918_v58 = vsel %vm1425_vm0, %v9575_v62, 0.0  ;;  %v2784_v51 = vmul.f32 1.442695, %v2657_v55 }
 0x569   : > { %v2587_v53 = vpop.xlane.xlu1 %2586  ;;  %2964 = vadd.xlane.f32.xlu0 %v2963_v50  ;;  %v2806_v25 = vpop.xlane.xlu0 %2805  ;;  %2919 = vadd.xlane.f32.xlu1 %v2918_v58  ;;  %7551 = vpow2.f32 %v2766_v29  ;;  %v2897_v1 = vsel %vm1425_vm0, %v9579_v27, 0.0 }
 0x56a   : > { %v9583_v20 = vpop.eup %7539  ;;  %7553 = vpow2.f32 %v2778_v31  ;;  %v2655_v32 = vsub.f32 %v9334_v34, %v2587_v53 }
 0x56b   : > { %7555 = vpow2.f32 %v2762_v44  ;;  %v2957_v56 = vsel %vm1425_vm0, %v9583_v20, 0.0 }
 0x56c   : > { %v2780_v31 = vmul.f32 1.442695, %v2655_v32 }
 0x56d   : > { %v2809_v10 = vpop.xlane.xlu1 %2808  ;;  %2898 = vadd.xlane.f32.xlu0 %v2897_v1  ;;  %v2800_v28 = vpop.xlane.xlu0 %2799 }
 0x56e   : > { %7557 = vrcp.f32 %v2809_v10 }
 0x56f   : > { %v9588_v54 = vpop.eup %7541  ;;  %7559 = vrcp.f32 %v2800_v28 }
 0x570   : > { %10761 = vst [vmem:[#allocation54_spill] sm:$0xff] %v9588_v54  ;;  %v2951_v5 = vsel %vm1425_vm0, %v9588_v54, 0.0  ;;  %v9595_v45 = vpop.eup %7543  ;;  %7561 = vrcp.f32 %v2806_v25 }
 0x571   : > { %v2803_v19 = vpop.xlane.xlu1 %2802  ;;  %2958 = vadd.xlane.f32.xlu0 %v2957_v56  ;;  %2952 = vadd.xlane.f32.xlu1 %v2951_v5  ;;  %v2818_v50 = vpop.xlane.xlu0 %2817  ;;  %v2927_v34 = vsel %vm1425_vm0, %v9595_v45, 0.0 }
 0x572   : > { %7563 = vrcp.f32 %v2803_v19 }
 0x573   : > { %v9597_v0 = vpop.eup %7545  ;;  %7565 = vpow2.f32 %v2784_v51 }
 0x574   : > { %10762 = vst [vmem:[#allocation60_spill] sm:$0xff] %v9597_v0  ;;  %v9599_v29 = vpop.eup %7547  ;;  %v2945_v53 = vsel %vm1425_vm0, %v9597_v0, 0.0  ;;  %7567 = vpow2.f32 %v2780_v31 }
 0x575   : > { %v9605_v58 = vpop.eup %7549  ;;  %v9607_v25 = vpop.xlane.xlu1 %2865  ;;  %2928 = vadd.xlane.f32.xlu0 %v2927_v34  ;;  %2946 = vadd.xlane.f32.xlu1 %v2945_v53  ;;  %v2921_v55 = vsel %vm1425_vm0, %v9599_v29, 0.0  ;;  %7569 = vrcp.f32 %v9459_v33 }
 0x576   : > { %10763 = vst [vmem:[#allocation62_spill] sm:$0xff] %v9605_v58  ;;  %v9609_v44 = vpop.eup %7551  ;;  %v2972_v1 = vsel %vm1425_vm0, %v9605_v58, 0.0  ;;  %v2812_v56 = vpop.xlane.xlu0 %2811  ;;  %7571 = vrcp.f32 %v9465_v16  ;;  %v10767_v16 = vld [vmem:[#allocation32_spill] sm:$0xff] }
 0x577   : > { %10764 = vst [vmem:[#allocation57_spill] sm:$0xff] %v9609_v44  ;;  %v9615_v10 = vpop.eup %7553  ;;  %v2948_v5 = vsel %vm1425_vm0, %v9609_v44, 0.0 }
 0x578   : > { %10765 = vst [vmem:[#allocation63_spill] sm:$0xff] %v9615_v10  ;;  %v9617_v51 = vpop.eup %7555  ;;  %v2966_v19 = vsel %vm1425_vm0, %v9615_v10, 0.0 }
 0x579   : > { %v2860_v28 = vpop.xlane.xlu1 %2859  ;;  %2922 = vadd.xlane.f32.xlu0 %v2921_v55  ;;  %2973 = vadd.xlane.f32.xlu1 %v2972_v1  ;;  %v2942_v1 = vsel %vm1425_vm0, %v9617_v51, 0.0 }
 0x57a   : > { %v2830_v55 = vpop.xlane.xlu0 %2829 }
 0x57b   : > { %v7558_v32 = vpop.eup %7557 }
 0x57c   : > { %v7560_v31 = vpop.eup %7559  ;;  %v3113_v54 = vmul.f32 %v7558_v32, %v9342_v61 }
 0x57d   : > { %v2821_v34 = vpop.xlane.xlu1 %2820  ;;  %2949 = vadd.xlane.f32.xlu0 %v2948_v5  ;;  %2967 = vadd.xlane.f32.xlu1 %v2966_v19  ;;  %v7562_v53 = vpop.eup %7561  ;;  %v3110_v0 = vmul.f32 %v7560_v31, %v9347_v40  ;;  %v10769_v31 = vld [vmem:[#allocation28_spill] sm:$0xff] }
 0x57e   : > { %v3112_v5 = vmul.f32 %v7562_v53, %v9327_v49  ;;  %7573 = vrcp.f32 %v2821_v34  ;;  %v2890_v33 = vpop.xlane.xlu0 %2889  ;;  %v10766_v49 = vld [vmem:[#allocation29_spill] sm:$0xff] }
 0x57f   : > { %v7564_v58 = vpop.eup %7563  ;;  %7575 = vrcp.f32 %v2812_v56 }
 0x580   : > { %v3111_v30 = vmul.f32 %v7564_v58, %v9355_v63  ;;  %v9628_v44 = vpop.eup %7565  ;;  %v3173_v61 = vpack.c.bf16 %v3113_v54, %v3112_v5  ;;  %7577 = vrcp.f32 %v2818_v50 }
 0x581   : > { %v2869_v10 = vpop.xlane.xlu1 %2868  ;;  %2943 = vadd.xlane.f32.xlu0 %v2942_v1  ;;  %v2975_v40 = vsel %vm1425_vm0, %v9628_v44, 0.0  ;;  %v9636_v63 = vpop.eup %7567 }
 0x582   : > { %v3172_v19 = vpack.c.bf16 %v3111_v30, %v3110_v0  ;;  %v2969_v30 = vsel %vm1425_vm0, %v9636_v63, 0.0  ;;  %v10768_v0 = vld [vmem:[#allocation30_spill] sm:$0xff]  ;;  %v2824_v50 = vpop.xlane.xlu0 %2823  ;;  %v7570_v32 = vpop.eup %7569 }
 0x583   : > { %v7572_v34 = vpop.eup %7571 }
 0x584   : > { %6842 = vmatprep.mubr.msk.bf16.mxu1 %vm1425_vm0, %v3172_v19 }
 0x585   : > { %v2815_v58 = vpop.xlane.xlu1 %2814  ;;  %2976 = vadd.xlane.f32.xlu0 %v2975_v40  ;;  %6843 = vmatmul.mubr.msk.bf16.vlgmr.msra.gmra.mxu1 %vm1425_vm0, %v3173_v61 }
 0x586   : > { %7579 = vrcp.f32 %v2815_v58  ;;  %6855 = vmatpush3.bf16.msra.mxu1 %v10766_v49  ;;  %v2884_v19 = vpop.xlane.xlu0 %2883  ;;  %v10770_v58 = vld [vmem:[#allocation51_spill] sm:$0xff] }
 0x587   : > { %6856 = vmatprep.subr.bf16.mxu1 %v10767_v16  ;;  %7581 = vrcp.f32 %v9457_v42  ;;  %v3123_v49 = vmul.f32 %v7572_v34, %v10770_v58 }
 0x589   : > { %v2863_v54 = vpop.xlane.xlu1 %2862  ;;  %2970 = vadd.xlane.f32.xlu0 %v2969_v30 }
 0x58a   : > { %6857 = vmatpush3.bf16.msra.mxu1 %v10767_v16  ;;  %7583 = vrcp.f32 %v2863_v54  ;;  %v10771_v54 = vld [vmem:[#allocation48_spill] sm:$0xff] }
 0x58b   : > { %6870 = vmatprep.subr.bf16.mxu1 %v10768_v0  ;;  %7585 = vrcp.f32 %v9454_v23  ;;  %v7574_v53 = vpop.eup %7573 }
 0x58c   : > { %7587 = vrcp.f32 %v2860_v28  ;;  %v7576_v1 = vpop.eup %7575  ;;  %v3117_v23 = vmul.f32 %v7574_v53, %v9382_v52 }
 0x58d   : > { %v2833_v56 = vpop.xlane.xlu1 %2832  ;;  %v7578_v42 = vpop.eup %7577  ;;  %v3114_v40 = vmul.f32 %v7576_v1, %v9366_v26 }
 0x58e   : > { %1413 = vrot.lane.b32.xlu1 %v10769_v31, %s8168_s16  ;;  %7589 = vrcp.f32 %v2833_v56  ;;  %v3116_v30 = vmul.f32 %v7578_v42, %v9360_v60 }
 0x58f   : > { %7591 = vrcp.f32 %v2824_v50  ;;  %v3122_v50 = vmul.f32 %v7570_v32, %v10771_v54  ;;  %v10773_v32 = vld [vmem:[#allocation49_spill] sm:$0xff] }
 0x590   : > { %7593 = vrcp.f32 %v2830_v55  ;;  %v3175_v56 = vpack.c.bf16 %v3117_v23, %v3116_v30 }
 0x591   : > { %v2827_v5 = vpop.xlane.xlu1 %2826  ;;  %v3178_v26 = vpack.c.bf16 %v3123_v49, %v3122_v50 }
 0x592   : > { %7595 = vrcp.f32 %v2827_v5 }
 0x593   : > { %v7580_v61 = vpop.eup %7579  ;;  %7597 = vrcp.f32 %v2869_v10  ;;  %v2893_v10 = vpop.xlane.xlu0 %2892 }
 0x594   : > { %v3115_v28 = vmul.f32 %v7580_v61, %v9400_v11  ;;  %7599 = vrcp.f32 %v9607_v25  ;;  %v7582_v5 = vpop.eup %7581  ;;  %v10772_v25 = vld [vmem:[#allocation24_spill] sm:$0xff] }
 0x595   : > { %v2887_v16 = vpop.xlane.xlu1 %2886  ;;  %v3125_v34 = vmul.f32 %v7582_v5, %v10773_v32 }
 0x596   : > { %7601 = vrcp.f32 %v2887_v16  ;;  %v3174_v55 = vpack.c.bf16 %v3115_v28, %v3114_v40  ;;  %v10775_v28 = vld [vmem:[#allocation31_spill] sm:$0xff] }
 0x597   : > { %7603 = vrcp.f32 %v2884_v19  ;;  %v7584_v52 = vpop.eup %7583  ;;  %v10774_v19 = vld [vmem:[#allocation47_spill] sm:$0xff] }
 0x598   : > { %6850 = vmatprep.mubr.msk.bf16.mxu0 %vm1425_vm0, %v3174_v55  ;;  %v7586_v11 = vpop.eup %7585  ;;  %7605 = vrcp.f32 %v2893_v10  ;;  %v3131_v1 = vmul.f32 %v7584_v52, %v9408_v3  ;;  %v10777_v10 = vld [vmem:[#allocation34_spill] sm:$0xff] }
 0x599   : > { %6851 = vmatmul.mubr.msk.bf16.vlgmr.msra.gmra.mxu0 %vm1425_vm0, %v3175_v56  ;;  %v7588_v60 = vpop.eup %7587  ;;  %7607 = vrcp.f32 %v2890_v33  ;;  %v3124_v61 = vmul.f32 %v7586_v11, %v10774_v19  ;;  %v10776_v56 = vld [vmem:[#allocation33_spill] sm:$0xff] }
 0x59a   : > { %6863 = vmatpush3.bf16.msra.mxu0 %v8858_v48  ;;  %6866 = vmatprep.mubr.msk.bf16.mxu0 %vm1425_vm0, %v3178_v26  ;;  %v3130_v48 = vmul.f32 %v7588_v60, %v9373_v43  ;;  %v10778_v26 = vld [vmem:[#allocation25_spill] sm:$0xff] }
 0x59b   : > { %6864 = vmatprep.subr.bf16.mxu0 %v10772_v25  ;;  %v7590_v53 = vpop.eup %7589  ;;  %v3179_v58 = vpack.c.bf16 %v3125_v34, %v3124_v61 }
 0x59c   : > { %v7592_v42 = vpop.eup %7591  ;;  %v3121_v49 = vmul.f32 %v7590_v53, %v9418_v37  ;;  %v3182_v3 = vpack.c.bf16 %v3131_v1, %v3130_v48  ;;  %v10782_v53 = vld [vmem:[#allocation43_spill] sm:$0xff]  ;;  %v2854_v1 = vpop.xlane.xlu0 %2853 }
 0x59d   : > { %v7594_v23 = vpop.eup %7593  ;;  %v3118_v33 = vmul.f32 %v7592_v42, %v9398_v36  ;;  %v10783_v42 = vld [vmem:[#allocation26_spill] sm:$0xff] }
 0x59e   : > { %6865 = vmatpush3.bf16.msra.mxu0 %v10772_v25  ;;  %v3120_v55 = vmul.f32 %v7594_v23, %v9380_v39  ;;  %v10780_v25 = vld [vmem:[#allocation27_spill] sm:$0xff] }
 0x59f   : > { %v7596_v40 = vpop.eup %7595  ;;  %6878 = vmatprep.subr.bf16.mxu0 %v10775_v28  ;;  %1389 = vrot.lane.b32.xlu0 %v10769_v31, %s8167_s30 }
 0x5a0   : > { %v7598_v16 = vpop.eup %7597  ;;  %v3119_v30 = vmul.f32 %v7596_v40, %v9430_v7  ;;  %v3177_v37 = vpack.c.bf16 %v3121_v49, %v3120_v55 }
 0x5a1   : > { %6867 = vmatmul.mubr.msk.bf16.vlgmr.msra.gmra.mxu0 %vm1425_vm0, %v3179_v58  ;;  %v7600_v43 = vpop.eup %7599  ;;  %v3133_v5 = vmul.f32 %v7598_v16, %v9392_v8 }
 0x5a2   : > { %6879 = vmatpush3.bf16.msra.mxu0 %v10775_v28  ;;  %6882 = vmatprep.mubr.msk.bf16.mxu0 %vm1425_vm0, %v3182_v3  ;;  %v3176_v54 = vpack.c.bf16 %v3119_v30, %v3118_v33  ;;  %v3132_v7 = vmul.f32 %v7600_v43, %v9363_v21 }
 0x5a3   : > { %v7602_v50 = vpop.eup %7601  ;;  %6880 = vmatprep.subr.bf16.mxu0 %v10776_v56 }
 0x5a4   : > { %6858 = vmatprep.mubr.msk.bf16.mxu1 %vm1425_vm0, %v3176_v54  ;;  %v7604_v36 = vpop.eup %7603  ;;  %v3139_v39 = vmul.f32 %v7602_v50, %v9432_v46  ;;  %v3183_v52 = vpack.c.bf16 %v3133_v5, %v3132_v7 }
 0x5a5   : > { %6859 = vmatmul.mubr.msk.bf16.vlgmr.msra.gmra.mxu1 %vm1425_vm0, %v3177_v37  ;;  %v7606_v11 = vpop.eup %7605  ;;  %v3138_v8 = vmul.f32 %v7604_v36, %v9406_v18  ;;  %v10781_v18 = vld [vmem:[#allocation35_spill] sm:$0xff] }
 0x5a6   : > { %6871 = vmatpush3.bf16.msra.mxu1 %v10768_v0  ;;  %6881 = vmatpush3.bf16.msra.mxu0 %v10776_v56  ;;  %v7608_v60 = vpop.eup %7607  ;;  %v10779_v0 = vld [vmem:[#allocation36_spill] sm:$0xff]  ;;  %v3141_v46 = vmul.f32 %v7606_v11, %v9410_v22 }
 0x5a7   : > { %6872 = vmatprep.subr.bf16.mxu1 %v10777_v10  ;;  %6894 = vmatprep.subr.bf16.mxu0 %v10778_v26  ;;  %v3186_v21 = vpack.c.bf16 %v3139_v39, %v3138_v8  ;;  %v3140_v32 = vmul.f32 %v7608_v60, %v9389_v38  ;;  %v10784_v11 = vld [vmem:[#allocation64_spill] sm:$0xff]  ;;  %v10786_v8 = vld [vmem:[#allocation39_spill] sm:$0xff] }
 0x5a9   : > { %6883 = vmatmul.mubr.msk.bf16.vlgmr.msra.gmra.mxu0 %vm1425_vm0, %v3183_v52  ;;  %v3187_v34 = vpack.c.bf16 %v3141_v46, %v3140_v32 }
 0x5aa   : > { %6873 = vmatpush3.bf16.msra.mxu1 %v10777_v10  ;;  %6895 = vmatpush3.bf16.msra.mxu0 %v10778_v26 }
 0x5ab   : > { %6886 = vmatprep.subr.bf16.mxu1 %v10779_v0  ;;  %6896 = vmatprep.subr.bf16.mxu0 %v10780_v25 }
 0x5ac   : > { %6898 = vmatprep.mubr.msk.bf16.mxu0 %vm1425_vm0, %v3186_v21 }
 0x5ae   : > { %6897 = vmatpush3.bf16.msra.mxu0 %v10780_v25  ;;  %v10787_v25 = vld [vmem:[#allocation40_spill] sm:$0xff] }
 0x5af   : > { %6910 = vmatprep.subr.bf16.mxu0 %v10781_v18 }
 0x5b1   : > { %6899 = vmatmul.mubr.msk.bf16.vlgmr.msra.gmra.mxu0 %vm1425_vm0, %v3187_v34 }
 0x5b2   : > { %6911 = vmatpush3.bf16.msra.mxu0 %v10781_v18 }
 0x5b3   : > { %6912 = vmatprep.subr.bf16.mxu0 %v10782_v53 }
 0x5b6   : > { %6913 = vmatpush3.bf16.msra.mxu0 %v10782_v53 }
 0x5b7   : > { %6926 = vmatprep.subr.bf16.mxu0 %v10783_v42 }
 0x5ba   : > { %v2914_v22 = vpop.xlane.xlu0 %2913 }
 0x5bb   : > { %7609 = vrcp.f32 %v2914_v22 }
 0x5be   : > { %v2848_v19 = vpop.xlane.xlu0 %2847 }
 0x5c2   : > { %v2908_v61 = vpop.xlane.xlu1 %2907  ;;  %v2917_v38 = vpop.xlane.xlu0 %2916 }
 0x5c3   : > { %7611 = vrcp.f32 %v2917_v38 }
 0x5c4   : > { %7613 = vrcp.f32 %v2908_v61 }
 0x5c6   : > { %v2857_v23 = vpop.xlane.xlu1 %2856  ;;  %v2911_v48 = vpop.xlane.xlu0 %2910 }
 0x5c7   : > { %7615 = vrcp.f32 %v2857_v23 }
 0x5c8   : > { %7617 = vrcp.f32 %v2911_v48  ;;  %v7610_v28 = vpop.eup %7609 }
 0x5c9   : > { %7619 = vrcp.f32 %v2848_v19  ;;  %v3148_v37 = vmul.f32 %v7610_v28, %v9461_v2 }
 0x5ca   : > { %7621 = vrcp.f32 %v2854_v1  ;;  %v2851_v40 = vpop.xlane.xlu1 %2850 }
 0x5cb   : > { %7623 = vrcp.f32 %v2851_v40 }
 0x5ce   : > { %v2878_v16 = vpop.xlane.xlu0 %2877 }
 0x5d0   : > { %v7612_v58 = vpop.eup %7611 }
 0x5d1   : > { %v7614_v49 = vpop.eup %7613  ;;  %v3149_v30 = vmul.f32 %v7612_v58, %v9472_v15 }
 0x5d2   : > { %v3146_v54 = vmul.f32 %v7614_v49, %v9475_v12  ;;  %v2938_v39 = vpop.xlane.xlu0 %2937 }
 0x5d3   : > { %v3191_v10 = vpack.c.bf16 %v3149_v30, %v3148_v37  ;;  %v10789_v30 = vld [vmem:[#allocation55_spill] sm:$0xff] }
 0x5d4   : > { %v7616_v3 = vpop.eup %7615 }
 0x5d5   : > { %v7618_v33 = vpop.eup %7617  ;;  %v3129_v7 = vmul.f32 %v7616_v3, %v9481_v57 }
 0x5d6   : > { %v7620_v55 = vpop.eup %7619  ;;  %v2872_v43 = vpop.xlane.xlu1 %2871  ;;  %v3147_v50 = vmul.f32 %v7618_v33, %v9484_v17 }
 0x5d7   : > { %v7622_v56 = vpop.eup %7621  ;;  %v3126_v26 = vmul.f32 %v7620_v55, %v9468_v59 }
 0x5d8   : > { %v7624_v5 = vpop.eup %7623  ;;  %v3190_v36 = vpack.c.bf16 %v3147_v50, %v3146_v54  ;;  %v3128_v12 = vmul.f32 %v7622_v56, %v10784_v11 }
 0x5d9   : > { %v3127_v52 = vmul.f32 %v7624_v5, %v9491_v24  ;;  %v10785_v24 = vld [vmem:[#allocation38_spill] sm:$0xff] }
 0x5da   : > { %6914 = vmatprep.mubr.msk.bf16.mxu0 %vm1425_vm0, %v3190_v36  ;;  %v2932_v15 = vpop.xlane.xlu1 %2931  ;;  %v3181_v2 = vpack.c.bf16 %v3129_v7, %v3128_v12  ;;  %v10791_v36 = vld [vmem:[#allocation41_spill] sm:$0xff] }
 0x5db   : > { %6915 = vmatmul.mubr.msk.bf16.vlgmr.msra.gmra.mxu0 %vm1425_vm0, %v3191_v10  ;;  %v3180_v17 = vpack.c.bf16 %v3127_v52, %v3126_v26  ;;  %7625 = vrcp.f32 %v2932_v15  ;;  %v10792_v10 = vld [vmem:[#allocation42_spill] sm:$0xff] }
 0x5dc   : > { %6927 = vmatpush3.bf16.msra.mxu0 %v10783_v42 }
 0x5dd   : > { %6928 = vmatprep.subr.bf16.mxu0 %v10769_v31  ;;  %6874 = vmatprep.mubr.msk.bf16.mxu1 %vm1425_vm0, %v3180_v17 }
 0x5de   : > { %v2935_v57 = vpop.xlane.xlu0 %2934  ;;  %v2881_v59 = vpop.xlane.xlu1 %2880  ;;  %6875 = vmatmul.mubr.msk.bf16.vlgmr.msra.gmra.mxu1 %vm1425_vm0, %v3181_v2 }
 0x5df   : > { %7627 = vrcp.f32 %v2935_v57  ;;  %6887 = vmatpush3.bf16.msra.mxu1 %v10779_v0 }
 0x5e0   : > { %6929 = vmatpush3.bf16.msra.mxu0 %v10769_v31  ;;  %6888 = vmatprep.subr.bf16.mxu1 %v10785_v24  ;;  %7629 = vrcp.f32 %v2938_v39 }
 0x5e1   : > { %6942 = vmatprep.subr.bf16.mxu0 %v10786_v8 }
 0x5e2   : > { %v2902_v60 = vpop.xlane.xlu0 %2901  ;;  %v2941_v21 = vpop.xlane.xlu1 %2940 }
 0x5e3   : > { %7631 = vrcp.f32 %v2941_v21  ;;  %6889 = vmatpush3.bf16.msra.mxu1 %v10785_v24 }
 0x5e4   : > { %7633 = vrcp.f32 %v2881_v59  ;;  %6902 = vmatprep.subr.bf16.mxu1 %v10787_v25  ;;  %v10793_v59 = vld [vmem:[#allocation52_spill] sm:$0xff] }
 0x5e5   : > { %7635 = vrcp.f32 %v2872_v43 }
 0x5e6   : > { %v9722_v46 = vpop.xlane.xlu0 %2961  ;;  %7637 = vrcp.f32 %v2878_v16  ;;  %v2875_v0 = vpop.xlane.xlu1 %2874 }
 0x5e7   : > { %7639 = vrcp.f32 %v2875_v0 }
 0x5e8   : > { %v7626_v31 = vpop.eup %7625 }
 0x5e9   : > { %v3154_v53 = vmul.f32 %v7626_v31, %v9516_v35 }
 0x5ea   : > { %v2896_v32 = vpop.xlane.xlu0 %2895  ;;  %v2956_v18 = vpop.xlane.xlu1 %2955 }
 0x5ec   : > { %v7628_v34 = vpop.eup %7627 }
 0x5ed   : > { %v3155_v1 = vmul.f32 %v7628_v34, %v9524_v41  ;;  %v7630_v22 = vpop.eup %7629  ;;  %v10788_v41 = vld [vmem:[#allocation58_spill] sm:$0xff] }
 0x5ee   : > { %v2905_v42 = vpop.xlane.xlu0 %2904  ;;  %v2926_v38 = vpop.xlane.xlu1 %2925  ;;  %v3156_v40 = vmul.f32 %v7630_v22, %v9505_v4  ;;  %v10796_v22 = vld [vmem:[#allocation37_spill] sm:$0xff] }
 0x5ef   : > { %v3194_v19 = vpack.c.bf16 %v3155_v1, %v3154_v53  ;;  %7641 = vrcp.f32 %v2905_v42 }
 0x5f0   : > { %v7632_v61 = vpop.eup %7631  ;;  %7643 = vrcp.f32 %v2896_v32 }
 0x5f1   : > { %6930 = vmatprep.mubr.msk.bf16.mxu0 %vm1425_vm0, %v3194_v19  ;;  %v7634_v23 = vpop.eup %7633  ;;  %v3157_v28 = vmul.f32 %v7632_v61, %v9533_v9  ;;  %7645 = vrcp.f32 %v2902_v60  ;;  %v10790_v9 = vld [vmem:[#allocation53_spill] sm:$0xff] }
 0x5f2   : > { %v2965_v48 = vpop.xlane.xlu0 %2964  ;;  %v7636_v58 = vpop.eup %7635  ;;  %v3137_v3 = vmul.f32 %v7634_v23, %v10788_v41 }
 0x5f3   : > { %v7638_v49 = vpop.eup %7637  ;;  %v3195_v16 = vpack.c.bf16 %v3157_v28, %v3156_v40  ;;  %v3134_v55 = vmul.f32 %v7636_v58, %v10789_v30  ;;  %v2920_v54 = vpop.xlane.xlu1 %2919 }
 0x5f4   : > { %v7640_v35 = vpop.eup %7639  ;;  %v3136_v4 = vmul.f32 %v7638_v49, %v10790_v9 }
 0x5f5   : > { %6931 = vmatmul.mubr.msk.bf16.vlgmr.msra.gmra.mxu0 %vm1425_vm0, %v3195_v16  ;;  %v3135_v43 = vmul.f32 %v7640_v35, %v9543_v13  ;;  %v10797_v35 = vld [vmem:[#allocation56_spill] sm:$0xff] }
 0x5f6   : > { %v2899_v33 = vpop.xlane.xlu0 %2898  ;;  %6943 = vmatpush3.bf16.msra.mxu0 %v10786_v8  ;;  %v3185_v56 = vpack.c.bf16 %v3137_v3, %v3136_v4  ;;  %v10801_v4 = vld [vmem:[#allocation57_spill] sm:$0xff] }
 0x5f7   : > { %7647 = vrcp.f32 %v2899_v33  ;;  %v3184_v50 = vpack.c.bf16 %v3135_v43, %v3134_v55 }
 0x5f8   : > { %7649 = vrcp.f32 %v2956_v18 }
 0x5f9   : > { %6890 = vmatprep.mubr.msk.bf16.mxu1 %vm1425_vm0, %v3184_v50 }
 0x5fa   : > { %v2959_v37 = vpop.xlane.xlu0 %2958  ;;  %v2953_v5 = vpop.xlane.xlu1 %2952  ;;  %6891 = vmatmul.mubr.msk.bf16.vlgmr.msra.gmra.mxu1 %vm1425_vm0, %v3185_v56 }
 0x5fb   : > { %6903 = vmatpush3.bf16.msra.mxu1 %v10787_v25  ;;  %7651 = vrcp.f32 %v2959_v37  ;;  %v10802_v37 = vld [vmem:[#allocation54_spill] sm:$0xff] }
 0x5fc   : > { %6904 = vmatprep.subr.bf16.mxu1 %v10791_v36  ;;  %v7642_v7 = vpop.eup %7641 }
 0x5fd   : > { %v7644_v26 = vpop.eup %7643  ;;  %v3145_v12 = vmul.f32 %v7642_v7, %v9553_v47  ;;  %v10794_v47 = vld [vmem:[#allocation59_spill] sm:$0xff] }
 0x5fe   : > { %v2929_v13 = vpop.xlane.xlu0 %2928  ;;  %v2947_v39 = vpop.xlane.xlu1 %2946  ;;  %v3142_v17 = vmul.f32 %v7644_v26, %v9548_v14 }
 0x5ff   : > { %6905 = vmatpush3.bf16.msra.mxu1 %v10791_v36  ;;  %7653 = vrcp.f32 %v2929_v13  ;;  %v7646_v15 = vpop.eup %7645  ;;  %v10803_v13 = vld [vmem:[#allocation46_spill] sm:$0xff] }
 0x600   : > { %6918 = vmatprep.subr.bf16.mxu1 %v10792_v10  ;;  %7655 = vrcp.f32 %v2920_v54  ;;  %v3144_v24 = vmul.f32 %v7646_v15, %v10793_v59  ;;  %v10800_v54 = vld [vmem:[#allocation60_spill] sm:$0xff] }
 0x601   : > { %7657 = vrcp.f32 %v2926_v38 }
 0x602   : > { %v2923_v52 = vpop.xlane.xlu0 %2922  ;;  %v2974_v60 = vpop.xlane.xlu1 %2973  ;;  %v3189_v25 = vpack.c.bf16 %v3145_v12, %v3144_v24  ;;  %v10806_v24 = vmov 0  }
 0x603   : > { %7659 = vrcp.f32 %v2923_v52  ;;  %v10804_v52 = vld [vmem:[#allocation63_spill] sm:$0xff] }
 0x604   : > { %v7648_v11 = vpop.eup %7647  ;;  %7661 = vrcp.f32 %v2965_v48 }
 0x605   : > { %v3143_v2 = vmul.f32 %v7648_v11, %v9579_v27  ;;  %v7650_v8 = vpop.eup %7649  ;;  %7663 = vrcp.f32 %v9722_v46  ;;  %v10795_v46 = vld [vmem:[#allocation44_spill] sm:$0xff] }
 0x606   : > { %v2950_v57 = vpop.xlane.xlu0 %2949  ;;  %7665 = vrcp.f32 %v2947_v39  ;;  %v3162_v27 = vmul.f32 %v7650_v8, %v10794_v47  ;;  %v2968_v18 = vpop.xlane.xlu1 %2967 }
 0x607   : > { %v3188_v21 = vpack.c.bf16 %v3143_v2, %v3142_v17  ;;  %7667 = vrcp.f32 %v2950_v57  ;;  %v10805_v2 = vld [vmem:[#allocation62_spill] sm:$0xff] }
 0x608   : > { %v7652_v0 = vpop.eup %7651  ;;  %7669 = vrcp.f32 %v2953_v5 }
 0x609   : > { %6906 = vmatprep.mubr.msk.bf16.mxu1 %vm1425_vm0, %v3188_v21  ;;  %v3163_v31 = vmul.f32 %v7652_v0, %v9583_v20  ;;  %v7305_v21 = vld [vmem:[#allocation7 + $0x38] sm:$0xff]  }
 0x60a   : > { %6907 = vmatmul.mubr.msk.bf16.vlgmr.msra.gmra.mxu1 %vm1425_vm0, %v3189_v25  ;;  %v2944_v14 = vpop.xlane.xlu0 %2943  ;;  %v1414_v26 = vpop.permute.xlu1 %1413 }
 0x60b   : > { %6919 = vmatpush3.bf16.msra.mxu1 %v10792_v10  ;;  %7671 = vrcp.f32 %v2944_v14  ;;  %v3198_v32 = vpack.c.bf16 %v3163_v31, %v3162_v27  ;;  %v9782_v14 = vpop.f32.mrf.mxu0  ;;  %v7307_v31 = vld [vmem:[#allocation7 + $0x28] sm:$0xff]  }
 0x60c   : > { %6920 = vmatprep.subr.bf16.mxu1 %v10795_v46  ;;  %v7654_v34 = vpop.eup %7653  ;;  %7673 = vrcp.f32 %v2968_v18 }
 0x60d   : > { %6946 = vmatprep.mubr.msk.bf16.mxu0 %vm1425_vm0, %v3198_v32  ;;  %v7656_v1 = vpop.eup %7655  ;;  %v3153_v20 = vmul.f32 %v7654_v34, %v9595_v45  ;;  %v9786_v27 = vpop.f32.mrf.mxu0  ;;  %v7308_v32 = vld [vmem:[#allocation7 + $0x20] sm:$0xff]   ;;  %v7309_v34 = vld [vmem:[#allocation7 + $0x18] sm:$0xff]  }
 0x60e   : > { %v2977_v53 = vpop.xlane.xlu0 %2976  ;;  %v7658_v42 = vpop.eup %7657  ;;  %v3150_v23 = vmul.f32 %v7656_v1, %v9575_v62  ;;  %v10798_v62 = vld [vmem:[#allocation50_spill] sm:$0xff] }
 0x60f   : > { %6921 = vmatpush3.bf16.msra.mxu1 %v10795_v46  ;;  %7675 = vrcp.f32 %v2977_v53  ;;  %v3152_v40 = vmul.f32 %v7658_v42, %v9565_v6  ;;  %v10799_v6 = vld [vmem:[#allocation45_spill] sm:$0xff]  ;;  %v9788_v46 = vpop.f32.mrf.mxu0  ;;  %v7310_v42 = vld [vmem:[#allocation7 + $0x10] sm:$0xff]  }
 0x610   : > { %6934 = vmatprep.subr.bf16.mxu1 %v10796_v22  ;;  %v7660_v19 = vpop.eup %7659  ;;  %7677 = vrcp.f32 %v2974_v60 }
 0x611   : > { %v7662_v61 = vpop.eup %7661  ;;  %v3151_v48 = vmul.f32 %v7660_v19, %v9599_v29  ;;  %v3193_v16 = vpack.c.bf16 %v3153_v20, %v3152_v40  ;;  %v9790_v18 = vpop.f32.mrf.mxu0  ;;  %v7312_v40 = vld [vmem:[#allocation7] sm:$0xff]  }
 0x612   : > { %v2971_v38 = vpop.xlane.xlu0 %2970  ;;  %v7664_v28 = vpop.eup %7663  ;;  %v3165_v41 = vmul.f32 %v7662_v61, %v10797_v35 }
 0x613   : > { %7679 = vrcp.f32 %v2971_v38  ;;  %v3192_v58 = vpack.c.bf16 %v3151_v48, %v3150_v23  ;;  %v7666_v49 = vpop.eup %7665  ;;  %v3164_v30 = vmul.f32 %v7664_v28, %v10798_v62  ;;  %v7311_v38 = vld [vmem:[#allocation7 + $0x8] sm:$0xff]  }
 0x614   : > { %v7668_v3 = vpop.eup %7667  ;;  %v3159_v9 = vmul.f32 %v7666_v49, %v10800_v54 }
 0x615   : > { %6922 = vmatprep.mubr.msk.bf16.mxu1 %vm1425_vm0, %v3192_v58  ;;  %v7670_v33 = vpop.eup %7669  ;;  %v3199_v55 = vpack.c.bf16 %v3165_v41, %v3164_v30  ;;  %v3160_v50 = vmul.f32 %v7668_v3, %v10801_v4 }
 0x616   : > { %v1390_v45 = vpop.permute.xlu0 %1389  ;;  %6923 = vmatmul.mubr.msk.bf16.vlgmr.msra.gmra.mxu1 %vm1425_vm0, %v3193_v16  ;;  %v3161_v5 = vmul.f32 %v7670_v33, %v10802_v37 }
 0x617   : > { %6944 = vmatprep.subr.bf16.mxu0 %v1390_v45  ;;  %6935 = vmatpush3.bf16.msra.mxu1 %v10796_v22 }
 0x618   : > { %v7672_v29 = vpop.eup %7671  ;;  %6945 = vmatpush3.bf16.msra.mxu0 %v1390_v45  ;;  %6936 = vmatprep.subr.bf16.mxu1 %v10799_v6  ;;  %v3197_v7 = vpack.c.bf16 %v3161_v5, %v3160_v50 }
 0x619   : > { %v3158_v43 = vmul.f32 %v7672_v29, %v9617_v51  ;;  %v7674_v36 = vpop.eup %7673  ;;  %6958 = vmatprep.subr.bf16.mxu0 %v7305_v21 }
 0x61a   : > { %v3166_v15 = vmul.f32 %v7674_v36, %v10804_v52 }
 0x61b   : > { %6947 = vmatmul.mubr.msk.bf16.vlgmr.msra.gmra.mxu0 %vm1425_vm0, %v3199_v55  ;;  %v3196_v56 = vpack.c.bf16 %v3159_v9, %v3158_v43  ;;  %6937 = vmatpush3.bf16.msra.mxu1 %v10799_v6 }
 0x61c   : > { %6950 = vmatprep.subr.bf16.mxu1 %v10803_v13  ;;  %v7676_v39 = vpop.eup %7675  ;;  %6959 = vmatpush3.bf16.msra.mxu0 %v7305_v21 }
 0x61d   : > { %6938 = vmatprep.mubr.msk.bf16.mxu1 %vm1425_vm0, %v3196_v56  ;;  %v7678_v10 = vpop.eup %7677  ;;  %v3169_v12 = vmul.f32 %v7676_v39, %v9628_v44 }
 0x61e   : > { %6939 = vmatmul.mubr.msk.bf16.vlgmr.msra.gmra.mxu1 %vm1425_vm0, %v3197_v7  ;;  %v3168_v57 = vmul.f32 %v7678_v10, %v10805_v2 }
 0x61f   : > { %6951 = vmatpush3.bf16.msra.mxu1 %v10803_v13 }
 0x620   : > { %v7680_v51 = vpop.eup %7679  ;;  %6952 = vmatprep.subr.bf16.mxu1 %v1414_v26  ;;  %v3201_v59 = vpack.c.bf16 %v3169_v12, %v3168_v57 }
 0x621   : > { %v3167_v11 = vmul.f32 %v7680_v51, %v9636_v63  ;;  %v7306_v63 = vld [vmem:[#allocation7 + $0x30] sm:$0xff]  }
 0x622   : > { %6960 = vmatprep.subr.bf16.mxu0 %v7306_v63 }
 0x623   : > { %v3200_v17 = vpack.c.bf16 %v3167_v11, %v3166_v15  ;;  %6953 = vmatpush3.bf16.msra.mxu1 %v1414_v26  ;;  %6961 = vmatpush3.bf16.msra.mxu0 %v7306_v63 }
 0x624   : > { %6962 = vmatprep.subr.bf16.mxu0 %v7307_v31 }
 0x625   : > { %6954 = vmatprep.mubr.msk.bf16.mxu1 %vm1425_vm0, %v3200_v17 }
 0x626   : > { %6955 = vmatmul.mubr.msk.bf16.vlgmr.msra.gmra.mxu1 %vm1425_vm0, %v3201_v59 }
 0x627   : > { %4992 = vmatprep.mubr.bf16.mxu1 %v10806_v24  ;;  %6963 = vmatpush3.bf16.msra.mxu0 %v7307_v31 }
 0x628   : > { %6964 = vmatprep.subr.bf16.mxu0 %v7308_v32 }
 0x62b   : > { %6965 = vmatpush3.bf16.msra.mxu0 %v7308_v32 }
 0x62c   : > { %6966 = vmatprep.subr.bf16.mxu0 %v7309_v34 }
 0x62f   : > { %6967 = vmatpush3.bf16.msra.mxu0 %v7309_v34 }
 0x630   : > { %6968 = vmatprep.subr.bf16.mxu0 %v7310_v42 }
 0x633   : > { %6969 = vmatpush3.bf16.msra.mxu0 %v7310_v42 }
 0x634   : > { %6970 = vmatprep.subr.bf16.mxu0 %v7311_v38 }
 0x637   : > { %6971 = vmatpush3.bf16.msra.mxu0 %v7311_v38 }
 0x638   : > { %6972 = vmatprep.subr.bf16.mxu0 %v7312_v40 }
 0x63b   : > { %6973 = vmatpush3.bf16.msra.mxu0 %v7312_v40 }
 0x645   : > { %v6844_v8 = vpop.f32.mrf.mxu1 }
 0x647   : > { %v3297_v60 = vpop.f32.mrf.mxu1 }
 0x649   : > { %v6845_v25 = vpop.f32.mrf.mxu1 }
 0x64a   : > { %v7153_v0 = vpack.i.bf16 %v6845_v25, %v6844_v8 }
 0x64b   : > { %v3300_v44 = vpop.f32.mrf.mxu1 }
 0x64c   : > { %v7158_v47 = vpack.i.bf16 %v3300_v44, %v3297_v60  ;;  %7154 = vrot.lane.b32.xlu1 %v7153_v0, %s8168_s16 }
 0x64e   : > { %7159 = vrot.lane.b32.xlu0 %v7158_v47, %s8168_s16 }
 0x659   : > { %v6852_v53 = vpop.f32.mrf.mxu0 }
 0x65b   : > { %v3352_v1 = vpop.f32.mrf.mxu0 }
 0x65d   : > { %v6853_v22 = vpop.f32.mrf.mxu0 }
 0x65e   : > { %v7163_v19 = vpack.i.bf16 %v6853_v22, %v6852_v53 }
 0x65f   : > { %v3355_v20 = vpop.f32.mrf.mxu0 }
 0x660   : > { %v7168_v61 = vpack.i.bf16 %v3355_v20, %v3352_v1  ;;  %7164 = vrot.lane.b32.xlu1 %v7163_v19, %s8167_s30 }
 0x661   : > { %v9793_v23 = vpop.f32.mrf.mxu0 }
 0x662   : > { %7169 = vrot.lane.b32.xlu0 %v7168_v61, %s8167_s30 }
 0x663   : > { %v9796_v48 = vpop.f32.mrf.mxu0 }
 0x665   : > { %v6860_v28 = vpop.f32.mrf.mxu1  ;;  %v9798_v58 = vpop.f32.mrf.mxu0 }
 0x667   : > { %v3407_v49 = vpop.f32.mrf.mxu1  ;;  %v9800_v16 = vpop.f32.mrf.mxu0 }
 0x669   : > { %v6861_v35 = vpop.f32.mrf.mxu1  ;;  %v6884_v41 = vpop.f32.mrf.mxu0 }
 0x66a   : > { %v7178_v3 = vpack.i.bf16 %v6861_v35, %v6860_v28 }
 0x66b   : > { %v3410_v45 = vpop.f32.mrf.mxu1  ;;  %v3572_v33 = vpop.f32.mrf.mxu0 }
 0x66c   : > { %v7173_v62 = vpack.i.bf16 %v3410_v45, %v3407_v49  ;;  %7179 = vrot.lane.b32.xlu1 %v7178_v3, %s8166_s22 }
 0x66d   : > { %v6885_v30 = vpop.f32.mrf.mxu0 }
 0x66e   : > { %v7183_v29 = vpack.i.bf16 %v6885_v30, %v6884_v41  ;;  %7174 = vrot.lane.b32.xlu0 %v7173_v62, %s8166_s22 }
 0x66f   : > { %v3575_v6 = vpop.f32.mrf.mxu0 }
 0x670   : > { %v7188_v55 = vpack.i.bf16 %v3575_v6, %v3572_v33  ;;  %7184 = vrot.lane.b32.xlu1 %v7183_v29, %s8167_s30 }
 0x671   : > { %v9808_v37 = vpop.f32.mrf.mxu0 }
 0x672   : > { %7189 = vrot.lane.b32.xlu0 %v7188_v55, %s8167_s30 }
 0x673   : > { %v9810_v5 = vpop.f32.mrf.mxu0 }
 0x675   : > { %v9812_v36 = vpop.f32.mrf.mxu0 }
 0x677   : > { %v9814_v13 = vpop.f32.mrf.mxu0 }
 0x69b   : > { %v6916_v7 = vpop.f32.mrf.mxu0 }
 0x69d   : > { %v3792_v39 = vpop.f32.mrf.mxu0 }
 0x69e   : > { %v6876_v43 = vpop.f32.mrf.mxu1 }
 0x69f   : > { %v6917_v26 = vpop.f32.mrf.mxu0 }
 0x6a0   : > { %v3517_v54 = vpop.f32.mrf.mxu1  ;;  %v7218_v2 = vpack.i.bf16 %v6917_v26, %v6916_v7 }
 0x6a1   : > { %v3795_v17 = vpop.f32.mrf.mxu0 }
 0x6a2   : > { %v6877_v9 = vpop.f32.mrf.mxu1  ;;  %v7213_v57 = vpack.i.bf16 %v3795_v17, %v3792_v39 }
 0x6a3   : > { %v7193_v4 = vpack.i.bf16 %v6877_v9, %v6876_v43 }
 0x6a4   : > { %v3520_v50 = vpop.f32.mrf.mxu1 }
 0x6a5   : > { %v7198_v56 = vpack.i.bf16 %v3520_v50, %v3517_v54  ;;  %7194 = vrot.lane.b32.xlu1 %v7193_v4, %s8168_s16 }
 0x6a7   : > { %7199 = vrot.lane.b32.xlu0 %v7198_v56, %s8168_s16 }
 0x6b5   : > { %v9820_v8 = vpop.f32.mrf.mxu0 }
 0x6b7   : > { %v9822_v0 = vpop.f32.mrf.mxu0 }
 0x6b9   : > { %v9826_v47 = vpop.f32.mrf.mxu0 }
 0x6ba   : > { %v6892_v10 = vpop.f32.mrf.mxu1 }
 0x6bb   : > { %v9828_v53 = vpop.f32.mrf.mxu0 }
 0x6bc   : > { %v3627_v51 = vpop.f32.mrf.mxu1 }
 0x6be   : > { %v6893_v52 = vpop.f32.mrf.mxu1  ;;  %v7155_v31 = vpop.permute.xlu1 %7154 }
 0x6bf   : > { %v7208_v15 = vpack.i.bf16 %v6893_v52, %v6892_v10  ;;  %v7157_v19 = vunpack.i.h.bf16 %v7155_v31  ;;  %v7156_v20 = vunpack.i.l.bf16 %v7155_v31 }
 0x6c0   : > { %v3630_v11 = vpop.f32.mrf.mxu1  ;;  %v7160_v32 = vpop.permute.xlu0 %7159 }
 0x6c1   : > { %v7203_v12 = vpack.i.bf16 %v3630_v11, %v3627_v51  ;;  %7209 = vrot.lane.b32.xlu1 %v7208_v15, %s8166_s22  ;;  %v7162_v40 = vunpack.i.h.bf16 %v7160_v32  ;;  %v7161_v28 = vunpack.i.l.bf16 %v7160_v32  ;;  %v4277_v6 = vsel %vm1425_vm0, %v9788_v46, %v7157_v19 }
 0x6c2   : > { %v4276_v55 = vsel %vm1425_vm0, %v9782_v14, %v7156_v20 }
 0x6c3   : > { %7204 = vrot.lane.b32.xlu0 %v7203_v12, %s8166_s22  ;;  %v4275_v50 = vsel %vm1425_vm0, %v9790_v18, %v7162_v40  ;;  %v4274_v56 = vsel %vm1425_vm0, %v9786_v27, %v7161_v28 }
 0x6c5   : > { %7219 = vrot.lane.b32.xlu1 %v7218_v2, %s8167_s30 }
 0x6c7   : > { %7214 = vrot.lane.b32.xlu0 %v7213_v57, %s8167_s30 }
 0x6ca   : > { %v6908_v59 = vpop.f32.mrf.mxu1 }
 0x6cc   : > { %v3737_v60 = vpop.f32.mrf.mxu1 }
 0x6ce   : > { %v6909_v21 = vpop.f32.mrf.mxu1 }
 0x6cf   : > { %v7223_v25 = vpack.i.bf16 %v6909_v21, %v6908_v59 }
 0x6d0   : > { %v3740_v63 = vpop.f32.mrf.mxu1 }
 0x6d1   : > { %v7228_v44 = vpack.i.bf16 %v3740_v63, %v3737_v60  ;;  %7224 = vrot.lane.b32.xlu1 %v7223_v25, %s8168_s16 }
 0x6d2   : > { %v7165_v1 = vpop.permute.xlu1 %7164 }
 0x6d3   : > { %7229 = vrot.lane.b32.xlu0 %v7228_v44, %s8168_s16  ;;  %v7167_v49 = vunpack.i.h.bf16 %v7165_v1  ;;  %v7166_v41 = vunpack.i.l.bf16 %v7165_v1 }
 0x6d4   : > { %v7170_v22 = vpop.permute.xlu0 %7169 }
 0x6d5   : > { %v7171_v3 = vunpack.i.l.bf16 %v7170_v22  ;;  %v7172_v62 = vunpack.i.h.bf16 %v7170_v22  ;;  %v4294_v7 = vsel %vm4290_vm1, %v4277_v6, %v7167_v49  ;;  %v4293_v46 = vsel %vm4290_vm1, %v4276_v55, %v7166_v41 }
 0x6d6   : > { %v6924_v34 = vpop.f32.mrf.mxu1 }
 0x6d7   : > { %v4291_v14 = vsel %vm4290_vm1, %v4274_v56, %v7171_v3  ;;  %v4292_v11 = vsel %vm4290_vm1, %v4275_v50, %v7172_v62 }
 0x6d8   : > { %v3847_v42 = vpop.f32.mrf.mxu1 }
 0x6da   : > { %v6925_v61 = vpop.f32.mrf.mxu1 }
 0x6db   : > { %v6948_v38 = vpop.f32.mrf.mxu0  ;;  %v7238_v35 = vpack.i.bf16 %v6925_v61, %v6924_v34 }
 0x6dc   : > { %v3850_v45 = vpop.f32.mrf.mxu1 }
 0x6dd   : > { %v4012_v33 = vpop.f32.mrf.mxu0  ;;  %v7233_v30 = vpack.i.bf16 %v3850_v45, %v3847_v42  ;;  %7239 = vrot.lane.b32.xlu1 %v7238_v35, %s8166_s22 }
 0x6de   : > { %v7180_v29 = vpop.permute.xlu1 %7179  ;;  %v6940_v9 = vpop.f32.mrf.mxu1 }
 0x6df   : > { %v7182_v43 = vunpack.i.h.bf16 %v7180_v29  ;;  %v7181_v54 = vunpack.i.l.bf16 %v7180_v29  ;;  %v6949_v4 = vpop.f32.mrf.mxu0  ;;  %7234 = vrot.lane.b32.xlu0 %v7233_v30, %s8166_s22 }
 0x6e0   : > { %v7248_v39 = vpack.i.bf16 %v6949_v4, %v6948_v38  ;;  %v7175_v10 = vpop.permute.xlu0 %7174  ;;  %v3957_v51 = vpop.f32.mrf.mxu1 }
 0x6e1   : > { %v7177_v26 = vunpack.i.h.bf16 %v7175_v10  ;;  %v7176_v52 = vunpack.i.l.bf16 %v7175_v10  ;;  %v4015_v15 = vpop.f32.mrf.mxu0  ;;  %v4311_v18 = vsel %vm4307_vm2, %v4294_v7, %v7182_v43  ;;  %v4310_v27 = vsel %vm4307_vm2, %v4293_v46, %v7181_v54 }
 0x6e2   : > { %v7243_v12 = vpack.i.bf16 %v4015_v15, %v4012_v33  ;;  %7249 = vrot.lane.b32.xlu1 %v7248_v39, %s8167_s30  ;;  %v6941_v17 = vpop.f32.mrf.mxu1  ;;  %v4325_v21 = vpack.c.bf16 %v4311_v18, %v4310_v27  ;;  %v7185_v22 = vpop.permute.xlu1 %7184 }
 0x6e3   : > { %v4308_v2 = vsel %vm4307_vm2, %v4291_v14, %v7176_v52  ;;  %v4309_v57 = vsel %vm4307_vm2, %v4292_v11, %v7177_v26  ;;  %v7253_v59 = vpack.i.bf16 %v6941_v17, %v6940_v9  ;;  %v7187_v35 = vunpack.i.h.bf16 %v7185_v22 }
 0x6e4   : > { %7244 = vrot.lane.b32.xlu0 %v7243_v12, %s8167_s30  ;;  %v4324_v60 = vpack.c.bf16 %v4309_v57, %v4308_v2  ;;  %v3960_v25 = vpop.f32.mrf.mxu1  ;;  %v7190_v19 = vpop.permute.xlu0 %7189  ;;  %v7186_v41 = vunpack.i.l.bf16 %v7185_v22  ;;  %s6028_s30 = scalar_lea.sflag [#allocation4], %s8417_s9 }
 0x6e5   : > { %v7258_v63 = vpack.i.bf16 %v3960_v25, %v3957_v51  ;;  %v7192_v55 = vunpack.i.h.bf16 %v7190_v19  ;;  %v7191_v43 = vunpack.i.l.bf16 %v7190_v19 }
 0x6e6   : > { %7254 = vrot.lane.b32.xlu1 %v7253_v59, %s8168_s16  ;;  %6974 = vmatprep.mubr.bf16.mxu0 %v4324_v60  ;;  %v6956_v44 = vpop.f32.mrf.mxu1 }
 0x6e7   : > { %6975 = vmatmul.mubr.bf16.vlgmr.msra.gmra.mxu0 %v4325_v21 }
 0x6e8   : > { %7259 = vrot.lane.b32.xlu0 %v7258_v63, %s8168_s16  ;;  %v4067_v31 = vpop.f32.mrf.mxu1  ;;  %s8067_s16 = scalar_lea.vmem %s10530_s15, 2048 }
 0x6e9   : > { %p8068_p13 = scmp.ne.s32.totalorder %s10530_s15, %s8067_s16  ;;  %p8075_p3 = scmp.lt.s32.totalorder %s8073_s23, %s8067_s16 }
 0x6ea   : > { %v6957_v32 = vpop.f32.mrf.mxu1 }
 0x6eb   : > { %v7268_v34 = vpack.i.bf16 %v6957_v32, %v6956_v44  ;;  %p8069_p7 = pnand %p8068_p13, %p10827_p0  ;;  %p8076_p12 = por %p8075_p3, %p8074_p1 }
 0x6ec   : > { %v4070_v1 = vpop.f32.mrf.mxu1 }
 0x6ed   : > { %v7263_v42 = vpack.i.bf16 %v4070_v1, %v4067_v31  ;;  %7269 = vrot.lane.b32.xlu1 %v7268_v34, %s8166_s22  ;;  %p8070_p8 = pneg %p8069_p7 }
 0x6ef   : > { %7264 = vrot.lane.b32.xlu0 %v7263_v42, %s8166_s22  ;;  %s10528_s22 = scalar_lea.hbm %s10825_s21, %s6381_s10  ;;  %p8077_p6 = pnand %p8076_p12, %p8070_p8 }
 0x717   : > { %v7195_v20 = vpop.permute.xlu1 %7194 }
 0x718   : > { %v7197_v38 = vunpack.i.h.bf16 %v7195_v20  ;;  %v7196_v40 = vunpack.i.l.bf16 %v7195_v20 }
 0x719   : > { %v7200_v61 = vpop.permute.xlu0 %7199 }
 0x71a   : > { %v7202_v28 = vunpack.i.h.bf16 %v7200_v61  ;;  %v7201_v49 = vunpack.i.l.bf16 %v7200_v61  ;;  %v4281_v3 = vsel %vm1425_vm0, %v9798_v58, %v7197_v38  ;;  %v4280_v45 = vsel %vm1425_vm0, %v9793_v23, %v7196_v40 }
 0x71b   : > { %v4297_v50 = vsel %vm4290_vm1, %v4280_v45, %v7186_v41  ;;  %v4298_v58 = vsel %vm4290_vm1, %v4281_v3, %v7187_v35 }
 0x71c   : > { %v4279_v62 = vsel %vm1425_vm0, %v9800_v16, %v7202_v28  ;;  %v4278_v30 = vsel %vm1425_vm0, %v9796_v48, %v7201_v49 }
 0x71d   : > { %v4295_v23 = vsel %vm4290_vm1, %v4278_v30, %v7191_v43  ;;  %v4296_v56 = vsel %vm4290_vm1, %v4279_v62, %v7192_v55 }
 0x733   : > { %v7210_v33 = vpop.permute.xlu1 %7209 }
 0x734   : > { %v7212_v29 = vunpack.i.h.bf16 %v7210_v33  ;;  %v7211_v6 = vunpack.i.l.bf16 %v7210_v33 }
 0x735   : > { %v7205_v54 = vpop.permute.xlu0 %7204 }
 0x736   : > { %v7207_v9 = vunpack.i.h.bf16 %v7205_v54  ;;  %v7206_v4 = vunpack.i.l.bf16 %v7205_v54  ;;  %v4314_v16 = vsel %vm4307_vm2, %v4297_v50, %v7211_v6  ;;  %v4315_v7 = vsel %vm4307_vm2, %v4298_v58, %v7212_v29 }
 0x737   : > { %v4327_v46 = vpack.c.bf16 %v4315_v7, %v4314_v16  ;;  %v7220_v14 = vpop.permute.xlu1 %7219 }
 0x738   : > { %v4312_v48 = vsel %vm4307_vm2, %v4295_v23, %v7206_v4  ;;  %v4313_v39 = vsel %vm4307_vm2, %v4296_v56, %v7207_v9  ;;  %v7222_v12 = vunpack.i.h.bf16 %v7220_v14  ;;  %v7221_v17 = vunpack.i.l.bf16 %v7220_v14 }
 0x739   : > { %v4326_v10 = vpack.c.bf16 %v4313_v39, %v4312_v48  ;;  %v7215_v51 = vpop.permute.xlu0 %7214 }
 0x73a   : > { %v7217_v44 = vunpack.i.h.bf16 %v7215_v51  ;;  %v7216_v31 = vunpack.i.l.bf16 %v7215_v51 }
 0x73b   : > { %6978 = vmatprep.mubr.bf16.mxu0 %v4326_v10 }
 0x73c   : > { %6979 = vmatmul.mubr.bf16.gmra.mxu0 %v4327_v46 }
 0x743   : > { %v7225_v26 = vpop.permute.xlu1 %7224 }
 0x744   : > { %v7227_v15 = vunpack.i.h.bf16 %v7225_v26  ;;  %v7226_v11 = vunpack.i.l.bf16 %v7225_v26  ;;  %v9903_v26 = vld [vmem:[#allocation8] ss:$0 sm:$0xff] }
 0x745   : > { %v7230_v52 = vpop.permute.xlu0 %7229 }
 0x746   : > { %v7232_v18 = vunpack.i.h.bf16 %v7230_v52  ;;  %v7231_v27 = vunpack.i.l.bf16 %v7230_v52  ;;  %v4285_v2 = vsel %vm1425_vm0, %v9812_v36, %v7227_v15  ;;  %v4284_v57 = vsel %vm1425_vm0, %v9808_v37, %v7226_v11 }
 0x747   : > { %v4301_v42 = vsel %vm4290_vm1, %v4284_v57, %v7221_v17  ;;  %v4302_v36 = vsel %vm4290_vm1, %v4285_v2, %v7222_v12  ;;  %v7842_v57 = vld [vmem:[%s8423_s20 + $0x10] sm:$0xff] }
 0x748   : > { %v4283_v60 = vsel %vm1425_vm0, %v9814_v13, %v7232_v18  ;;  %v4282_v21 = vsel %vm1425_vm0, %v9810_v5, %v7231_v27  ;;  %v7841_v27 = vld [vmem:[%s8423_s20] sm:$0xff] }
 0x749   : > { %v4299_v37 = vsel %vm4290_vm1, %v4282_v21, %v7216_v31  ;;  %v4300_v19 = vsel %vm4290_vm1, %v4283_v60, %v7217_v44  ;;  %v7843_v21 = vld [vmem:[%s8423_s20 + $0x8] sm:$0xff] }
 0x74f   : > { %v7240_v59 = vpop.permute.xlu1 %7239 }
 0x750   : > { %v7242_v25 = vunpack.i.h.bf16 %v7240_v59  ;;  %v7241_v63 = vunpack.i.l.bf16 %v7240_v59 }
 0x751   : > { %v7235_v32 = vpop.permute.xlu0 %7234 }
 0x752   : > { %v7237_v34 = vunpack.i.h.bf16 %v7235_v32  ;;  %v7236_v1 = vunpack.i.l.bf16 %v7235_v32  ;;  %v4318_v13 = vsel %vm4307_vm2, %v4301_v42, %v7241_v63  ;;  %v4319_v5 = vsel %vm4307_vm2, %v4302_v36, %v7242_v25  ;;  %v7844_v63 = vld [vmem:[%s8423_s20 + $0x18] sm:$0xff]  ;;  %v7845_v36 = vld [vmem:[%s8423_s20 + $0x20] sm:$0xff] }
 0x753   : > { %v4329_v28 = vpack.c.bf16 %v4319_v5, %v4318_v13  ;;  %v7846_v13 = vld [vmem:[%s8423_s20 + $0x30] sm:$0xff] }
 0x754   : > { %v7250_v22 = vpop.permute.xlu1 %7249  ;;  %v4316_v20 = vsel %vm4307_vm2, %v4299_v37, %v7236_v1  ;;  %v4317_v61 = vsel %vm4307_vm2, %v4300_v19, %v7237_v34 }
 0x755   : > { %v4328_v40 = vpack.c.bf16 %v4317_v61, %v4316_v20  ;;  %v7252_v62 = vunpack.i.h.bf16 %v7250_v22  ;;  %v7251_v30 = vunpack.i.l.bf16 %v7250_v22  ;;  %v7847_v61 = vld [vmem:[%s8423_s20 + $0x28] sm:$0xff] }
 0x756   : > { %v7245_v38 = vpop.permute.xlu0 %7244 }
 0x757   : > { %6982 = vmatprep.mubr.bf16.mxu0 %v4328_v40  ;;  %v7247_v50 = vunpack.i.h.bf16 %v7245_v38  ;;  %v7246_v58 = vunpack.i.l.bf16 %v7245_v38  ;;  %v7848_v40 = vld [vmem:[%s8423_s20 + $0x38] sm:$0xff] }
 0x758   : > { %v7255_v49 = vpop.permute.xlu1 %7254  ;;  %6983 = vmatmul.mubr.bf16.gmra.mxu0 %v4329_v28 }
 0x759   : > { %v7257_v41 = vunpack.i.h.bf16 %v7255_v49  ;;  %v7256_v3 = vunpack.i.l.bf16 %v7255_v49 }
 0x75a   : > { %v7260_v35 = vpop.permute.xlu0 %7259 }
 0x75b   : > { %v7262_v45 = vunpack.i.h.bf16 %v7260_v35  ;;  %v7261_v33 = vunpack.i.l.bf16 %v7260_v35  ;;  %v4289_v29 = vsel %vm1425_vm0, %v9826_v47, %v7257_v41  ;;  %v4288_v6 = vsel %vm1425_vm0, %v9820_v8, %v7256_v3 }
 0x75c   : > { %v4305_v7 = vsel %vm4290_vm1, %v4288_v6, %v7251_v30  ;;  %v4306_v47 = vsel %vm4290_vm1, %v4289_v29, %v7252_v62  ;;  %v7850_v6 = vld [vmem:[%s8423_s20 + $0x50] sm:$0xff] }
 0x75d   : > { %v4287_v43 = vsel %vm1425_vm0, %v9828_v53, %v7262_v45  ;;  %v4286_v54 = vsel %vm1425_vm0, %v9822_v0, %v7261_v33  ;;  %v7849_v33 = vld [vmem:[%s8423_s20 + $0x40] sm:$0xff] }
 0x75e   : > { %v4303_v8 = vsel %vm4290_vm1, %v4286_v54, %v7246_v58  ;;  %v4304_v48 = vsel %vm4290_vm1, %v4287_v43, %v7247_v50  ;;  %v7851_v54 = vld [vmem:[%s8423_s20 + $0x48] sm:$0xff] }
 0x75f   : > { %v7270_v55 = vpop.permute.xlu1 %7269 }
 0x760   : > { %v7272_v9 = vunpack.i.h.bf16 %v7270_v55  ;;  %v7271_v4 = vunpack.i.l.bf16 %v7270_v55 }
 0x761   : > { %v7265_v23 = vpop.permute.xlu0 %7264 }
 0x762   : > { %v7267_v56 = vunpack.i.h.bf16 %v7265_v23  ;;  %v7266_v16 = vunpack.i.l.bf16 %v7265_v23  ;;  %v4322_v53 = vsel %vm4307_vm2, %v4305_v7, %v7271_v4  ;;  %v4323_v0 = vsel %vm4307_vm2, %v4306_v47, %v7272_v9  ;;  %v7852_v4 = vld [vmem:[%s8423_s20 + $0x58] sm:$0xff]  ;;  %v7853_v47 = vld [vmem:[%s8423_s20 + $0x60] sm:$0xff] }
 0x763   : > { %v4331_v14 = vpack.c.bf16 %v4323_v0, %v4322_v53  ;;  %v7854_v0 = vld [vmem:[%s8423_s20 + $0x70] sm:$0xff] }
 0x764   : > { %v4320_v39 = vsel %vm4307_vm2, %v4303_v8, %v7266_v16  ;;  %v4321_v10 = vsel %vm4307_vm2, %v4304_v48, %v7267_v56 }
 0x765   : > { %v4330_v46 = vpack.c.bf16 %v4321_v10, %v4320_v39 }
 0x767   : > { %6986 = vmatprep.mubr.bf16.mxu0 %v4330_v46  ;;  %v7855_v46 = vld [vmem:[%s8423_s20 + $0x68] sm:$0xff] }
 0x768   : > { %6987 = vmatmul.mubr.bf16.gmra.mxu0 %v4331_v14 }
 0x769   : > { %5105 = vmatprep.mubr.bf16.mxu0 %v10806_v24 }
 0x7a7   : > { %v6976_v51 = vpop.f32.mrf.mxu0 }
 0x7a8   : > { %v4446_v18 = vadd.f32 %v6976_v51, %v9903_v26  ;;  %v7856_v51 = vld [vmem:[%s8423_s20 + $0x78] sm:$0xff] }
 0x7a9   : > { %v4437_v52 = vpop.f32.mrf.mxu0 }
 0x7aa   : > { %v4438_v15 = vadd.f32 %v9903_v26, %v4437_v52  ;;  %v9913_v59 = vadd.f32 %v7842_v57, %v4446_v18 }
 0x7ab   : > { %v6977_v11 = vpop.f32.mrf.mxu0 }
 0x7ac   : > { %v9908_v12 = vadd.f32 %v7841_v27, %v4438_v15  ;;  %v4449_v60 = vadd.f32 %v6977_v11, %v9903_v26 }
 0x7ad   : > { %v4440_v17 = vpop.f32.mrf.mxu0 }
 0x7ae   : > { %v4441_v2 = vadd.f32 %v9903_v26, %v4440_v17  ;;  %4518 = vadd.xlane.f32.xlu0 %v9908_v12  ;;  %v9922_v44 = vadd.f32 %v7844_v63, %v4449_v60 }
 0x7b0   : > { %v9917_v25 = vadd.f32 %v7843_v21, %v4441_v2 }
 0x7b2   : > { %4520 = vadd.xlane.f32.xlu1 %v9917_v25  ;;  %4522 = vadd.xlane.f32.xlu0 %v9913_v59 }
 0x7b6   : > { %4524 = vadd.xlane.f32.xlu0 %v9922_v44 }
 0x7fc   : > { %v6980_v31 = vpop.f32.mrf.mxu0 }
 0x7fd   : > { %v4462_v42 = vadd.f32 %v6980_v31, %v9903_v26 }
 0x7fe   : > { %v4453_v32 = vpop.f32.mrf.mxu0 }
 0x7ff   : > { %v4454_v34 = vadd.f32 %v9903_v26, %v4453_v32  ;;  %v9933_v5 = vadd.f32 %v7846_v13, %v4462_v42  ;;  %v7318_v13 = vld [vmem:[#allocation10 + $0xec] ss:$16 sps:$4 sm:$0xff]  }
 0x800   : > { %v6981_v1 = vpop.f32.mrf.mxu0  ;;  %5073 = vmatprep.subr.bf16.mxu0 %v7318_v13 }
 0x801   : > { %v9928_v22 = vadd.f32 %v7845_v36, %v4454_v34  ;;  %v4465_v20 = vadd.f32 %v6981_v1, %v9903_v26  ;;  %v7313_v36 = vld [vmem:[#allocation10 + $0xe0] ss:$16 sps:$4 sm:$0xff]  }
 0x802   : > { %v4456_v37 = vpop.f32.mrf.mxu0 }
 0x803   : > { %v4457_v19 = vadd.f32 %v9903_v26, %v4456_v37  ;;  %4526 = vadd.xlane.f32.xlu0 %v9928_v22  ;;  %v9942_v28 = vadd.f32 %v7848_v40, %v4465_v20  ;;  %v7315_v37 = vld [vmem:[#allocation10 + $0xe4] ss:$16 sps:$4 sm:$0xff]   ;;  %v7319_v40 = vld [vmem:[#allocation10 + $0xc0] ss:$16 sps:$4 sm:$0xff]  }
 0x804   : > { %4960 = vmatprep.subr.bf16.mxu1 %v7315_v37  ;;  %v7321_v20 = vld [vmem:[#allocation10 + $0xc4] ss:$16 sps:$4 sm:$0xff]  }
 0x805   : > { %v9937_v38 = vadd.f32 %v7847_v61, %v4457_v19  ;;  %v7316_v19 = vld [vmem:[#allocation10 + $0xe8] ss:$16 sps:$4 sm:$0xff]   ;;  %4961 = vmatpush1.bf16.msra.mxu1 %v7313_v36  ;;  %v7324_v61 = vld [vmem:[#allocation10 + $0xcc] ss:$16 sps:$4 sm:$0xff]  }
 0x806   : > { %5074 = vmatpush1.bf16.msra.mxu0 %v7316_v19  ;;  %4962 = vmatprep.subr.bf16.mxu1 %v7321_v20 }
 0x807   : > { %4528 = vadd.xlane.f32.xlu1 %v9937_v38  ;;  %4530 = vadd.xlane.f32.xlu0 %v9933_v5 }
 0x808   : > { %5075 = vmatprep.subr.bf16.mxu0 %v7324_v61 }
 0x809   : > { %4963 = vmatpush1.bf16.msra.mxu1 %v7319_v40 }
 0x80b   : > { %4532 = vadd.xlane.f32.xlu1 %v9942_v28 }
 0x818   : > { %v6984_v49 = vpop.f32.mrf.mxu0 }
 0x819   : > { %v4478_v45 = vadd.f32 %v6984_v49, %v9903_v26  ;;  %v7322_v49 = vld [vmem:[#allocation10 + $0xc8] ss:$16 sps:$4 sm:$0xff]  }
 0x81a   : > { %v4469_v35 = vpop.f32.mrf.mxu0  ;;  %5076 = vmatpush1.bf16.msra.mxu0 %v7322_v49 }
 0x81b   : > { %v4470_v41 = vadd.f32 %v9903_v26, %v4469_v35  ;;  %v9953_v55 = vadd.f32 %v7850_v6, %v4478_v45  ;;  %v7327_v35 = vld [vmem:[#allocation10 + $0xa4] ss:$16 sps:$4 sm:$0xff]   ;;  %v7328_v45 = vld [vmem:[#allocation10 + $0xa8] ss:$16 sps:$4 sm:$0xff]  }
 0x81c   : > { %v6985_v3 = vpop.f32.mrf.mxu0  ;;  %4964 = vmatprep.subr.bf16.mxu1 %v7327_v35  ;;  %v7334_v6 = vld [vmem:[#allocation10 + $0x88] ss:$16 sps:$4 sm:$0xff]  }
 0x81d   : > { %v9948_v62 = vadd.f32 %v7849_v33, %v4470_v41  ;;  %10807 = vst [vmem:[#allocation61_spill] sm:$0xff] %v9953_v55  ;;  %v4481_v43 = vadd.f32 %v6985_v3, %v9903_v26  ;;  %v7330_v41 = vld [vmem:[#allocation10 + $0xac] ss:$16 sps:$4 sm:$0xff]   ;;  %v7325_v3 = vld [vmem:[#allocation10 + $0xa0] ss:$16 sps:$4 sm:$0xff]  }
 0x81e   : > { %v4472_v30 = vpop.f32.mrf.mxu0  ;;  %5077 = vmatprep.subr.bf16.mxu0 %v7330_v41  ;;  %4965 = vmatpush1.bf16.msra.mxu1 %v7325_v3  ;;  %v7333_v33 = vld [vmem:[#allocation10 + $0x84] ss:$16 sps:$4 sm:$0xff]  }
 0x81f   : > { %v4473_v29 = vadd.f32 %v9903_v26, %v4472_v30  ;;  %4534 = vadd.xlane.f32.xlu0 %v9948_v62  ;;  %v9962_v50 = vadd.f32 %v7852_v4, %v4481_v43  ;;  %5078 = vmatpush1.bf16.msra.mxu0 %v7328_v45  ;;  %v7336_v30 = vld [vmem:[#allocation10 + $0x8c] ss:$16 sps:$4 sm:$0xff]   ;;  %v7339_v43 = vld [vmem:[#allocation10 + $0x64] ss:$16 sps:$4 sm:$0xff]   ;;  %v7337_v4 = vld [vmem:[#allocation10 + $0x60] ss:$16 sps:$4 sm:$0xff]  }
 0x820   : > { %4966 = vmatprep.subr.bf16.mxu1 %v7333_v33  ;;  %5079 = vmatprep.subr.bf16.mxu0 %v7336_v30 }
 0x821   : > { %v9957_v9 = vadd.f32 %v7851_v54, %v4473_v29  ;;  %10809 = vst [vmem:[#allocation32_spill] sm:$0xff] %v9962_v50  ;;  %v7331_v29 = vld [vmem:[#allocation10 + $0x80] ss:$16 sps:$4 sm:$0xff]   ;;  %v7342_v54 = vld [vmem:[#allocation10 + $0x6c] ss:$16 sps:$4 sm:$0xff]  }
 0x822   : > { %4967 = vmatpush1.bf16.msra.mxu1 %v7331_v29 }
 0x823   : > { %10808 = vst [vmem:[#allocation29_spill] sm:$0xff] %v9957_v9  ;;  %4536 = vadd.xlane.f32.xlu1 %v9957_v9  ;;  %4538 = vadd.xlane.f32.xlu0 %v9953_v55 }
 0x824   : > { %5080 = vmatpush1.bf16.msra.mxu0 %v7334_v6  ;;  %4968 = vmatprep.subr.bf16.mxu1 %v7339_v43 }
 0x825   : > { %5081 = vmatprep.subr.bf16.mxu0 %v7342_v54 }
 0x826   : > { %4969 = vmatpush1.bf16.msra.mxu1 %v7337_v4 }
 0x827   : > { %4540 = vadd.xlane.f32.xlu1 %v9962_v50 }
 0x828   : > { %v6988_v58 = vpop.f32.mrf.mxu0 }
 0x829   : > { %v4494_v7 = vadd.f32 %v6988_v58, %v9903_v26  ;;  %v7340_v58 = vld [vmem:[#allocation10 + $0x68] ss:$16 sps:$4 sm:$0xff]  }
 0x82a   : > { %v4485_v23 = vpop.f32.mrf.mxu0  ;;  %5082 = vmatpush1.bf16.msra.mxu0 %v7340_v58 }
 0x82b   : > { %v4486_v56 = vadd.f32 %v9903_v26, %v4485_v23  ;;  %v9973_v39 = vadd.f32 %v7854_v0, %v4494_v7  ;;  %v7345_v23 = vld [vmem:[#allocation10 + $0x44] ss:$16 sps:$4 sm:$0xff]   ;;  %v7346_v7 = vld [vmem:[#allocation10 + $0x48] ss:$16 sps:$4 sm:$0xff]  }
 0x82c   : > { %v6989_v16 = vpop.f32.mrf.mxu0  ;;  %4970 = vmatprep.subr.bf16.mxu1 %v7345_v23  ;;  %v7352_v0 = vld [vmem:[#allocation10 + $0x28] ss:$16 sps:$4 sm:$0xff]  }
 0x82d   : > { %v9968_v8 = vadd.f32 %v7853_v47, %v4486_v56  ;;  %10811 = vst [vmem:[#allocation28_spill] sm:$0xff] %v9973_v39  ;;  %v4497_v10 = vadd.f32 %v6989_v16, %v9903_v26  ;;  %v7348_v56 = vld [vmem:[#allocation10 + $0x4c] ss:$16 sps:$4 sm:$0xff]   ;;  %v7343_v16 = vld [vmem:[#allocation10 + $0x40] ss:$16 sps:$4 sm:$0xff]  }
 0x82e   : > { %v4488_v48 = vpop.f32.mrf.mxu0  ;;  %5083 = vmatprep.subr.bf16.mxu0 %v7348_v56  ;;  %v7351_v47 = vld [vmem:[#allocation10 + $0x24] ss:$16 sps:$4 sm:$0xff]   ;;  %4971 = vmatpush1.bf16.msra.mxu1 %v7343_v16 }
 0x82f   : > { %10810 = vst [vmem:[#allocation30_spill] sm:$0xff] %v9968_v8  ;;  %v4489_v53 = vadd.f32 %v9903_v26, %v4488_v48  ;;  %4542 = vadd.xlane.f32.xlu0 %v9968_v8  ;;  %v9982_v52 = vadd.f32 %v7856_v51, %v4497_v10  ;;  %v7354_v48 = vld [vmem:[#allocation10 + $0x2c] ss:$16 sps:$4 sm:$0xff]   ;;  %5084 = vmatpush1.bf16.msra.mxu0 %v7346_v7  ;;  %v7357_v10 = vld [vmem:[#allocation10 + $0x4] ss:$16 sps:$4 sm:$0xff]  }
 0x830   : > { %4972 = vmatprep.subr.bf16.mxu1 %v7351_v47  ;;  %5085 = vmatprep.subr.bf16.mxu0 %v7354_v48  ;;  %v7355_v51 = vld [vmem:[#allocation10] ss:$16 sps:$4 sm:$0xff]  }
 0x831   : > { %v9977_v14 = vadd.f32 %v7855_v46, %v4489_v53  ;;  %10813 = vst [vmem:[#allocation48_spill] sm:$0xff] %v9982_v52  ;;  %v7349_v53 = vld [vmem:[#allocation10 + $0x20] ss:$16 sps:$4 sm:$0xff]   ;;  %v7360_v46 = vld [vmem:[#allocation10 + $0xc] ss:$16 sps:$4 sm:$0xff]  }
 0x832   : > { %4973 = vmatpush1.bf16.msra.mxu1 %v7349_v53 }
 0x833   : > { %10812 = vst [vmem:[#allocation51_spill] sm:$0xff] %v9977_v14  ;;  %4544 = vadd.xlane.f32.xlu1 %v9977_v14  ;;  %4546 = vadd.xlane.f32.xlu0 %v9973_v39 }
 0x834   : > { %5086 = vmatpush1.bf16.msra.mxu0 %v7352_v0  ;;  %4974 = vmatprep.subr.bf16.mxu1 %v7357_v10 }
 0x835   : > { %5087 = vmatprep.subr.bf16.mxu0 %v7360_v46 }
 0x836   : > { %4975 = vmatpush1.bf16.msra.mxu1 %v7355_v51 }
 0x837   : > { %v4519_v15 = vpop.xlane.xlu0 %4518  ;;  %4548 = vadd.xlane.f32.xlu1 %v9982_v52 }
 0x838   : > { %v4550_v11 = vmul.f32 0.0078125, %v4519_v15  ;;  %v7358_v15 = vld [vmem:[#allocation10 + $0x8] ss:$16 sps:$4 sm:$0xff]  }
 0x839   : > { %5088 = vmatpush1.bf16.msra.mxu0 %v7358_v15 }
 0x83a   : > { %v9986_v18 = vsub.f32 %v9908_v12, %v4550_v11 }
 0x83b   : > { %v4521_v27 = vpop.xlane.xlu1 %4520  ;;  %v4523_v17 = vpop.xlane.xlu0 %4522 }
 0x83c   : > { %v4551_v26 = vmul.f32 0.0078125, %v4521_v27  ;;  %v4552_v2 = vmul.f32 0.0078125, %v4523_v17  ;;  %v4582_v57 = vmul.f32 %v9986_v18, %v9986_v18 }
 0x83e   : > { %v9991_v60 = vsub.f32 %v9917_v25, %v4551_v26  ;;  %v9994_v21 = vsub.f32 %v9913_v59, %v4552_v2  ;;  %4598 = vadd.xlane.f32.xlu0 %v4582_v57 }
 0x83f   : > { %v4525_v63 = vpop.xlane.xlu0 %4524 }
 0x840   : > { %v4553_v31 = vmul.f32 0.0078125, %v4525_v63  ;;  %v4583_v32 = vmul.f32 %v9991_v60, %v9991_v60  ;;  %v4584_v34 = vmul.f32 %v9994_v21, %v9994_v21 }
 0x842   : > { %v10001_v1 = vsub.f32 %v9922_v44, %v4553_v31  ;;  %4600 = vadd.xlane.f32.xlu1 %v4583_v32  ;;  %4602 = vadd.xlane.f32.xlu0 %v4584_v34 }
 0x844   : > { %v4585_v42 = vmul.f32 %v10001_v1, %v10001_v1 }
 0x846   : > { %4604 = vadd.xlane.f32.xlu1 %v4585_v42 }
 0x88c   : > { %v4527_v11 = vpop.xlane.xlu0 %4526 }
 0x88d   : > { %v4554_v27 = vmul.f32 0.0078125, %v4527_v11 }
 0x88f   : > { %v10006_v17 = vsub.f32 %v9928_v22, %v4554_v27 }
 0x890   : > { %v4529_v26 = vpop.xlane.xlu1 %4528  ;;  %v4531_v2 = vpop.xlane.xlu0 %4530 }
 0x891   : > { %v4555_v57 = vmul.f32 0.0078125, %v4529_v26  ;;  %v4556_v63 = vmul.f32 0.0078125, %v4531_v2  ;;  %v4586_v31 = vmul.f32 %v10006_v17, %v10006_v17 }
 0x893   : > { %v10011_v32 = vsub.f32 %v9937_v38, %v4555_v57  ;;  %v10014_v34 = vsub.f32 %v9933_v5, %v4556_v63  ;;  %4606 = vadd.xlane.f32.xlu0 %v4586_v31 }
 0x894   : > { %v4533_v42 = vpop.xlane.xlu1 %4532 }
 0x895   : > { %v4557_v36 = vmul.f32 0.0078125, %v4533_v42  ;;  %v4587_v37 = vmul.f32 %v10011_v32, %v10011_v32  ;;  %v4588_v19 = vmul.f32 %v10014_v34, %v10014_v34 }
 0x897   : > { %v10021_v13 = vsub.f32 %v9942_v28, %v4557_v36  ;;  %4608 = vadd.xlane.f32.xlu1 %v4587_v37  ;;  %4610 = vadd.xlane.f32.xlu0 %v4588_v19 }
 0x899   : > { %v4589_v20 = vmul.f32 %v10021_v13, %v10021_v13 }
 0x89b   : > { %4612 = vadd.xlane.f32.xlu1 %v4589_v20 }
 0x8a8   : > { %v4535_v61 = vpop.xlane.xlu0 %4534 }
 0x8a9   : > { %v4558_v40 = vmul.f32 0.0078125, %v4535_v61 }
 0x8ab   : > { %v10026_v49 = vsub.f32 %v9948_v62, %v4558_v40 }
 0x8ac   : > { %v4537_v35 = vpop.xlane.xlu1 %4536  ;;  %v4539_v41 = vpop.xlane.xlu0 %4538 }
 0x8ad   : > { %v4559_v3 = vmul.f32 0.0078125, %v4537_v35  ;;  %v4560_v45 = vmul.f32 0.0078125, %v4539_v41  ;;  %v4590_v33 = vmul.f32 %v10026_v49, %v10026_v49 }
 0x8af   : > { %v10031_v30 = vsub.f32 %v9957_v9, %v4559_v3  ;;  %v10034_v29 = vsub.f32 %v9953_v55, %v4560_v45  ;;  %4614 = vadd.xlane.f32.xlu0 %v4590_v33 }
 0x8b0   : > { %v4541_v6 = vpop.xlane.xlu1 %4540 }
 0x8b1   : > { %v4561_v43 = vmul.f32 0.0078125, %v4541_v6  ;;  %v4591_v54 = vmul.f32 %v10031_v30, %v10031_v30  ;;  %v4592_v4 = vmul.f32 %v10034_v29, %v10034_v29  ;;  %v10069_v6 = vld [vmem:[%s10582_s7] ss:$0 sm:$0xff] }
 0x8b3   : > { %v10041_v58 = vsub.f32 %v9962_v50, %v4561_v43  ;;  %4616 = vadd.xlane.f32.xlu1 %v4591_v54  ;;  %4618 = vadd.xlane.f32.xlu0 %v4592_v4 }
 0x8b5   : > { %v4593_v23 = vmul.f32 %v10041_v58, %v10041_v58 }
 0x8b7   : > { %4620 = vadd.xlane.f32.xlu1 %v4593_v23 }
 0x8b8   : > { %v4543_v56 = vpop.xlane.xlu0 %4542 }
 0x8b9   : > { %v4562_v16 = vmul.f32 0.0078125, %v4543_v56  ;;  %v10076_v56 = vld [vmem:[%s10814_s3] ss:$0 sm:$0xff] }
 0x8bb   : > { %v10046_v7 = vsub.f32 %v9968_v8, %v4562_v16 }
 0x8bc   : > { %v4545_v47 = vpop.xlane.xlu1 %4544  ;;  %v4547_v48 = vpop.xlane.xlu0 %4546 }
 0x8bd   : > { %v4563_v53 = vmul.f32 0.0078125, %v4545_v47  ;;  %v4564_v0 = vmul.f32 0.0078125, %v4547_v48  ;;  %v4594_v10 = vmul.f32 %v10046_v7, %v10046_v7 }
 0x8bf   : > { %v10051_v46 = vsub.f32 %v9977_v14, %v4563_v53  ;;  %v10054_v51 = vsub.f32 %v9973_v39, %v4564_v0  ;;  %4622 = vadd.xlane.f32.xlu0 %v4594_v10 }
 0x8c0   : > { %v4549_v15 = vpop.xlane.xlu1 %4548 }
 0x8c1   : > { %v4565_v11 = vmul.f32 0.0078125, %v4549_v15  ;;  %v4595_v27 = vmul.f32 %v10051_v46, %v10051_v46  ;;  %v4596_v26 = vmul.f32 %v10054_v51, %v10054_v51 }
 0x8c3   : > { %v10061_v2 = vsub.f32 %v9982_v52, %v4565_v11  ;;  %4624 = vadd.xlane.f32.xlu1 %v4595_v27  ;;  %4626 = vadd.xlane.f32.xlu0 %v4596_v26 }
 0x8c5   : > { %v4597_v57 = vmul.f32 %v10061_v2, %v10061_v2 }
 0x8c7   : > { %v4599_v63 = vpop.xlane.xlu0 %4598  ;;  %4628 = vadd.xlane.f32.xlu1 %v4597_v57 }
 0x8c8   : > { %v4630_v31 = vmul.f32 0.0078125, %v4599_v63 }
 0x8ca   : > { %v4646_v42 = vadd.f32 1e-05, %v4630_v31 }
 0x8cb   : > { %v4601_v36 = vpop.xlane.xlu1 %4600  ;;  %v4603_v37 = vpop.xlane.xlu0 %4602 }
 0x8cc   : > { %7681 = vrsqrt.f32 %v4646_v42  ;;  %v4631_v19 = vmul.f32 0.0078125, %v4601_v36  ;;  %v4632_v20 = vmul.f32 0.0078125, %v4603_v37 }
 0x8ce   : > { %v4647_v61 = vadd.f32 1e-05, %v4631_v19  ;;  %v4648_v40 = vadd.f32 1e-05, %v4632_v20 }
 0x8cf   : > { %v4605_v35 = vpop.xlane.xlu1 %4604 }
 0x8d0   : > { %7683 = vrsqrt.f32 %v4647_v61  ;;  %v4633_v41 = vmul.f32 0.0078125, %v4605_v35  ;;  %v7362_v35 = vld [vmem:[#allocation13 + $0xf8] sm:$0xff]  }
 0x8d1   : > { %7685 = vrsqrt.f32 %v4648_v40  ;;  %v7361_v40 = vld [vmem:[#allocation13 + $0x78] sm:$0xff]   ;;  %6606 = vmatprep.subr.bf16.mxu0 %v7362_v35 }
 0x8d2   : > { %v4649_v3 = vadd.f32 1e-05, %v4633_v41  ;;  %6542 = vmatprep.subr.bf16.mxu1 %v7361_v40 }
 0x8d4   : > { %7687 = vrsqrt.f32 %v4649_v3  ;;  %v7363_v3 = vld [vmem:[#allocation13 + $0x38] sm:$0xff]  }
 0x8d9   : > { %v7682_v45 = vpop.eup %7681 }
 0x8da   : > { %v4678_v33 = vmul.f32 %v7682_v45, %v9986_v18  ;;  %v7364_v45 = vld [vmem:[#allocation13 + $0xb8] sm:$0xff]  }
 0x8dc   : > { %v4700_v4 = vmul.f32 %v10069_v6, %v4678_v33  ;;  %v7365_v33 = vld [vmem:[#allocation13 + $0x70] sm:$0xff]  }
 0x8dd   : > { %v7684_v43 = vpop.eup %7683 }
 0x8de   : > { %v4679_v54 = vmul.f32 %v7684_v43, %v9991_v60  ;;  %v7686_v23 = vpop.eup %7685  ;;  %v4722_v18 = vadd.f32 %v10076_v56, %v4700_v4  ;;  %v7366_v43 = vld [vmem:[#allocation13 + $0xf0] sm:$0xff]  }
 0x8df   : > { %v4680_v53 = vmul.f32 %v7686_v23, %v9994_v21  ;;  %v7368_v4 = vld [vmem:[#allocation13 + $0xb0] sm:$0xff]  }
 0x8e0   : > { %v4701_v16 = vmul.f32 %v10069_v6, %v4679_v54  ;;  %v7367_v54 = vld [vmem:[#allocation13 + $0x30] sm:$0xff]  }
 0x8e1   : > { %v7688_v47 = vpop.eup %7687  ;;  %v4702_v15 = vmul.f32 %v10069_v6, %v4680_v53  ;;  %v7372_v53 = vld [vmem:[#allocation13 + $0xa8] sm:$0xff]  }
 0x8e2   : > { %v4723_v48 = vadd.f32 %v10076_v56, %v4701_v16  ;;  %v4681_v0 = vmul.f32 %v7688_v47, %v10001_v1  ;;  %v7369_v16 = vld [vmem:[#allocation13 + $0x68] sm:$0xff]  }
 0x8e3   : > { %v4724_v27 = vadd.f32 %v10076_v56, %v4702_v15  ;;  %v7370_v47 = vld [vmem:[#allocation13 + $0xe8] sm:$0xff]  }
 0x8e4   : > { %v4738_v60 = vpack.c.bf16 %v4723_v48, %v4722_v18  ;;  %v4703_v10 = vmul.f32 %v10069_v6, %v4681_v0  ;;  %v7371_v48 = vld [vmem:[#allocation13 + $0x28] sm:$0xff]  }
 0x8e6   : > { %4993 = vmatmul.mubr.bf16.vlgmr.msra.gmra.mxu1 %v4738_v60  ;;  %5106 = vmatmul.mubr.bf16.vlgmr.msra.gmra.mxu0 %v4738_v60  ;;  %v4725_v11 = vadd.f32 %v10076_v56, %v4703_v10  ;;  %v7373_v60 = vld [vmem:[#allocation13 + $0x60] sm:$0xff]  }
 0x8e7   : > { %5002 = vmatprep.mubr.bf16.mxu1 %v10806_v24  ;;  %5115 = vmatprep.mubr.bf16.mxu0 %v10806_v24  ;;  %v7374_v10 = vld [vmem:[#allocation13 + $0xe0] sm:$0xff]  }
 0x8e8   : > { %v4739_v26 = vpack.c.bf16 %v4725_v11, %v4724_v27  ;;  %6543 = vmatpush3.bf16.msra.mxu1 %v7363_v3  ;;  %6607 = vmatpush3.bf16.msra.mxu0 %v7364_v45  ;;  %v7375_v27 = vld [vmem:[#allocation13 + $0x20] sm:$0xff]   ;;  %v7382_v3 = vld [vmem:[#allocation13 + $0xd0] sm:$0xff]  }
 0x8e9   : > { %6544 = vmatprep.subr.bf16.mxu1 %v7365_v33  ;;  %6608 = vmatprep.subr.bf16.mxu0 %v7366_v43  ;;  %v7383_v33 = vld [vmem:[#allocation13 + $0x10] sm:$0xff]  }
 0x8ec   : > { %6545 = vmatpush3.bf16.msra.mxu1 %v7367_v54  ;;  %6609 = vmatpush3.bf16.msra.mxu0 %v7368_v4 }
 0x8ed   : > { %6546 = vmatprep.subr.bf16.mxu1 %v7369_v16  ;;  %6610 = vmatprep.subr.bf16.mxu0 %v7370_v47  ;;  %v7385_v47 = vld [vmem:[#allocation13 + $0x48] sm:$0xff]  }
 0x8ee   : > { %5003 = vmatmul.mubr.bf16.gmra.mxu1 %v4739_v26  ;;  %5116 = vmatmul.mubr.bf16.gmra.mxu0 %v4739_v26  ;;  %v7376_v26 = vld [vmem:[#allocation13 + $0xa0] sm:$0xff]  }
 0x8ef   : > { %5012 = vmatprep.mubr.bf16.mxu1 %v10806_v24  ;;  %5125 = vmatprep.mubr.bf16.mxu0 %v10806_v24 }
 0x8f0   : > { %6547 = vmatpush3.bf16.msra.mxu1 %v7371_v48  ;;  %6611 = vmatpush3.bf16.msra.mxu0 %v7372_v53 }
 0x8f1   : > { %6548 = vmatprep.subr.bf16.mxu1 %v7373_v60  ;;  %6612 = vmatprep.subr.bf16.mxu0 %v7374_v10  ;;  %v7387_v60 = vld [vmem:[#allocation13 + $0x8] sm:$0xff]  }
 0x8f2   : > { %v7388_v10 = vld [vmem:[#allocation13 + $0x88] sm:$0xff]  }
 0x8f4   : > { %6549 = vmatpush3.bf16.msra.mxu1 %v7375_v27  ;;  %6613 = vmatpush3.bf16.msra.mxu0 %v7376_v26  ;;  %v7389_v26 = vld [vmem:[#allocation13 + $0x40] sm:$0xff]  }
 0x91c   : > { %v4607_v21 = vpop.xlane.xlu0 %4606 }
 0x91d   : > { %v4634_v1 = vmul.f32 0.0078125, %v4607_v21 }
 0x91f   : > { %v4650_v57 = vadd.f32 1e-05, %v4634_v1 }
 0x920   : > { %v4609_v63 = vpop.xlane.xlu1 %4608  ;;  %v4611_v31 = vpop.xlane.xlu0 %4610 }
 0x921   : > { %7689 = vrsqrt.f32 %v4650_v57  ;;  %v4635_v42 = vmul.f32 0.0078125, %v4609_v63  ;;  %v4636_v36 = vmul.f32 0.0078125, %v4611_v31  ;;  %v7377_v57 = vld [vmem:[#allocation13 + $0x58] sm:$0xff]  }
 0x922   : > { %v7378_v63 = vld [vmem:[#allocation13 + $0xd8] sm:$0xff]   ;;  %6550 = vmatprep.subr.bf16.mxu1 %v7377_v57  ;;  %v7392_v57 = vld [vmem:[#allocation13 + $0x80] sm:$0xff]  }
 0x923   : > { %v4651_v37 = vadd.f32 1e-05, %v4635_v42  ;;  %v4652_v19 = vadd.f32 1e-05, %v4636_v36  ;;  %6614 = vmatprep.subr.bf16.mxu0 %v7378_v63 }
 0x924   : > { %v4613_v20 = vpop.xlane.xlu1 %4612 }
 0x925   : > { %7691 = vrsqrt.f32 %v4651_v37  ;;  %v4637_v61 = vmul.f32 0.0078125, %v4613_v20  ;;  %v7379_v37 = vld [vmem:[#allocation13 + $0x18] sm:$0xff]  }
 0x926   : > { %7693 = vrsqrt.f32 %v4652_v19  ;;  %v7380_v19 = vld [vmem:[#allocation13 + $0x98] sm:$0xff]   ;;  %6551 = vmatpush3.bf16.msra.mxu1 %v7379_v37 }
 0x927   : > { %v4653_v41 = vadd.f32 1e-05, %v4637_v61  ;;  %6615 = vmatpush3.bf16.msra.mxu0 %v7380_v19 }
 0x928   : > { %6616 = vmatprep.subr.bf16.mxu0 %v7382_v3 }
 0x929   : > { %7695 = vrsqrt.f32 %v4653_v41  ;;  %v7381_v41 = vld [vmem:[#allocation13 + $0x50] sm:$0xff]  }
 0x92a   : > { %6552 = vmatprep.subr.bf16.mxu1 %v7381_v41 }
 0x92b   : > { %6553 = vmatpush3.bf16.msra.mxu1 %v7383_v33 }
 0x92c   : > { %6554 = vmatprep.subr.bf16.mxu1 %v7385_v47 }
 0x92e   : > { %v7690_v23 = vpop.eup %7689 }
 0x92f   : > { %v4682_v18 = vmul.f32 %v7690_v23, %v10006_v17  ;;  %6555 = vmatpush3.bf16.msra.mxu1 %v7387_v60 }
 0x930   : > { %6556 = vmatprep.subr.bf16.mxu1 %v7389_v26 }
 0x931   : > { %v4704_v11 = vmul.f32 %v10069_v6, %v4682_v18  ;;  %v7386_v18 = vld [vmem:[#allocation13 + $0xc8] sm:$0xff]  }
 0x932   : > { %v7692_v0 = vpop.eup %7691 }
 0x933   : > { %v4683_v15 = vmul.f32 %v7692_v0, %v10011_v32  ;;  %v7694_v21 = vpop.eup %7693  ;;  %v4726_v31 = vadd.f32 %v10076_v56, %v4704_v11 }
 0x934   : > { %v4684_v32 = vmul.f32 %v7694_v21, %v10014_v34  ;;  %v7390_v21 = vld [vmem:[#allocation13 + $0xc0] sm:$0xff]  }
 0x935   : > { %v4705_v17 = vmul.f32 %v10069_v6, %v4683_v15 }
 0x936   : > { %v7696_v1 = vpop.eup %7695  ;;  %v4706_v34 = vmul.f32 %v10069_v6, %v4684_v32 }
 0x937   : > { %v4727_v42 = vadd.f32 %v10076_v56, %v4705_v17  ;;  %v4685_v36 = vmul.f32 %v7696_v1, %v10021_v13  ;;  %v7384_v13 = vld [vmem:[#allocation13 + $0x90] sm:$0xff]   ;;  %v7391_v1 = vld [vmem:[#allocation13] sm:$0xff]  }
 0x938   : > { %v4615_v20 = vpop.xlane.xlu0 %4614  ;;  %6617 = vmatpush3.bf16.msra.mxu0 %v7384_v13  ;;  %v4728_v0 = vadd.f32 %v10076_v56, %v4706_v34  ;;  %6557 = vmatpush3.bf16.msra.mxu1 %v7391_v1 }
 0x939   : > { %v4638_v61 = vmul.f32 0.0078125, %v4615_v20  ;;  %v4740_v40 = vpack.c.bf16 %v4727_v42, %v4726_v31  ;;  %v4707_v35 = vmul.f32 %v10069_v6, %v4685_v36  ;;  %6618 = vmatprep.subr.bf16.mxu0 %v7386_v18 }
 0x93b   : > { %v4654_v45 = vadd.f32 1e-05, %v4638_v61  ;;  %5013 = vmatmul.mubr.bf16.gmra.mxu1 %v4740_v40  ;;  %5126 = vmatmul.mubr.bf16.gmra.mxu0 %v4740_v40  ;;  %v4729_v16 = vadd.f32 %v10076_v56, %v4707_v35 }
 0x93c   : > { %v4617_v43 = vpop.xlane.xlu1 %4616  ;;  %v4619_v54 = vpop.xlane.xlu0 %4618  ;;  %5022 = vmatprep.mubr.bf16.mxu1 %v10806_v24  ;;  %5135 = vmatprep.mubr.bf16.mxu0 %v10806_v24 }
 0x93d   : > { %7697 = vrsqrt.f32 %v4654_v45  ;;  %v4639_v4 = vmul.f32 0.0078125, %v4617_v43  ;;  %v4640_v23 = vmul.f32 0.0078125, %v4619_v54  ;;  %v4741_v27 = vpack.c.bf16 %v4729_v16, %v4728_v0  ;;  %6619 = vmatpush3.bf16.msra.mxu0 %v7388_v10 }
 0x93e   : > { %6620 = vmatprep.subr.bf16.mxu0 %v7390_v21 }
 0x93f   : > { %v4655_v48 = vadd.f32 1e-05, %v4639_v4  ;;  %v4656_v53 = vadd.f32 1e-05, %v4640_v23 }
 0x940   : > { %v4621_v15 = vpop.xlane.xlu1 %4620 }
 0x941   : > { %7699 = vrsqrt.f32 %v4655_v48  ;;  %v4641_v11 = vmul.f32 0.0078125, %v4621_v15  ;;  %6621 = vmatpush3.bf16.msra.mxu0 %v7392_v57 }
 0x942   : > { %7701 = vrsqrt.f32 %v4656_v53 }
 0x943   : > { %v4657_v17 = vadd.f32 1e-05, %v4641_v11  ;;  %5023 = vmatmul.mubr.bf16.gmra.mxu1 %v4741_v27  ;;  %5136 = vmatmul.mubr.bf16.gmra.mxu0 %v4741_v27 }
 0x944   : > { %5032 = vmatprep.mubr.bf16.mxu1 %v10806_v24  ;;  %5145 = vmatprep.mubr.bf16.mxu0 %v10806_v24 }
 0x945   : > { %7703 = vrsqrt.f32 %v4657_v17 }
 0x948   : > { %v4623_v63 = vpop.xlane.xlu0 %4622 }
 0x949   : > { %v4642_v31 = vmul.f32 0.0078125, %v4623_v63 }
 0x94a   : > { %v7698_v42 = vpop.eup %7697 }
 0x94b   : > { %v4658_v32 = vadd.f32 1e-05, %v4642_v31  ;;  %v4686_v36 = vmul.f32 %v7698_v42, %v10026_v49 }
 0x94c   : > { %v4625_v37 = vpop.xlane.xlu1 %4624  ;;  %v4627_v19 = vpop.xlane.xlu0 %4626 }
 0x94d   : > { %7705 = vrsqrt.f32 %v4658_v32  ;;  %v4643_v20 = vmul.f32 0.0078125, %v4625_v37  ;;  %v4644_v61 = vmul.f32 0.0078125, %v4627_v19  ;;  %v4708_v35 = vmul.f32 %v10069_v6, %v4686_v36 }
 0x94e   : > { %v7700_v40 = vpop.eup %7699 }
 0x94f   : > { %v7702_v41 = vpop.eup %7701  ;;  %v4659_v3 = vadd.f32 1e-05, %v4643_v20  ;;  %v4660_v45 = vadd.f32 1e-05, %v4644_v61  ;;  %v4687_v34 = vmul.f32 %v7700_v40, %v10031_v30  ;;  %v4730_v49 = vadd.f32 %v10076_v56, %v4708_v35 }
 0x950   : > { %v4629_v33 = vpop.xlane.xlu1 %4628  ;;  %v4688_v4 = vmul.f32 %v7702_v41, %v10034_v29 }
 0x951   : > { %7707 = vrsqrt.f32 %v4659_v3  ;;  %v4645_v13 = vmul.f32 0.0078125, %v4629_v33  ;;  %v4709_v43 = vmul.f32 %v10069_v6, %v4687_v34 }
 0x952   : > { %v7704_v54 = vpop.eup %7703  ;;  %7709 = vrsqrt.f32 %v4660_v45  ;;  %v4710_v48 = vmul.f32 %v10069_v6, %v4688_v4 }
 0x953   : > { %v4661_v23 = vadd.f32 1e-05, %v4645_v13  ;;  %v4731_v16 = vadd.f32 %v10076_v56, %v4709_v43  ;;  %v4689_v47 = vmul.f32 %v7704_v54, %v10041_v58 }
 0x954   : > { %v4732_v0 = vadd.f32 %v10076_v56, %v4710_v48 }
 0x955   : > { %7711 = vrsqrt.f32 %v4661_v23  ;;  %v4742_v18 = vpack.c.bf16 %v4731_v16, %v4730_v49  ;;  %v4711_v30 = vmul.f32 %v10069_v6, %v4689_v47 }
 0x957   : > { %5033 = vmatmul.mubr.bf16.gmra.mxu1 %v4742_v18  ;;  %5146 = vmatmul.mubr.bf16.gmra.mxu0 %v4742_v18  ;;  %v4733_v29 = vadd.f32 %v10076_v56, %v4711_v30 }
 0x958   : > { %5042 = vmatprep.mubr.bf16.mxu1 %v10806_v24  ;;  %5155 = vmatprep.mubr.bf16.mxu0 %v10806_v24 }
 0x959   : > { %v4743_v58 = vpack.c.bf16 %v4733_v29, %v4732_v0 }
 0x95a   : > { %v7706_v53 = vpop.eup %7705 }
 0x95b   : > { %v4690_v60 = vmul.f32 %v7706_v53, %v10046_v7 }
 0x95d   : > { %v4712_v11 = vmul.f32 %v10069_v6, %v4690_v60 }
 0x95e   : > { %v7708_v10 = vpop.eup %7707 }
 0x95f   : > { %5043 = vmatmul.mubr.bf16.gmra.mxu1 %v4743_v58  ;;  %5156 = vmatmul.mubr.bf16.gmra.mxu0 %v4743_v58  ;;  %v4691_v15 = vmul.f32 %v7708_v10, %v10051_v46  ;;  %v7710_v27 = vpop.eup %7709  ;;  %v4734_v17 = vadd.f32 %v10076_v56, %v4712_v11 }
 0x960   : > { %5052 = vmatprep.mubr.bf16.mxu1 %v10806_v24  ;;  %5165 = vmatprep.mubr.bf16.mxu0 %v10806_v24  ;;  %v4692_v1 = vmul.f32 %v7710_v27, %v10054_v51  ;;  %v4778_v51 = vld [vmem:[#allocation11] sm:$0xf] }
 0x961   : > { %v4713_v26 = vmul.f32 %v10069_v6, %v4691_v15 }
 0x962   : > { %v7712_v21 = vpop.eup %7711  ;;  %v4714_v31 = vmul.f32 %v10069_v6, %v4692_v1 }
 0x963   : > { %v4735_v7 = vadd.f32 %v10076_v56, %v4713_v26  ;;  %v4693_v57 = vmul.f32 %v7712_v21, %v10061_v2  ;;  %v10815_v2 = vld [vmem:[#allocation23_spill] sm:$0xff] }
 0x964   : > { %v4736_v32 = vadd.f32 %v10076_v56, %v4714_v31  ;;  %v4794_v37 = vsub.s32 3, %v10815_v2  ;;  %v10816_v19 = vsub.s32 0, %v10815_v2  ;;  %v10818_v35 = vsub.s32 1, %v10815_v2 }
 0x965   : > { %v4744_v63 = vpack.c.bf16 %v4735_v7, %v4734_v17  ;;  %v4715_v46 = vmul.f32 %v10069_v6, %v4693_v57  ;;  %v10817_v6 = vsub.s32 2, %v10815_v2 }
 0x966   : > { %v10140_v20 = vrot.slane %v4778_v51, %v10816_v19  ;;  %v10148_v41 = vrot.slane %v4778_v51, %v10818_v35 }
 0x967   : > { %5053 = vmatmul.mubr.bf16.gmra.mxu1 %v4744_v63  ;;  %5166 = vmatmul.mubr.bf16.gmra.mxu0 %v4744_v63  ;;  %v4737_v42 = vadd.f32 %v10076_v56, %v4715_v46  ;;  %v10144_v61 = vrot.slane %v4778_v51, %v10817_v6  ;;  %v10150_v56 = vrot.slane %v4778_v51, %v4794_v37 }
 0x968   : > { %5062 = vmatprep.mubr.bf16.mxu1 %v10806_v24  ;;  %5175 = vmatprep.mubr.bf16.mxu0 %v10806_v24 }
 0x969   : > { %v4745_v36 = vpack.c.bf16 %v4737_v42, %v4736_v32 }
 0x96f   : > { %5063 = vmatmul.mubr.bf16.gmra.mxu1 %v4745_v36  ;;  %5176 = vmatmul.mubr.bf16.gmra.mxu0 %v4745_v36 }
 0x9a6   : > { %v4994_v40 = vpop.f32.mrf.mxu1  ;;  %v5107_v24 = vpop.f32.mrf.mxu0 }
 0x9a7   : > { %v10153_v3 = vadd.f32 %v4994_v40, %v10140_v20  ;;  %v10156_v45 = vadd.f32 %v5107_v24, %v10144_v61 }
 0x9a8   : > { %v4996_v34 = vpop.f32.mrf.mxu1  ;;  %v5109_v33 = vpop.f32.mrf.mxu0 }
 0x9a9   : > { %v5250_v13 = vmul.f32 0.70710677, %v10153_v3  ;;  %v5252_v43 = vmul.f32 0.70710677, %v10156_v45  ;;  %v4997_v54 = vadd.f32 %v4996_v34, %v10148_v41  ;;  %v10162_v49 = vadd.f32 %v5109_v33, %v10150_v56 }
 0x9aa   : > { %v4998_v4 = vpop.f32.mrf.mxu1  ;;  %v5111_v23 = vpop.f32.mrf.mxu0 }
 0x9ab   : > { %v10165_v16 = vadd.f32 %v4998_v4, %v10140_v20  ;;  %v10168_v47 = vadd.f32 %v5111_v23, %v10144_v61  ;;  %7713 = verf.f32 %v5250_v13  ;;  %v5251_v18 = vmul.f32 0.70710677, %v4997_v54 }
 0x9ac   : > { %v5000_v30 = vpop.f32.mrf.mxu1  ;;  %v5113_v48 = vpop.f32.mrf.mxu0  ;;  %7715 = verf.f32 %v5252_v43  ;;  %v5253_v29 = vmul.f32 0.70710677, %v10162_v49 }
 0x9ad   : > { %v5254_v53 = vmul.f32 0.70710677, %v10165_v16  ;;  %7717 = verf.f32 %v5251_v18  ;;  %v5256_v0 = vmul.f32 0.70710677, %v10168_v47  ;;  %v5001_v60 = vadd.f32 %v5000_v30, %v10148_v41 }
 0x9ae   : > { %v10175_v58 = vadd.f32 %v5113_v48, %v10150_v56  ;;  %v5004_v10 = vpop.f32.mrf.mxu1  ;;  %v5117_v15 = vpop.f32.mrf.mxu0  ;;  %7719 = verf.f32 %v5253_v29  ;;  %v5186_v48 = vmul.f32 0.5, %v10153_v3  ;;  %v5187_v29 = vmul.f32 0.5, %v4997_v54 }
 0x9af   : > { %v10178_v11 = vadd.f32 %v5004_v10, %v10140_v20  ;;  %v10181_v27 = vadd.f32 %v5117_v15, %v10144_v61  ;;  %7721 = verf.f32 %v5254_v53  ;;  %v5255_v26 = vmul.f32 0.70710677, %v5001_v60 }
 0x9b0   : > { %v5006_v21 = vpop.f32.mrf.mxu1  ;;  %v5119_v17 = vpop.f32.mrf.mxu0  ;;  %7723 = verf.f32 %v5256_v0  ;;  %v5257_v7 = vmul.f32 0.70710677, %v10175_v58  ;;  %v5193_v3 = vmul.f32 0.5, %v10175_v58 }
 0x9b1   : > { %v5258_v1 = vmul.f32 0.70710677, %v10178_v11  ;;  %7725 = verf.f32 %v5255_v26  ;;  %v5260_v57 = vmul.f32 0.70710677, %v10181_v27  ;;  %v10187_v63 = vadd.f32 %v5006_v21, %v10148_v41 }
 0x9b2   : > { %v5008_v46 = vpop.f32.mrf.mxu1  ;;  %v5121_v31 = vpop.f32.mrf.mxu0  ;;  %7727 = verf.f32 %v5257_v7  ;;  %v10190_v42 = vadd.f32 %v5119_v17, %v10150_v56  ;;  %v5190_v21 = vmul.f32 0.5, %v10165_v16 }
 0x9b3   : > { %v10193_v32 = vadd.f32 %v5008_v46, %v10140_v20  ;;  %v10196_v36 = vadd.f32 %v5121_v31, %v10144_v61  ;;  %7729 = verf.f32 %v5258_v1  ;;  %v5259_v51 = vmul.f32 0.70710677, %v10187_v63 }
 0x9b4   : > { %v5010_v2 = vpop.f32.mrf.mxu1  ;;  %v5123_v37 = vpop.f32.mrf.mxu0  ;;  %7731 = verf.f32 %v5260_v57  ;;  %v5261_v19 = vmul.f32 0.70710677, %v10190_v42  ;;  %v5192_v57 = vmul.f32 0.5, %v10168_v47  ;;  %v5191_v46 = vmul.f32 0.5, %v5001_v60 }
 0x9b5   : > { %7733 = verf.f32 %v5259_v51  ;;  %v5262_v6 = vmul.f32 0.70710677, %v10193_v32  ;;  %v5264_v40 = vmul.f32 0.70710677, %v10196_v36  ;;  %v10203_v24 = vadd.f32 %v5010_v2, %v10148_v41 }
 0x9b6   : > { %7735 = verf.f32 %v5261_v19  ;;  %v10206_v35 = vadd.f32 %v5123_v37, %v10150_v56  ;;  %v5189_v2 = vmul.f32 0.5, %v10162_v49 }
 0x9b7   : > { %7737 = verf.f32 %v5262_v6  ;;  %v5263_v33 = vmul.f32 0.70710677, %v10203_v24  ;;  %v5188_v6 = vmul.f32 0.5, %v10156_v45 }
 0x9b8   : > { %v7714_v34 = vpop.eup %7713  ;;  %7739 = verf.f32 %v5264_v40  ;;  %v5265_v43 = vmul.f32 0.70710677, %v10206_v35 }
 0x9b9   : > { %v7716_v13 = vpop.eup %7715  ;;  %7741 = verf.f32 %v5263_v33  ;;  %v5378_v15 = vadd.f32 1.0, %v7714_v34 }
 0x9ba   : > { %v7718_v4 = vpop.eup %7717  ;;  %7743 = verf.f32 %v5265_v43  ;;  %v5380_v1 = vadd.f32 1.0, %v7716_v13 }
 0x9bb   : > { %v7720_v23 = vpop.eup %7719  ;;  %v5379_v53 = vadd.f32 1.0, %v7718_v4  ;;  %v5442_v43 = vmul.f32 %v5378_v15, %v5186_v48  ;;  %v5195_v15 = vmul.f32 0.5, %v10187_v63 }
 0x9bc   : > { %v7722_v18 = vpop.eup %7721  ;;  %v5381_v26 = vadd.f32 1.0, %v7720_v23  ;;  %v5444_v60 = vmul.f32 %v5380_v1, %v5188_v6 }
 0x9bd   : > { %v7724_v30 = vpop.eup %7723  ;;  %v5382_v0 = vadd.f32 1.0, %v7722_v18  ;;  %v5443_v40 = vmul.f32 %v5379_v53, %v5187_v29 }
 0x9be   : > { %v7726_v10 = vpop.eup %7725  ;;  %v5384_v17 = vadd.f32 1.0, %v7724_v30  ;;  %v5445_v13 = vmul.f32 %v5381_v26, %v5189_v2 }
 0x9bf   : > { %v7728_v7 = vpop.eup %7727  ;;  %v5383_v31 = vadd.f32 1.0, %v7726_v10  ;;  %v5446_v37 = vmul.f32 %v5382_v0, %v5190_v21  ;;  %v5194_v21 = vmul.f32 0.5, %v10178_v11  ;;  %v5197_v11 = vmul.f32 0.5, %v10190_v42 }
 0x9c0   : > { %v7730_v51 = vpop.eup %7729  ;;  %v5385_v54 = vadd.f32 1.0, %v7728_v7  ;;  %v5448_v34 = vmul.f32 %v5384_v17, %v5192_v57  ;;  %v5198_v17 = vmul.f32 0.5, %v10193_v32  ;;  %v5200_v57 = vmul.f32 0.5, %v10196_v36 }
 0x9c1   : > { %v7732_v19 = vpop.eup %7731  ;;  %v5447_v16 = vmul.f32 %v5383_v31, %v5191_v46  ;;  %v5506_v30 = vpack.c.bf16 %v5446_v37, %v5442_v43  ;;  %v5386_v48 = vadd.f32 1.0, %v7730_v51  ;;  %v5199_v46 = vmul.f32 0.5, %v10203_v24 }
 0x9c2   : > { %v7734_v33 = vpop.eup %7733  ;;  %v5449_v4 = vmul.f32 %v5385_v54, %v5193_v3  ;;  %v5508_v10 = vpack.c.bf16 %v5448_v34, %v5444_v60  ;;  %v5388_v1 = vadd.f32 1.0, %v7732_v19  ;;  %v5201_v37 = vmul.f32 0.5, %v10206_v35 }
 0x9c3   : > { %v7736_v47 = vpop.eup %7735  ;;  %v5507_v23 = vpack.c.bf16 %v5447_v16, %v5443_v40  ;;  %v5387_v45 = vadd.f32 1.0, %v7734_v33  ;;  %v5196_v51 = vmul.f32 0.5, %v10181_v27  ;;  %v5450_v32 = vmul.f32 %v5386_v48, %v5194_v21 }
 0x9c4   : > { %v7738_v18 = vpop.eup %7737  ;;  %v5509_v49 = vpack.c.bf16 %v5449_v4, %v5445_v13  ;;  %v5389_v26 = vadd.f32 1.0, %v7736_v47 }
 0x9c5   : > { %v7740_v0 = vpop.eup %7739  ;;  %v5390_v58 = vadd.f32 1.0, %v7738_v18  ;;  %5833 = vmatprep.mubr.bf16.mxu1 %v5507_v23  ;;  %v5451_v63 = vmul.f32 %v5387_v45, %v5195_v15  ;;  %v5452_v19 = vmul.f32 %v5388_v1, %v5196_v51 }
 0x9c6   : > { %v5392_v29 = vadd.f32 1.0, %v7740_v0  ;;  %5930 = vmatprep.mubr.bf16.mxu0 %v5509_v49  ;;  %5834 = vmatmul.mubr.bf16.vlgmr.msra.gmra.mxu1 %v5506_v30  ;;  %v7742_v53 = vpop.eup %7741  ;;  %v5453_v40 = vmul.f32 %v5389_v26, %v5197_v11 }
 0x9c7   : > { %5931 = vmatmul.mubr.bf16.vlgmr.msra.gmra.mxu0 %v5508_v10  ;;  %v7744_v7 = vpop.eup %7743  ;;  %v5391_v31 = vadd.f32 1.0, %v7742_v53  ;;  %v5454_v2 = vmul.f32 %v5390_v58, %v5198_v17 }
 0x9c8   : > { %v5393_v3 = vadd.f32 1.0, %v7744_v7  ;;  %v5456_v54 = vmul.f32 %v5392_v29, %v5200_v57 }
 0x9c9   : > { %v5455_v6 = vmul.f32 %v5391_v31, %v5199_v46  ;;  %v5510_v36 = vpack.c.bf16 %v5454_v2, %v5450_v32 }
 0x9ca   : > { %v5457_v34 = vmul.f32 %v5393_v3, %v5201_v37  ;;  %v5512_v24 = vpack.c.bf16 %v5456_v54, %v5452_v19 }
 0x9cb   : > { %v5511_v16 = vpack.c.bf16 %v5455_v6, %v5451_v63 }
 0x9cc   : > { %v5513_v33 = vpack.c.bf16 %v5457_v34, %v5453_v40 }
 0x9cd   : > { %5841 = vmatprep.mubr.bf16.mxu1 %v5511_v16 }
 0x9ce   : > { %5938 = vmatprep.mubr.bf16.mxu0 %v5513_v33  ;;  %5842 = vmatmul.mubr.bf16.gmra.mxu1 %v5510_v36 }
 0x9cf   : > { %5939 = vmatmul.mubr.bf16.gmra.mxu0 %v5512_v24 }
 0x9fb   : > { %v5014_v42 = vpop.f32.mrf.mxu1  ;;  %v5127_v35 = vpop.f32.mrf.mxu0 }
 0x9fc   : > { %v10225_v43 = vadd.f32 %v5014_v42, %v10140_v20  ;;  %v10228_v27 = vadd.f32 %v5127_v35, %v10144_v61 }
 0x9fd   : > { %v5016_v13 = vpop.f32.mrf.mxu1  ;;  %v5129_v4 = vpop.f32.mrf.mxu0 }
 0x9fe   : > { %v5266_v47 = vmul.f32 0.70710677, %v10225_v43  ;;  %v5268_v60 = vmul.f32 0.70710677, %v10228_v27  ;;  %v10233_v23 = vadd.f32 %v5016_v13, %v10148_v41  ;;  %v10236_v18 = vadd.f32 %v5129_v4, %v10150_v56 }
 0x9ff   : > { %v5018_v30 = vpop.f32.mrf.mxu1  ;;  %v5131_v49 = vpop.f32.mrf.mxu0 }
 0xa00   : > { %v5019_v0 = vadd.f32 %v5018_v30, %v10140_v20  ;;  %v10240_v10 = vadd.f32 %v5131_v49, %v10144_v61  ;;  %7745 = verf.f32 %v5266_v47  ;;  %v5267_v58 = vmul.f32 0.70710677, %v10233_v23 }
 0xa01   : > { %v5020_v21 = vpop.f32.mrf.mxu1  ;;  %v5133_v45 = vpop.f32.mrf.mxu0  ;;  %7747 = verf.f32 %v5268_v60  ;;  %v5269_v29 = vmul.f32 0.70710677, %v10236_v18 }
 0xa02   : > { %v5270_v53 = vmul.f32 0.70710677, %v5019_v0  ;;  %7749 = verf.f32 %v5267_v58  ;;  %v5272_v48 = vmul.f32 0.70710677, %v10240_v10  ;;  %v5021_v15 = vadd.f32 %v5020_v21, %v10148_v41 }
 0xa03   : > { %v10247_v26 = vadd.f32 %v5133_v45, %v10150_v56  ;;  %v5024_v17 = vpop.f32.mrf.mxu1  ;;  %v5137_v7 = vpop.f32.mrf.mxu0  ;;  %7751 = verf.f32 %v5269_v29 }
 0xa04   : > { %v10250_v1 = vadd.f32 %v5024_v17, %v10140_v20  ;;  %v10253_v57 = vadd.f32 %v5137_v7, %v10144_v61  ;;  %7753 = verf.f32 %v5270_v53  ;;  %v5271_v46 = vmul.f32 0.70710677, %v5021_v15 }
 0xa05   : > { %v5026_v31 = vpop.f32.mrf.mxu1  ;;  %v5139_v11 = vpop.f32.mrf.mxu0  ;;  %7755 = verf.f32 %v5272_v48  ;;  %v5273_v2 = vmul.f32 0.70710677, %v10247_v26  ;;  %v5206_v17 = vmul.f32 0.5, %v5019_v0 }
 0xa06   : > { %v5274_v37 = vmul.f32 0.70710677, %v10250_v1  ;;  %7757 = verf.f32 %v5271_v46  ;;  %v5276_v3 = vmul.f32 0.70710677, %v10253_v57  ;;  %v10259_v51 = vadd.f32 %v5026_v31, %v10148_v41 }
 0xa07   : > { %v5028_v63 = vpop.f32.mrf.mxu1  ;;  %v5141_v54 = vpop.f32.mrf.mxu0  ;;  %7759 = verf.f32 %v5273_v2  ;;  %v10262_v6 = vadd.f32 %v5139_v11, %v10150_v56  ;;  %v5203_v46 = vmul.f32 0.5, %v10233_v23  ;;  %v5207_v31 = vmul.f32 0.5, %v5021_v15 }
 0xa08   : > { %v10265_v32 = vadd.f32 %v5028_v63, %v10140_v20  ;;  %v10268_v40 = vadd.f32 %v5141_v54, %v10144_v61  ;;  %v5275_v34 = vmul.f32 0.70710677, %v10259_v51  ;;  %7761 = verf.f32 %v5274_v37 }
 0xa09   : > { %v5030_v19 = vpop.f32.mrf.mxu1  ;;  %v5143_v16 = vpop.f32.mrf.mxu0  ;;  %v5277_v36 = vmul.f32 0.70710677, %v10262_v6  ;;  %7763 = verf.f32 %v5276_v3  ;;  %v5202_v2 = vmul.f32 0.5, %v10225_v43  ;;  %v5208_v23 = vmul.f32 0.5, %v10240_v10 }
 0xa0a   : > { %v5278_v33 = vmul.f32 0.70710677, %v10265_v32  ;;  %v5280_v24 = vmul.f32 0.70710677, %v10268_v40  ;;  %7765 = verf.f32 %v5275_v34  ;;  %v10275_v42 = vadd.f32 %v5030_v19, %v10148_v41 }
 0xa0b   : > { %v10278_v35 = vadd.f32 %v5143_v16, %v10150_v56  ;;  %7767 = verf.f32 %v5277_v36  ;;  %v5209_v36 = vmul.f32 0.5, %v10247_v26  ;;  %v5210_v10 = vmul.f32 0.5, %v10250_v1 }
 0xa0c   : > { %7769 = verf.f32 %v5278_v33  ;;  %v5279_v4 = vmul.f32 0.70710677, %v10275_v42 }
 0xa0d   : > { %v7746_v13 = vpop.eup %7745  ;;  %7771 = verf.f32 %v5280_v24  ;;  %v5281_v60 = vmul.f32 0.70710677, %v10278_v35 }
 0xa0e   : > { %v7748_v47 = vpop.eup %7747  ;;  %7773 = verf.f32 %v5279_v4  ;;  %v5394_v48 = vadd.f32 1.0, %v7746_v13 }
 0xa0f   : > { %v7750_v30 = vpop.eup %7749  ;;  %7775 = verf.f32 %v5281_v60  ;;  %v5396_v4 = vadd.f32 1.0, %v7748_v47  ;;  %v5205_v60 = vmul.f32 0.5, %v10236_v18  ;;  %v5212_v18 = vmul.f32 0.5, %v10253_v57 }
 0xa10   : > { %v7752_v49 = vpop.eup %7751  ;;  %v5395_v45 = vadd.f32 1.0, %v7750_v30  ;;  %v5458_v0 = vmul.f32 %v5394_v48, %v5202_v2  ;;  %v5214_v2 = vmul.f32 0.5, %v10265_v32  ;;  %v5215_v57 = vmul.f32 0.5, %v10275_v42 }
 0xa11   : > { %v7754_v58 = vpop.eup %7753  ;;  %v5397_v19 = vadd.f32 1.0, %v7752_v49  ;;  %v5204_v49 = vmul.f32 0.5, %v10228_v27  ;;  %v5211_v27 = vmul.f32 0.5, %v10259_v51  ;;  %v5216_v42 = vmul.f32 0.5, %v10268_v40 }
 0xa12   : > { %v7756_v21 = vpop.eup %7755  ;;  %v5398_v29 = vadd.f32 1.0, %v7754_v58  ;;  %v5459_v34 = vmul.f32 %v5395_v45, %v5203_v46 }
 0xa13   : > { %v7758_v53 = vpop.eup %7757  ;;  %v5400_v3 = vadd.f32 1.0, %v7756_v21  ;;  %v5460_v46 = vmul.f32 %v5396_v4, %v5204_v49 }
 0xa14   : > { %v7760_v7 = vpop.eup %7759  ;;  %v5399_v11 = vadd.f32 1.0, %v7758_v53  ;;  %v5462_v37 = vmul.f32 %v5398_v29, %v5206_v17  ;;  %v5461_v17 = vmul.f32 %v5397_v19, %v5205_v60 }
 0xa15   : > { %v5401_v63 = vadd.f32 1.0, %v7760_v7  ;;  %v7762_v54 = vpop.eup %7761  ;;  %v5464_v53 = vmul.f32 %v5400_v3, %v5208_v23 }
 0xa16   : > { %v5463_v16 = vmul.f32 %v5399_v11, %v5207_v31  ;;  %v7764_v13 = vpop.eup %7763  ;;  %v5514_v45 = vpack.c.bf16 %v5462_v37, %v5458_v0  ;;  %v5402_v1 = vadd.f32 1.0, %v7762_v54 }
 0xa17   : > { %v5034_v33 = vpop.f32.mrf.mxu1  ;;  %v5147_v24 = vpop.f32.mrf.mxu0  ;;  %v5465_v43 = vmul.f32 %v5401_v63, %v5209_v36  ;;  %v5404_v54 = vadd.f32 1.0, %v7764_v13 }
 0xa18   : > { %v7766_v15 = vpop.eup %7765  ;;  %v5515_v21 = vpack.c.bf16 %v5463_v16, %v5459_v34  ;;  %v10291_v31 = vadd.f32 %v5034_v33, %v10140_v20  ;;  %v10296_v37 = vadd.f32 %v5147_v24, %v10144_v61  ;;  %v5516_v16 = vpack.c.bf16 %v5464_v53, %v5460_v46 }
 0xa19   : > { %v5036_v30 = vpop.f32.mrf.mxu1  ;;  %v5149_v58 = vpop.f32.mrf.mxu0  ;;  %v5517_v3 = vpack.c.bf16 %v5465_v43, %v5461_v17  ;;  %v5403_v33 = vadd.f32 1.0, %v7766_v15  ;;  %v5217_v24 = vmul.f32 0.5, %v10278_v35 }
 0xa1a   : > { %v7768_v29 = vpop.eup %7767  ;;  %5849 = vmatprep.mubr.bf16.mxu1 %v5515_v21  ;;  %v5282_v43 = vmul.f32 0.70710677, %v10291_v31  ;;  %v10302_v21 = vadd.f32 %v5036_v30, %v10148_v41  ;;  %v5284_v15 = vmul.f32 0.70710677, %v10296_v37  ;;  %v5150_v17 = vadd.f32 %v5149_v58, %v10150_v56 }
 0xa1b   : > { %v7770_v26 = vpop.eup %7769  ;;  %v5038_v7 = vpop.f32.mrf.mxu1  ;;  %5850 = vmatmul.mubr.bf16.gmra.mxu1 %v5514_v45  ;;  %5946 = vmatprep.mubr.bf16.mxu0 %v5517_v3  ;;  %v5405_v32 = vadd.f32 1.0, %v7768_v29  ;;  %v5213_v29 = vmul.f32 0.5, %v10262_v6  ;;  %v5467_v30 = vmul.f32 %v5403_v33, %v5211_v27 }
 0xa1c   : > { %v5151_v48 = vpop.f32.mrf.mxu0  ;;  %v7772_v47 = vpop.eup %7771  ;;  %v5406_v0 = vadd.f32 1.0, %v7770_v26  ;;  %5947 = vmatmul.mubr.bf16.gmra.mxu0 %v5516_v16  ;;  %v10307_v49 = vadd.f32 %v5038_v7, %v10140_v20  ;;  %7777 = verf.f32 %v5282_v43  ;;  %v5468_v16 = vmul.f32 %v5404_v54, %v5212_v18 }
 0xa1d   : > { %v7774_v11 = vpop.eup %7773  ;;  %v5040_v63 = vpop.f32.mrf.mxu1  ;;  %v5408_v4 = vadd.f32 1.0, %v7772_v47  ;;  %v5466_v47 = vmul.f32 %v5402_v1, %v5210_v10  ;;  %v5469_v40 = vmul.f32 %v5405_v32, %v5213_v29  ;;  %v5152_v7 = vadd.f32 %v5151_v48, %v10144_v61 }
 0xa1e   : > { %v5153_v34 = vpop.f32.mrf.mxu0  ;;  %v7776_v19 = vpop.eup %7775  ;;  %v5407_v36 = vadd.f32 1.0, %v7774_v11  ;;  %v5470_v46 = vmul.f32 %v5406_v0, %v5214_v2  ;;  %7779 = verf.f32 %v5284_v15  ;;  %v5286_v6 = vmul.f32 0.70710677, %v10307_v49 }
 0xa1f   : > { %v5409_v23 = vadd.f32 1.0, %v7776_v19  ;;  %v5044_v51 = vpop.f32.mrf.mxu1  ;;  %v5472_v11 = vmul.f32 %v5408_v4, %v5216_v42  ;;  %v5283_v19 = vmul.f32 0.70710677, %v10302_v21  ;;  %v5285_v10 = vmul.f32 0.70710677, %v5150_v17 }
 0xa20   : > { %v5157_v60 = vpop.f32.mrf.mxu0  ;;  %v5471_v26 = vmul.f32 %v5407_v36, %v5215_v57  ;;  %v5041_v57 = vadd.f32 %v5040_v63, %v10148_v41  ;;  %v5154_v27 = vadd.f32 %v5153_v34, %v10150_v56  ;;  %v5518_v33 = vpack.c.bf16 %v5470_v46, %v5466_v47 }
 0xa21   : > { %v5046_v45 = vpop.f32.mrf.mxu1  ;;  %v5473_v35 = vmul.f32 %v5409_v23, %v5217_v24  ;;  %v5520_v0 = vpack.c.bf16 %v5472_v11, %v5468_v16  ;;  %7781 = verf.f32 %v5283_v19  ;;  %v5288_v48 = vmul.f32 0.70710677, %v5152_v7 }
 0xa22   : > { %v5159_v53 = vpop.f32.mrf.mxu0  ;;  %v5519_v2 = vpack.c.bf16 %v5471_v26, %v5467_v30  ;;  %v5047_v4 = vadd.f32 %v5046_v45, %v10148_v41  ;;  %7783 = verf.f32 %v5286_v6  ;;  %v5287_v18 = vmul.f32 0.70710677, %v5041_v57 }
 0xa23   : > { %v5048_v13 = vpop.f32.mrf.mxu1  ;;  %v5521_v1 = vpack.c.bf16 %v5473_v35, %v5469_v40  ;;  %7785 = verf.f32 %v5285_v10  ;;  %v5289_v34 = vmul.f32 0.70710677, %v5154_v27  ;;  %v5160_v24 = vadd.f32 %v5159_v53, %v10150_v56 }
 0xa24   : > { %v5161_v3 = vpop.f32.mrf.mxu0  ;;  %5857 = vmatprep.mubr.bf16.mxu1 %v5519_v2  ;;  %v5045_v42 = vadd.f32 %v5044_v51, %v10140_v20  ;;  %v5291_v15 = vmul.f32 0.70710677, %v5047_v4  ;;  %7787 = verf.f32 %v5288_v48  ;;  %v10327_v26 = vadd.f32 %v5157_v60, %v10144_v61 }
 0xa25   : > { %v5050_v36 = vpop.f32.mrf.mxu1  ;;  %5954 = vmatprep.mubr.bf16.mxu0 %v5521_v1  ;;  %5858 = vmatmul.mubr.bf16.gmra.mxu1 %v5518_v33  ;;  %7789 = verf.f32 %v5287_v18  ;;  %v5293_v35 = vmul.f32 0.70710677, %v5160_v24  ;;  %v5049_v46 = vadd.f32 %v5048_v13, %v10140_v20  ;;  %v5218_v51 = vmul.f32 0.5, %v10291_v31 }
 0xa26   : > { %v5163_v58 = vpop.f32.mrf.mxu0  ;;  %5955 = vmatmul.mubr.bf16.gmra.mxu0 %v5520_v0  ;;  %v10318_v63 = vadd.f32 %v5050_v36, %v10148_v41  ;;  %7791 = verf.f32 %v5289_v34  ;;  %v5290_v30 = vmul.f32 0.70710677, %v5045_v42  ;;  %v5220_v40 = vmul.f32 0.5, %v10296_v37 }
 0xa27   : > { %v5054_v23 = vpop.f32.mrf.mxu1  ;;  %v10322_v43 = vadd.f32 %v5163_v58, %v10150_v56  ;;  %7793 = verf.f32 %v5291_v15  ;;  %v10337_v60 = vmul.f32 0.5, %v10302_v21  ;;  %v10339_v6 = vmul.f32 0.5, %v5150_v17 }
 0xa28   : > { %v5167_v32 = vpop.f32.mrf.mxu0  ;;  %v5295_v29 = vmul.f32 0.70710677, %v10318_v63  ;;  %v5162_v36 = vadd.f32 %v5161_v3, %v10144_v61  ;;  %v5222_v13 = vmul.f32 0.5, %v10307_v49  ;;  %v5292_v31 = vmul.f32 0.70710677, %v10327_v26 }
 0xa29   : > { %v5056_v54 = vpop.f32.mrf.mxu1  ;;  %v5297_v47 = vmul.f32 0.70710677, %v10322_v43  ;;  %v7778_v16 = vpop.eup %7777  ;;  %v10345_v37 = vadd.f32 %v5054_v23, %v10140_v20  ;;  %v10347_v2 = vmul.f32 0.5, %v5152_v7  ;;  %v5294_v21 = vmul.f32 0.70710677, %v5049_v46 }
 0xa2a   : > { %v5169_v45 = vpop.f32.mrf.mxu0  ;;  %7795 = verf.f32 %v5295_v29  ;;  %v10334_v19 = vadd.f32 %v5056_v54, %v10148_v41  ;;  %v5410_v3 = vadd.f32 1.0, %v7778_v16  ;;  %v10352_v33 = vmul.f32 0.5, %v5041_v57 }
 0xa2b   : > { %v5058_v53 = vpop.f32.mrf.mxu1  ;;  %7797 = verf.f32 %v5297_v47  ;;  %v7780_v58 = vpop.eup %7779  ;;  %v10350_v17 = vadd.f32 %v5169_v45, %v10150_v56  ;;  %v10355_v49 = vadd.f32 %v5167_v32, %v10144_v61  ;;  %v10358_v23 = vmul.f32 0.5, %v5154_v27 }
 0xa2c   : > { %v5171_v11 = vpop.f32.mrf.mxu0  ;;  %7799 = verf.f32 %v5293_v35  ;;  %v5299_v0 = vmul.f32 0.70710677, %v10334_v19  ;;  %v10360_v18 = vmul.f32 0.5, %v5045_v42  ;;  %v10362_v7 = vmul.f32 0.5, %v5047_v4 }
 0xa2d   : > { %v5060_v10 = vpop.f32.mrf.mxu1  ;;  %7801 = verf.f32 %v5290_v30  ;;  %v5296_v34 = vmul.f32 0.70710677, %v5162_v36  ;;  %v5412_v15 = vadd.f32 1.0, %v7780_v58  ;;  %v10364_v45 = vmul.f32 0.5, %v5160_v24 }
 0xa2e   : > { %v5173_v1 = vpop.f32.mrf.mxu0  ;;  %v7782_v48 = vpop.eup %7781  ;;  %7803 = verf.f32 %v5292_v31  ;;  %v5298_v57 = vmul.f32 0.70710677, %v10345_v37  ;;  %v10367_v35 = vmul.f32 0.5, %v5049_v46  ;;  %v5301_v27 = vmul.f32 0.70710677, %v10350_v17 }
 0xa2f   : > { %v7784_v54 = vpop.eup %7783  ;;  %v5064_v29 = vpop.f32.mrf.mxu1  ;;  %7805 = verf.f32 %v5294_v21  ;;  %v10371_v42 = vadd.f32 %v5058_v53, %v10140_v20  ;;  %v10375_v47 = vmul.f32 %v5410_v3, %v5218_v51  ;;  %v5411_v30 = vadd.f32 1.0, %v7782_v48 }
 0xa30   : > { %v7786_v32 = vpop.eup %7785  ;;  %v10373_v4 = vpop.f32.mrf.mxu0  ;;  %v5300_v24 = vmul.f32 0.70710677, %v10355_v49  ;;  %7807 = verf.f32 %v5299_v0  ;;  %v5414_v58 = vadd.f32 1.0, %v7784_v54  ;;  %v10379_v46 = vadd.f32 %v5060_v10, %v10148_v41 }
 0xa31   : > { %v7788_v16 = vpop.eup %7787  ;;  %7809 = verf.f32 %v5296_v34  ;;  %v10382_v31 = vadd.f32 %v5173_v1, %v10150_v56  ;;  %v5413_v53 = vadd.f32 1.0, %v7786_v32  ;;  %v10384_v52 = vmul.f32 0.5, %v5162_v36  ;;  %v5066_v3 = vpop.f32.mrf.mxu1 }
 0xa32   : > { %v7790_v21 = vpop.eup %7789  ;;  %7811 = verf.f32 %v5298_v57  ;;  %v10387_v51 = vadd.f32 %v5171_v11, %v10144_v61  ;;  %v5231_v0 = vmul.f32 0.5, %v10318_v63  ;;  %v5302_v34 = vmul.f32 0.70710677, %v10371_v42  ;;  %v5179_v54 = vpop.f32.mrf.mxu0 }
 0xa33   : > { %v7792_v48 = vpop.eup %7791  ;;  %7813 = verf.f32 %v5301_v27  ;;  %v5303_v10 = vmul.f32 0.70710677, %v10379_v46  ;;  %v10392_v39 = vmul.f32 %v5412_v15, %v5220_v40  ;;  %v5416_v32 = vadd.f32 1.0, %v7788_v16  ;;  %v5068_v15 = vpop.f32.mrf.mxu1 }
 0xa34   : > { %v7794_v1 = vpop.eup %7793  ;;  %7815 = verf.f32 %v5300_v24  ;;  %v5305_v36 = vmul.f32 0.70710677, %v10382_v31  ;;  %v5475_v11 = vmul.f32 %v5411_v30, %v10337_v60  ;;  %v10396_v14 = vmul.f32 %v5414_v58, %v5222_v13  ;;  %v5181_v60 = vpop.f32.mrf.mxu0 }
 0xa35   : > { %v5233_v63 = vmul.f32 0.5, %v10322_v43  ;;  %7817 = verf.f32 %v5303_v10  ;;  %v10400_v8 = vmul.f32 %v5413_v53, %v10339_v6  ;;  %v5415_v50 = vadd.f32 1.0, %v7790_v21  ;;  %v5070_v10 = vpop.f32.mrf.mxu1 }
 0xa36   : > { %v5304_v40 = vmul.f32 0.70710677, %v10387_v51  ;;  %7819 = verf.f32 %v5305_v36  ;;  %v5417_v16 = vadd.f32 1.0, %v7792_v48  ;;  %v5419_v55 = vadd.f32 1.0, %v7794_v1 }
 0xa37   : > { %v7796_v57 = vpop.eup %7795  ;;  %v10404_v9 = vmul.f32 0.5, %v10334_v19  ;;  %7821 = verf.f32 %v5302_v34  ;;  %v10407_v43 = vmul.f32 %v5416_v32, %v10347_v2  ;;  %v10410_v6 = vadd.f32 %v5064_v29, %v10140_v20 }
 0xa38   : > { %v7798_v27 = vpop.eup %7797  ;;  %v5423_v30 = vadd.f32 1.0, %v7796_v57  ;;  %v10413_v58 = vadd.f32 %v5066_v3, %v10148_v41  ;;  %v5522_v21 = vpack.c.bf16 %v10396_v14, %v10375_v47  ;;  %v10418_v19 = vadd.f32 %v5179_v54, %v10150_v56  ;;  %v5183_v54 = vpop.f32.mrf.mxu0 }
 0xa39   : > { %v7800_v24 = vpop.eup %7799  ;;  %v5425_v53 = vadd.f32 1.0, %v7798_v27  ;;  %v10421_v48 = vadd.f32 %v5068_v15, %v10140_v20  ;;  %v5479_v2 = vmul.f32 %v5415_v50, %v10352_v33  ;;  %7823 = verf.f32 %v5304_v40 }
 0xa3a   : > { %v7802_v13 = vpop.eup %7801  ;;  %v5421_v34 = vadd.f32 1.0, %v7800_v24  ;;  %v5307_v29 = vmul.f32 0.70710677, %v10413_v58  ;;  %v5481_v3 = vmul.f32 %v5417_v16, %v10358_v23  ;;  %v5483_v14 = vmul.f32 %v5419_v55, %v10362_v7 }
 0xa3b   : > { %v7804_v1 = vpop.eup %7803  ;;  %v5418_v32 = vadd.f32 1.0, %v7802_v13  ;;  %v5309_v47 = vmul.f32 0.70710677, %v10418_v19  ;;  %v5487_v57 = vmul.f32 %v5423_v30, %v5231_v0  ;;  %v5306_v20 = vmul.f32 0.70710677, %v10410_v6 }
 0xa3c   : > { %v7806_v36 = vpop.eup %7805  ;;  %v10431_v50 = vadd.f32 %v10373_v4, %v10144_v61  ;;  %v5310_v33 = vmul.f32 0.70710677, %v10421_v48  ;;  %v5489_v40 = vmul.f32 %v5425_v53, %v5233_v63  ;;  %7825 = verf.f32 %v5307_v29 }
 0xa3d   : > { %v7808_v27 = vpop.eup %7807  ;;  %v10435_v23 = vadd.f32 %v5181_v60, %v10144_v61  ;;  %v10438_v55 = vadd.f32 %v5070_v10, %v10148_v41  ;;  %v5485_v0 = vmul.f32 %v5421_v34, %v10364_v45  ;;  %7827 = verf.f32 %v5309_v47 }
 0xa3e   : > { %v7810_v7 = vpop.eup %7809  ;;  %v10442_v15 = vadd.f32 %v5183_v54, %v10150_v56  ;;  %v5523_v4 = vpack.c.bf16 %v5479_v2, %v5475_v11  ;;  %v5422_v16 = vadd.f32 1.0, %v7806_v36  ;;  %7829 = verf.f32 %v5310_v33 }
 0xa3f   : > { %v7812_v24 = vpop.eup %7811  ;;  %v5312_v63 = vmul.f32 0.70710677, %v10435_v23  ;;  %v5311_v13 = vmul.f32 0.70710677, %v10438_v55  ;;  %v5427_v60 = vadd.f32 1.0, %v7808_v27  ;;  %7831 = verf.f32 %v5306_v20 }
 0xa40   : > { %v7814_v61 = vpop.eup %7813  ;;  %v5308_v41 = vmul.f32 0.70710677, %v10431_v50  ;;  %v5313_v30 = vmul.f32 0.70710677, %v10442_v15  ;;  %5865 = vmatprep.mubr.bf16.mxu1 %v5523_v4  ;;  %v5525_v56 = vpack.c.bf16 %v5481_v3, %v10400_v8  ;;  %v5527_v11 = vpack.c.bf16 %v5487_v57, %v5483_v14 }
 0xa41   : > { %v7816_v45 = vpop.eup %7815  ;;  %7833 = verf.f32 %v5312_v63  ;;  %5866 = vmatmul.mubr.bf16.gmra.mxu1 %v5522_v21  ;;  %v5529_v53 = vpack.c.bf16 %v5489_v40, %v5485_v0  ;;  %v5524_v34 = vpack.c.bf16 %v10407_v43, %v10392_v39  ;;  %v5424_v29 = vadd.f32 1.0, %v7810_v7 }
 0xa42   : > { %v7818_v2 = vpop.eup %7817  ;;  %v5239_v10 = vmul.f32 0.5, %v10379_v46  ;;  %7835 = verf.f32 %v5311_v13  ;;  %v5486_v54 = vmul.f32 %v5422_v16, %v10367_v35  ;;  %v5429_v36 = vadd.f32 1.0, %v7814_v61  ;;  %5962 = vmatprep.mubr.bf16.mxu0 %v5525_v56  ;;  %5873 = vmatprep.mubr.bf16.mxu1 %v5527_v11 }
 0xa43   : > { %v7820_v47 = vpop.eup %7819  ;;  %v5431_v20 = vadd.f32 1.0, %v7818_v2  ;;  %7837 = verf.f32 %v5313_v30  ;;  %v5420_v21 = vadd.f32 1.0, %v7804_v1  ;;  %v5241_v3 = vmul.f32 0.5, %v10382_v31  ;;  %5963 = vmatmul.mubr.bf16.gmra.mxu0 %v5524_v34 }
 0xa44   : > { %v7822_v8 = vpop.eup %7821  ;;  %v5433_v14 = vadd.f32 1.0, %v7820_v47  ;;  %7839 = verf.f32 %v5308_v41  ;;  %v5482_v39 = vmul.f32 %v5418_v32, %v10360_v18  ;;  %v5491_v46 = vmul.f32 %v5427_v60, %v10404_v9  ;;  %5970 = vmatprep.mubr.bf16.mxu0 %v5529_v53 }
 0xa45   : > { %v5237_v43 = vmul.f32 0.5, %v10350_v17  ;;  %v5495_v57 = vmul.f32 %v5431_v20, %v5239_v10  ;;  %v5228_v35 = vmul.f32 0.5, %v10327_v26  ;;  %v5488_v33 = vmul.f32 %v5424_v29, %v10384_v52 }
 0xa46   : > { %v5497_v27 = vmul.f32 %v5433_v14, %v5241_v3  ;;  %v7824_v40 = vpop.eup %7823  ;;  %v5526_v1 = vpack.c.bf16 %v5486_v54, %v5482_v39  ;;  %v5430_v31 = vadd.f32 1.0, %v7822_v8  ;;  %v5426_v16 = vadd.f32 1.0, %v7812_v24 }
 0xa47   : > { %v5493_v7 = vmul.f32 %v5429_v36, %v5237_v43  ;;  %v5531_v0 = vpack.c.bf16 %v5495_v57, %v5491_v46  ;;  %v5484_v4 = vmul.f32 %v5420_v21, %v5228_v35  ;;  %v5238_v18 = vmul.f32 0.5, %v10371_v42 }
 0xa48   : > { %v5432_v63 = vadd.f32 1.0, %v7824_v40  ;;  %v5234_v26 = vmul.f32 0.5, %v10345_v37  ;;  %v5428_v60 = vadd.f32 1.0, %v7816_v45  ;;  %v5240_v41 = vmul.f32 0.5, %v10387_v51 }
 0xa49   : > { %5874 = vmatmul.mubr.bf16.gmra.mxu1 %v5526_v1  ;;  %v5533_v9 = vpack.c.bf16 %v5497_v27, %v5493_v7  ;;  %v7826_v32 = vpop.eup %7825  ;;  %v5528_v17 = vpack.c.bf16 %v5488_v33, %v5484_v4  ;;  %v5494_v52 = vmul.f32 %v5430_v31, %v5238_v18  ;;  %v5236_v42 = vmul.f32 0.5, %v10355_v49 }
 0xa4a   : > { %5881 = vmatprep.mubr.bf16.mxu1 %v5531_v0  ;;  %v7828_v13 = vpop.eup %7827  ;;  %v5490_v56 = vmul.f32 %v5426_v16, %v5234_v26  ;;  %v5496_v11 = vmul.f32 %v5432_v63, %v5240_v41  ;;  %v5435_v53 = vadd.f32 1.0, %v7826_v32  ;;  %v5243_v29 = vmul.f32 0.5, %v10413_v58  ;;  %v10471_v16 = vld [vmem:[#allocation14] ss:$0 sm:$0xff] }
 0xa4b   : > { %v7830_v61 = vpop.eup %7829  ;;  %5971 = vmatmul.mubr.bf16.gmra.mxu0 %v5528_v17  ;;  %v5437_v10 = vadd.f32 1.0, %v7828_v13  ;;  %v5492_v54 = vmul.f32 %v5428_v60, %v5236_v42  ;;  %v5245_v45 = vmul.f32 0.5, %v10418_v19  ;;  %v5247_v51 = vmul.f32 0.5, %v10438_v55 }
 0xa4c   : > { %v7832_v30 = vpop.eup %7831  ;;  %5978 = vmatprep.mubr.bf16.mxu0 %v5533_v9  ;;  %v5530_v34 = vpack.c.bf16 %v5494_v52, %v5490_v56  ;;  %v5438_v37 = vadd.f32 1.0, %v7830_v61  ;;  %v5246_v21 = vmul.f32 0.5, %v10421_v48  ;;  %v5249_v49 = vmul.f32 0.5, %v10442_v15 }
 0xa4d   : > { %v5434_v8 = vadd.f32 1.0, %v7832_v30  ;;  %v5532_v14 = vpack.c.bf16 %v5496_v11, %v5492_v54  ;;  %v5499_v39 = vmul.f32 %v5435_v53, %v5243_v29  ;;  %v5242_v43 = vmul.f32 0.5, %v10410_v6 }
 0xa4e   : > { %v7834_v24 = vpop.eup %7833  ;;  %v5501_v57 = vmul.f32 %v5437_v10, %v5245_v45  ;;  %v5502_v35 = vmul.f32 %v5438_v37, %v5246_v21  ;;  %v5248_v55 = vmul.f32 0.5, %v10435_v23  ;;  %v5244_v15 = vmul.f32 0.5, %v10431_v50 }
 0xa4f   : > { %v7836_v2 = vpop.eup %7835  ;;  %v5440_v58 = vadd.f32 1.0, %v7834_v24  ;;  %v5498_v40 = vmul.f32 %v5434_v8, %v5242_v43 }
 0xa50   : > { %v7838_v47 = vpop.eup %7837  ;;  %v5439_v36 = vadd.f32 1.0, %v7836_v2 }
 0xa51   : > { %v7840_v20 = vpop.eup %7839  ;;  %v5441_v3 = vadd.f32 1.0, %v7838_v47  ;;  %5882 = vmatmul.mubr.bf16.gmra.mxu1 %v5530_v34  ;;  %v5504_v1 = vmul.f32 %v5440_v58, %v5248_v55  ;;  %v5534_v7 = vpack.c.bf16 %v5502_v35, %v5498_v40 }
 0xa52   : > { %v5503_v46 = vmul.f32 %v5439_v36, %v5247_v51  ;;  %v5436_v33 = vadd.f32 1.0, %v7840_v20 }
 0xa53   : > { %v5505_v19 = vmul.f32 %v5441_v3, %v5249_v49  ;;  %5979 = vmatmul.mubr.bf16.gmra.mxu0 %v5532_v14 }
 0xa54   : > { %v5535_v27 = vpack.c.bf16 %v5503_v46, %v5499_v39  ;;  %v5500_v31 = vmul.f32 %v5436_v33, %v5244_v15 }
 0xa55   : > { %v5537_v48 = vpack.c.bf16 %v5505_v19, %v5501_v57 }
 0xa56   : > { %5889 = vmatprep.mubr.bf16.mxu1 %v5535_v27  ;;  %v5536_v0 = vpack.c.bf16 %v5504_v1, %v5500_v31 }
 0xa57   : > { %5986 = vmatprep.mubr.bf16.mxu0 %v5537_v48 }
 0xa59   : > { %5890 = vmatmul.mubr.bf16.gmra.mxu1 %v5534_v7 }
 0xa5b   : > { %5987 = vmatmul.mubr.bf16.gmra.mxu0 %v5536_v0 }
 0xa86   : > { %v6558_v6 = vpop.f32.mrf.mxu1 }
 0xa87   : > { %v6622_v4 = vpop.f32.mrf.mxu0 }
 0xa88   : > { %v6559_v18 = vpop.f32.mrf.mxu1 }
 0xa89   : > { %v6560_v23 = vadd.f32 %v6559_v18, %v6558_v6  ;;  %v6623_v9 = vpop.f32.mrf.mxu0 }
 0xa8a   : > { %v6561_v32 = vpop.f32.mrf.mxu1  ;;  %v6624_v50 = vadd.f32 %v6623_v9, %v6622_v4 }
 0xa8b   : > { %v5836_v17 = vadd.f32 %v6560_v23, %v10471_v16  ;;  %v6625_v63 = vpop.f32.mrf.mxu0 }
 0xa8c   : > { %v6562_v13 = vpop.f32.mrf.mxu1 }
 0xa8d   : > { %v5933_v26 = vadd.f32 %v6624_v50, %v5836_v17  ;;  %v6563_v52 = vadd.f32 %v6562_v13, %v6561_v32  ;;  %v6626_v61 = vpop.f32.mrf.mxu0 }
 0xa8e   : > { %v6627_v30 = vadd.f32 %v6626_v61, %v6625_v63  ;;  %v6564_v56 = vpop.f32.mrf.mxu1 }
 0xa8f   : > { %v5995_v60 = vadd.f32 %v5933_v26, %v9908_v12  ;;  %v5839_v41 = vadd.f32 %v6563_v52, %v10471_v16  ;;  %v6628_v24 = vpop.f32.mrf.mxu0 }
 0xa90   : > { %v6565_v11 = vpop.f32.mrf.mxu1 }
 0xa91   : > { %6011 = vst [vmem:[%s10478_s5] sm:$0xff] %v5995_v60  ;;  %v5936_v42 = vadd.f32 %v6627_v30, %v5839_v41  ;;  %v6566_v53 = vadd.f32 %v6565_v11, %v6564_v56  ;;  %v6629_v2 = vpop.f32.mrf.mxu0 }
 0xa92   : > { %v6567_v12 = vpop.f32.mrf.mxu1  ;;  %v6630_v10 = vadd.f32 %v6629_v2, %v6628_v24 }
 0xa93   : > { %v5996_v34 = vadd.f32 %v5936_v42, %v9917_v25  ;;  %v5844_v29 = vadd.f32 %v6566_v53, %v10471_v16  ;;  %v6631_v37 = vpop.f32.mrf.mxu0 }
 0xa94   : > { %v6568_v47 = vpop.f32.mrf.mxu1 }
 0xa95   : > { %6012 = vst [vmem:[%s10478_s5 + $0x8] sm:$0xff] %v5996_v34  ;;  %v5941_v54 = vadd.f32 %v6630_v10, %v5844_v29  ;;  %v6569_v45 = vadd.f32 %v6568_v47, %v6567_v12  ;;  %v6632_v51 = vpop.f32.mrf.mxu0 }
 0xa96   : > { %v6633_v8 = vadd.f32 %v6632_v51, %v6631_v37 }
 0xa97   : > { %v5997_v36 = vadd.f32 %v5941_v54, %v9913_v59  ;;  %v5847_v20 = vadd.f32 %v6569_v45, %v10471_v16 }
 0xa99   : > { %6013 = vst [vmem:[%s10478_s5 + $0x10] sm:$0xff] %v5997_v36  ;;  %v5944_v21 = vadd.f32 %v6633_v8, %v5847_v20 }
 0xa9b   : > { %v5998_v25 = vadd.f32 %v5944_v21, %v9922_v44  ;;  %v10819_v21 = vld [vmem:[#allocation29_spill] sm:$0xff] }
 0xa9d   : > { %6014 = vst [vmem:[%s10478_s5 + $0x18] sm:$0xff] %v5998_v25 }
 0xadb   : > { %v6570_v49 = vpop.f32.mrf.mxu1 }
 0xadc   : > { %v6634_v39 = vpop.f32.mrf.mxu0 }
 0xadd   : > { %v6571_v3 = vpop.f32.mrf.mxu1 }
 0xade   : > { %v6572_v14 = vadd.f32 %v6571_v3, %v6570_v49  ;;  %v6635_v43 = vpop.f32.mrf.mxu0 }
 0xadf   : > { %v6573_v58 = vpop.f32.mrf.mxu1  ;;  %v6636_v35 = vadd.f32 %v6635_v43, %v6634_v39 }
 0xae0   : > { %v5852_v46 = vadd.f32 %v6572_v14, %v10471_v16  ;;  %v6637_v19 = vpop.f32.mrf.mxu0 }
 0xae1   : > { %v6574_v57 = vpop.f32.mrf.mxu1 }
 0xae2   : > { %v6575_v59 = vadd.f32 %v6574_v57, %v6573_v58  ;;  %v5949_v33 = vadd.f32 %v6636_v35, %v5852_v46  ;;  %v6638_v27 = vpop.f32.mrf.mxu0  ;;  %v10820_v57 = vld [vmem:[#allocation61_spill] sm:$0xff] }
 0xae3   : > { %v6639_v40 = vadd.f32 %v6638_v27, %v6637_v19 }
 0xae4   : > { %v5855_v55 = vadd.f32 %v6575_v59, %v10471_v16  ;;  %v5999_v44 = vadd.f32 %v5949_v33, %v9928_v22 }
 0xae5   : > { %v6576_v15 = vpop.f32.mrf.mxu1 }
 0xae6   : > { %6015 = vst [vmem:[%s10478_s5 + $0x20] sm:$0xff] %v5999_v44  ;;  %v5952_v48 = vadd.f32 %v6639_v40, %v5855_v55  ;;  %v6640_v1 = vpop.f32.mrf.mxu0 }
 0xae7   : > { %v6577_v31 = vpop.f32.mrf.mxu1 }
 0xae8   : > { %v6000_v7 = vadd.f32 %v5952_v48, %v9937_v38  ;;  %v6641_v0 = vpop.f32.mrf.mxu0  ;;  %v6578_v6 = vadd.f32 %v6577_v31, %v6576_v15  ;;  %v10821_v15 = vld [vmem:[#allocation32_spill] sm:$0xff] }
 0xae9   : > { %v6579_v4 = vpop.f32.mrf.mxu1  ;;  %v6642_v9 = vadd.f32 %v6641_v0, %v6640_v1 }
 0xaea   : > { %6016 = vst [vmem:[%s10478_s5 + $0x28] sm:$0xff] %v6000_v7  ;;  %v6643_v18 = vpop.f32.mrf.mxu0  ;;  %v5860_v23 = vadd.f32 %v6578_v6, %v10471_v16 }
 0xaeb   : > { %v6580_v32 = vpop.f32.mrf.mxu1 }
 0xaec   : > { %v6644_v22 = vpop.f32.mrf.mxu0  ;;  %v5957_v17 = vadd.f32 %v6642_v9, %v5860_v23  ;;  %v6581_v50 = vadd.f32 %v6580_v32, %v6579_v4  ;;  %v10822_v32 = vld [vmem:[#allocation30_spill] sm:$0xff] }
 0xaed   : > { %v6645_v38 = vadd.f32 %v6644_v22, %v6643_v18 }
 0xaee   : > { %v6001_v63 = vadd.f32 %v5957_v17, %v9933_v5  ;;  %v5863_v13 = vadd.f32 %v6581_v50, %v10471_v16 }
 0xaf0   : > { %6017 = vst [vmem:[%s10478_s5 + $0x30] sm:$0xff] %v6001_v63  ;;  %v5960_v26 = vadd.f32 %v6645_v38, %v5863_v13 }
 0xaf2   : > { %v6002_v52 = vadd.f32 %v5960_v26, %v9942_v28 }
 0xaf4   : > { %6018 = vst [vmem:[%s10478_s5 + $0x38] sm:$0xff] %v6002_v52 }
 0xb01   : > { %v6582_v61 = vpop.f32.mrf.mxu1 }
 0xb03   : > { %v6583_v60 = vpop.f32.mrf.mxu1  ;;  %v6646_v41 = vpop.f32.mrf.mxu0 }
 0xb04   : > { %v6584_v30 = vadd.f32 %v6583_v60, %v6582_v61  ;;  %v10823_v60 = vld [vmem:[#allocation51_spill] sm:$0xff] }
 0xb05   : > { %v6585_v56 = vpop.f32.mrf.mxu1  ;;  %v6647_v42 = vpop.f32.mrf.mxu0 }
 0xb06   : > { %v5868_v24 = vadd.f32 %v6584_v30, %v10471_v16  ;;  %v6648_v11 = vadd.f32 %v6647_v42, %v6646_v41 }
 0xb07   : > { %v6586_v53 = vpop.f32.mrf.mxu1  ;;  %v6649_v5 = vpop.f32.mrf.mxu0 }
 0xb08   : > { %v6587_v2 = vadd.f32 %v6586_v53, %v6585_v56  ;;  %v5965_v34 = vadd.f32 %v6648_v11, %v5868_v24 }
 0xb09   : > { %v6588_v12 = vpop.f32.mrf.mxu1  ;;  %v6650_v10 = vpop.f32.mrf.mxu0 }
 0xb0a   : > { %v5871_v29 = vadd.f32 %v6587_v2, %v10471_v16  ;;  %v6003_v28 = vadd.f32 %v5965_v34, %v9948_v62  ;;  %v6651_v37 = vadd.f32 %v6650_v10, %v6649_v5  ;;  %v10824_v2 = vld [vmem:[#allocation28_spill] sm:$0xff] }
 0xb0b   : > { %v6589_v47 = vpop.f32.mrf.mxu1  ;;  %v6652_v54 = vpop.f32.mrf.mxu0  ;;  %v10826_v10 = vld [vmem:[#allocation48_spill] sm:$0xff] }
 0xb0c   : > { %v6590_v45 = vadd.f32 %v6589_v47, %v6588_v12  ;;  %6019 = vst [vmem:[%s10478_s5 + $0x40] sm:$0xff] %v6003_v28  ;;  %v5968_v51 = vadd.f32 %v6651_v37, %v5871_v29 }
 0xb0d   : > { %v6591_v36 = vpop.f32.mrf.mxu1  ;;  %v6653_v8 = vpop.f32.mrf.mxu0 }
 0xb0e   : > { %v5876_v20 = vadd.f32 %v6590_v45, %v10471_v16  ;;  %v6004_v25 = vadd.f32 %v5968_v51, %v10819_v21  ;;  %v6654_v49 = vadd.f32 %v6653_v8, %v6652_v54 }
 0xb0f   : > { %v6592_v3 = vpop.f32.mrf.mxu1  ;;  %v6655_v14 = vpop.f32.mrf.mxu0 }
 0xb10   : > { %v6593_v39 = vadd.f32 %v6592_v3, %v6591_v36  ;;  %6020 = vst [vmem:[%s10478_s5 + $0x48] sm:$0xff] %v6004_v25  ;;  %v5973_v58 = vadd.f32 %v6654_v49, %v5876_v20 }
 0xb11   : > { %v6594_v62 = vpop.f32.mrf.mxu1  ;;  %v6656_v43 = vpop.f32.mrf.mxu0 }
 0xb12   : > { %v5879_v46 = vadd.f32 %v6593_v39, %v10471_v16  ;;  %v6005_v35 = vadd.f32 %v5973_v58, %v10820_v57  ;;  %v6657_v59 = vadd.f32 %v6656_v43, %v6655_v14 }
 0xb13   : > { %v6595_v19 = vpop.f32.mrf.mxu1  ;;  %v6658_v33 = vpop.f32.mrf.mxu0 }
 0xb14   : > { %v6596_v55 = vadd.f32 %v6595_v19, %v6594_v62  ;;  %6021 = vst [vmem:[%s10478_s5 + $0x50] sm:$0xff] %v6005_v35  ;;  %v5976_v27 = vadd.f32 %v6657_v59, %v5879_v46 }
 0xb15   : > { %v6597_v44 = vpop.f32.mrf.mxu1  ;;  %v6659_v48 = vpop.f32.mrf.mxu0 }
 0xb16   : > { %v5884_v40 = vadd.f32 %v6596_v55, %v10471_v16  ;;  %v6006_v1 = vadd.f32 %v5976_v27, %v10821_v15  ;;  %v6660_v7 = vadd.f32 %v6659_v48, %v6658_v33 }
 0xb17   : > { %v6598_v31 = vpop.f32.mrf.mxu1  ;;  %v6661_v0 = vpop.f32.mrf.mxu0 }
 0xb18   : > { %v6599_v6 = vadd.f32 %v6598_v31, %v6597_v44  ;;  %6022 = vst [vmem:[%s10478_s5 + $0x58] sm:$0xff] %v6006_v1  ;;  %v5981_v4 = vadd.f32 %v6660_v7, %v5884_v40 }
 0xb19   : > { %v6600_v18 = vpop.f32.mrf.mxu1  ;;  %v6662_v9 = vpop.f32.mrf.mxu0 }
 0xb1a   : > { %v5887_v23 = vadd.f32 %v6599_v6, %v10471_v16  ;;  %v6007_v22 = vadd.f32 %v5981_v4, %v10822_v32  ;;  %v6663_v17 = vadd.f32 %v6662_v9, %v6661_v0 }
 0xb1b   : > { %v6601_v50 = vpop.f32.mrf.mxu1  ;;  %v6664_v63 = vpop.f32.mrf.mxu0 }
 0xb1c   : > { %v6602_v13 = vadd.f32 %v6601_v50, %v6600_v18  ;;  %6023 = vst [vmem:[%s10478_s5 + $0x60] sm:$0xff] %v6007_v22  ;;  %v5984_v38 = vadd.f32 %v6663_v17, %v5887_v23 }
 0xb1d   : > { %v6603_v26 = vpop.f32.mrf.mxu1  ;;  %v6665_v61 = vpop.f32.mrf.mxu0 }
 0xb1e   : > { %v5892_v52 = vadd.f32 %v6602_v13, %v10471_v16  ;;  %v6008_v41 = vadd.f32 %v5984_v38, %v10823_v60  ;;  %v6666_v30 = vadd.f32 %v6665_v61, %v6664_v63 }
 0xb1f   : > { %v6604_v56 = vpop.f32.mrf.mxu1  ;;  %v6667_v24 = vpop.f32.mrf.mxu0 }
 0xb20   : > { %v6605_v42 = vadd.f32 %v6604_v56, %v6603_v26  ;;  %6024 = vst [vmem:[%s10478_s5 + $0x68] sm:$0xff] %v6008_v41  ;;  %v5989_v11 = vadd.f32 %v6666_v30, %v5892_v52 }
 0xb21   : > { %v6668_v5 = vpop.f32.mrf.mxu0 }
 0xb22   : > { %v5895_v53 = vadd.f32 %v6605_v42, %v10471_v16  ;;  %v6009_v34 = vadd.f32 %v5989_v11, %v10824_v2  ;;  %v6669_v12 = vadd.f32 %v6668_v5, %v6667_v24 }
 0xb24   : > { %6025 = vst [vmem:[%s10478_s5 + $0x70] sm:$0xff] %v6009_v34  ;;  %v5992_v29 = vadd.f32 %v6669_v12, %v5895_v53 }
 0xb26   : > { %v6010_v16 = vadd.f32 %v5992_v29, %v10826_v10 }
 0xb28   : > { %6026 = vst [vmem:[%s10478_s5 + $0x78] sm:$0xff] %v6010_v16 }
 0xb29   : > { %8080 = shalt.err (!%p8077_p6)
}
 0xb2a   : > { %s8081_s17 = scalar_lea.hbm %s10528_s22, 2048  ;;  %s8085_s5 = scalar_lea.hbm %s10825_s21, 4096 }
 0xb2b   : > { %p8082_p2 = scmp.ne.s32.totalorder %s10528_s22, %s8081_s17  ;;  %p8086_p9 = scmp.lt.s32.totalorder %s10528_s22, %s10825_s21 }
 0xb2c   : > { %p8087_p11 = scmp.lt.s32.totalorder %s8085_s5, %s8081_s17 }
 0xb2d   : > { %p8083_p4 = pnand %p8082_p2, %p10827_p0 }
 0xb2e   : > { %p8088_p10 = por %p8087_p11, %p8086_p9 }
 0xb2f   : > { %p8084_p5 = pneg %p8083_p4 }
 0xb31   : > { %p8089_p13 = pnand %p8088_p10, %p8084_p5 }
 0xb33   : > { %8092 = shalt.err (!%p8089_p13)
}
 0xb34   : > { %s8170_s19 = smov 128   ;;  %s8171_s16 = smov 8  }
 0xb35   : > { %7052 = dma.vmem_to_hbm [thread:$0]  (%p10827_p0), %s10530_s15, 2048, %s10528_s22, %s6028_s30, %s8170_s19, %s8170_s19, %s8171_s16  }
 0xb36 PF: > { %s6057_s14 = sand.u32 1, %s8135_s25   ;;  %p10828_p7 = scmp.ne.s32.totalorder %s10687_s13, 0 }
 0xb37   : > { %p10829_p8 = scmp.ge.s32.totalorder %s8147_s28, 2  ;;  %s6058_s6 = scalar_lea.sflag [#allocation4], %s6057_s14 }
 0xb39   : > { %p7081_p1 = pnand %p10829_p8, %p10828_p7 }
 0xb3b   : > { %p7082_p3 = pneg %p7081_p1 }
 0xb3d   : > { %8130 = dma.done.wait (%p7082_p3), %s6058_s6, 2048  }
 0xb3e   : > { %8132 = vsyncadd (%p7082_p3), %s6058_s6, 4294965248  ;;  %p30_p12 = scmp.ge.s32.totalorder %s8351_s18, 4   ;;  %s10830_s25 = smov %s8139_s26 }
 0xb3f   : > { %s10831_s26 = smov %s8143_s27  ;;  %s10832_s27 = smov %s8363_s8 }
 0xb40   : > { %s10833_s28 = smov %s8351_s18  ;;  %32 = sbr.rel (!%p30_p12) target bundleno = 17 (0x11), region = 145 }
 0xb45   :  { %6063 = vsyncpa [#allocation3], 1 }
 0xb46   :  { %6065 = vsyncpa [#allocation3 + $0x1], 1 }
 0xb47   :  { %6066 = vsyncpa [#allocation6], 1 }
 0xb48   :  { %6067 = vsyncpa [#allocation9], 1 }
 0xb49   :  { %6068 = vsyncpa [#allocation12], 1 }
 0xb4a   :  { %6069 = vsyncpa [#allocation15], 1 }
 0xb4b   :  { %6070 = vsyncpa [#allocation4], 1 }
 0xb4c   :  { %6072 = vsyncpa [#allocation4 + $0x1], 1 }

</bundles_post_ra>
